<compile_context>
chip_gen: v7x
topology: tpu7x:2x2x1
jax: 0.10.0
libtpu: 0.0.40
codegen_flags: <defaults>
</compile_context>

<pallas_src>
import functools

import jax
import jax.numpy as jnp
from jax import lax
from jax.experimental import pallas as pl
from jax.experimental.pallas import tpu as pltpu


def _is_pow2(v):
    return v > 0 and (v & (v - 1)) == 0


def _round_up(v, m):
    return ((v + m - 1) // m) * m


def _ratio_decider_kernel(x_ref, wpack_ref, colpack_ref, rowpack_ref, out_ref,
                          *, B, H, W, Cin_p, Hd, Hd2, off1, off2, off3):
    HW = H * W
    N = B * HW

    # ---- 3x3 border-validity masks: built once, pre-broadcast to [Hd, N] ----
    n_idx = lax.broadcasted_iota(jnp.int32, (1, N), 1)
    if _is_pow2(W) and _is_pow2(H):
        w_idx = n_idx & (W - 1)                       # bit ops only on the VPU
        h_idx = (n_idx >> (W.bit_length() - 1)) & (H - 1)
    else:
        w_idx = n_idx % W
        h_idx = (n_idx // W) % H

    def bcast(cond):
        return jnp.broadcast_to(cond.astype(jnp.float32), (Hd, N))

    row_m1 = bcast(h_idx >= 1)          # dy = -1 valid
    row_p1 = bcast(h_idx <= H - 2)      # dy = +1 valid
    col_m1 = bcast(w_idx >= 1)          # dx = -1 valid
    col_p1 = bcast(w_idx <= W - 2)      # dx = +1 valid

    def conv3x3(x, w_off, cout, b):
        # x: [cin, N] lane-dense; weights live at wpack_ref[:cout, w_off + t*cin : ...]
        # Accumulating per-tap matmuls -> no im2col buffer is ever materialized.
        cin = x.shape[0]
        acc = None
        for ky in range(3):
            dy = ky - 1
            if dy == 0:
                y_row = x
            else:
                rm = row_m1 if dy < 0 else row_p1
                y_row = pltpu.roll(x, (-dy * W) % N, axis=1) * rm[:cin]
            for kx in range(3):
                dx = kx - 1
                if dx == 0:
                    tap = y_row
                else:
                    cm = col_m1 if dx < 0 else col_p1
                    tap = pltpu.roll(y_row, (-dx) % N, axis=1) * cm[:cin]
                t = ky * 3 + kx
                w_t = wpack_ref[:cout, w_off + t * cin:w_off + (t + 1) * cin]
                part = jnp.dot(w_t, tap, preferred_element_type=jnp.float32)
                acc = part if acc is None else acc + part
        return acc + b

    b1 = colpack_ref[:Hd, 0:1]           # [Hd, 1]
    b2 = colpack_ref[:Hd, 1:2]           # [Hd, 1]
    b3 = colpack_ref[:Hd2, 2:3]          # [Hd2, 1]
    wmc = colpack_ref[:Hd2, 3:4]         # fc_mean feature weights, [Hd2, 1]

    y = jnp.maximum(conv3x3(x_ref[...], off1, Hd, b1), 0.0)     # [Hd,  N]
    y = jnp.maximum(conv3x3(y, off2, Hd, b2), 0.0)              # [Hd,  N]
    y = conv3x3(y, off3, Hd2, b3)                               # [Hd2, N]

    # ---- vectorized global max-pool + fc_mean epilogue ---------------------
    feat = jnp.concatenate(
        [jnp.max(y[:, b * HW:(b + 1) * HW], axis=1, keepdims=True)
         for b in range(B)], axis=1)                            # [Hd2, B]
    area_row = rowpack_ref[:, 0:B]                              # [1, B]
    wma = rowpack_ref[:, B:B + 1]                               # [1, 1]
    bm = rowpack_ref[:, B + 1:B + 2]                            # [1, 1]
    logstd = rowpack_ref[:, B + 2:B + 3]                        # [1, 1]

    pre = jnp.sum(wmc * feat, axis=0, keepdims=True)            # [1, B]
    pre = pre + area_row * wma + bm
    mean_row = jnp.tanh(pre)
    std_row = jnp.broadcast_to(jnp.exp(logstd), (1, B))
    out_ref[...] = jnp.concatenate([mean_row, std_row], axis=0)  # single store


@jax.jit
def ratio_decider_forward(stacked_mask_nchw, grid_area_next, params):
    """stacked_mask_nchw: [B, Cin, H, W]; grid_area_next: [B] -> (mean[B], std[B])."""
    B, Cin, H, W = stacked_mask_nchw.shape
    Hd = params["w1"].shape[0]           # torch layout [Cout, Cin, 3, 3]
    Hd2 = params["w3"].shape[0]
    N = B * H * W
    Cin_p = _round_up(Cin, 8)            # pad channels to the f32 sublane tile

    # activations: [C, B*H*W] (channels on sublanes, flat spatial lane-dense)
    x_cn = jnp.transpose(stacked_mask_nchw, (1, 0, 2, 3)).reshape(Cin, N)
    x_cn = jnp.pad(x_cn.astype(jnp.float32), ((0, Cin_p - Cin), (0, 0)))

    def pack_w(w_oihw, cin_pad):
        # [Cout, Cin, 3, 3] -> [Cout, 9*cin_pad]; K index = (ky*3+kx)*cin_pad + c
        cout, cin = w_oihw.shape[0], w_oihw.shape[1]
        w = jnp.transpose(w_oihw, (0, 2, 3, 1))                  # [Cout, 3, 3, Cin]
        w = jnp.pad(w, ((0, 0), (0, 0), (0, 0), (0, cin_pad - cin)))
        return w.reshape(cout, 9 * cin_pad).astype(jnp.float32)

    w1p = pack_w(params["w1"], Cin_p)    # [Hd,  9*Cin_p]
    w2p = pack_w(params["w2"], Hd)       # [Hd,  9*Hd]
    w3p = pack_w(params["w3"], Hd)       # [Hd2, 9*Hd]

    # Single weight operand; each conv's section starts on a 128-lane boundary.
    off1 = 0
    off2 = _round_up(9 * Cin_p, 128)
    off3 = off2 + _round_up(9 * Hd, 128)
    wcols = off3 + 9 * Hd
    wpack = jnp.zeros((Hd, wcols), jnp.float32)
    wpack = wpack.at[:, off1:off1 + 9 * Cin_p].set(w1p)
    wpack = wpack.at[:, off2:off2 + 9 * Hd].set(w2p)
    wpack = wpack.at[:Hd2, off3:off3 + 9 * Hd].set(w3p)

    # Small per-channel vectors packed into one [Hd, 4] operand.
    wm = params["wm"].astype(jnp.float32)                        # [1, Hd2 + 1]
    colpack = jnp.zeros((Hd, 4), jnp.float32)
    colpack = colpack.at[:, 0].set(params["b1"].astype(jnp.float32))
    colpack = colpack.at[:, 1].set(params["b2"].astype(jnp.float32))
    colpack = colpack.at[:Hd2, 2].set(params["b3"].astype(jnp.float32))
    colpack = colpack.at[:Hd2, 3].set(wm[0, :Hd2])

    # Scalars + per-image area in one [1, B+3] row: [area..., wm_area, bm, logstd]
    rowpack = jnp.concatenate([
        grid_area_next.astype(jnp.float32).reshape(-1),
        wm[0, Hd2:Hd2 + 1],
        params["bm"].astype(jnp.float32).reshape(-1),
        params["logstd"].astype(jnp.float32).reshape(-1),
    ]).reshape(1, B + 3)

    flops = 2 * N * (Hd * 9 * Cin_p + Hd * 9 * Hd + Hd2 * 9 * Hd) + 4 * Hd2 * B
    bytes_accessed = 4 * (x_cn.size + wpack.size + colpack.size
                          + rowpack.size + 2 * B)

    # NOTE: all operands are tiny (<< 1 MiB), so everything stays resident in
    # VMEM on every TPU generation (incl. v7x's 64 MiB).  If B/H/W ever scale,
    # (a) batch more images per call (biggest lever; per-call fixed cost
    # dominates at this size) and (b) add a "parallel" grid over images so the
    # two v7x TensorCores split the work, setting vmem_limit_bytes explicitly
    # once the per-step working set passes ~16-24 MiB.
    vmem = pl.BlockSpec(memory_space=pltpu.MemorySpace.VMEM)
    out = pl.pallas_call(
        functools.partial(_ratio_decider_kernel, B=B, H=H, W=W,
                          Cin_p=Cin_p, Hd=Hd, Hd2=Hd2,
                          off1=off1, off2=off2, off3=off3),
        out_shape=jax.ShapeDtypeStruct((2, B), jnp.float32),
        in_specs=[vmem] * 4,
        out_specs=vmem,
        cost_estimate=pl.CostEstimate(flops=flops, transcendentals=2 * B + 1,
                                      bytes_accessed=bytes_accessed),
    )(x_cn, wpack, colpack, rowpack)
    return out[0], out[1]


def _reference_forward(stacked_mask_nchw, grid_area_next, params):
    """Pure-JAX reference mirroring the PyTorch module."""
    x = jnp.transpose(stacked_mask_nchw, (0, 2, 3, 1)).astype(jnp.float32)

    def conv(x_nhwc, w_oihw, b):
        w_hwio = jnp.transpose(w_oihw, (2, 3, 1, 0))
        y = lax.conv_general_dilated(
            x_nhwc, w_hwio, window_strides=(1, 1), padding="SAME",
            dimension_numbers=("NHWC", "HWIO", "NHWC"))
        return y + b.reshape(1, 1, 1, -1)

    y = jax.nn.relu(conv(x, params["w1"], params["b1"]))
    y = jax.nn.relu(conv(y, params["w2"], params["b2"]))
    y = conv(y, params["w3"], params["b3"])
    feat = jnp.max(y, axis=(1, 2))                               # [B, Hd2]
    feat = jnp.concatenate([feat, grid_area_next[:, None]], axis=-1)
    mean = jnp.tanh(feat @ params["wm"].T + params["bm"])[:, 0]
    std = jnp.broadcast_to(jnp.exp(params["logstd"]), mean.shape)
    return mean, std


if __name__ == "__main__":
    B, Cin, H, W = 2, 4, 16, 16
    hidden = 32
    Hd2 = hidden // 2

    root = jax.random.PRNGKey(0)
    ks = jax.random.split(root, 12)
    params = {
        "w1": jax.random.normal(ks[0], (hidden, Cin, 3, 3), jnp.float32) * 0.1,
        "b1": jax.random.normal(ks[1], (hidden,), jnp.float32) * 0.1,
        "w2": jax.random.normal(ks[2], (hidden, hidden, 3, 3), jnp.float32) * 0.05,
        "b2": jax.random.normal(ks[3], (hidden,), jnp.float32) * 0.1,
        "w3": jax.random.normal(ks[4], (Hd2, hidden, 3, 3), jnp.float32) * 0.05,
        "b3": jax.random.normal(ks[5], (Hd2,), jnp.float32) * 0.1,
        "wm": jax.random.normal(ks[6], (1, Hd2 + 1), jnp.float32) * 0.2,
        "bm": jax.random.normal(ks[7], (1,), jnp.float32) * 0.1,
        "logstd": jnp.zeros((1,), jnp.float32),   # nn.Parameter(torch.zeros(1))
    }

    # Deterministic example inputs.
    output_of_shared_encoder = jax.random.normal(ks[8], (B, hidden), jnp.float32)  # unused (share_with_critics=False)
    stacked_mask = jax.random.normal(ks[9], (B, Cin, H, W), jnp.float32)
    grid_area_next = jax.random.uniform(ks[10], (B,), jnp.float32)

    mean, std = ratio_decider_forward(stacked_mask, grid_area_next, params)
    mean, std = jax.block_until_ready((mean, std))

    ref_mean, ref_std = _reference_forward(stacked_mask, grid_area_next, params)
    assert mean.shape == (B,) and std.shape == (B,)
    assert jnp.allclose(mean, ref_mean, rtol=1e-4, atol=2e-4), (mean, ref_mean)
    assert jnp.allclose(std, ref_std, rtol=1e-4, atol=2e-4), (std, ref_std)

    print("KERNEL_OK")
</pallas_src>

<mosaic_0001>
module attributes {stable_mosaic.version = 11 : i64} {
  func.func @_ratio_decider_kernel(%arg0: memref<8x512xf32, #tpu.memory_space<vmem>>, %arg1: memref<32x800xf32, #tpu.memory_space<vmem>>, %arg2: memref<32x4xf32, #tpu.memory_space<vmem>>, %arg3: memref<1x5xf32, #tpu.memory_space<vmem>>, %arg4: memref<2x2xf32, #tpu.memory_space<vmem>>) attributes {dimension_semantics = [], scalar_prefetch = 0 : i64, scratch_operands = 0 : i64, tpu.core_type = #tpu.core_type<tc>} {
    %0 = tpu.iota {dimensions = array<i32: 1>} : vector<1x512xi32>
    %c15_i32 = arith.constant 15 : i32
    %1 = vector.broadcast %c15_i32 : i32 to vector<1x512xi32>
    %2 = arith.andi %0, %1 : vector<1x512xi32>
    %c4_i32 = arith.constant 4 : i32
    %3 = vector.broadcast %c4_i32 : i32 to vector<1x512xi32>
    %4 = arith.shrsi %0, %3 : vector<1x512xi32>
    %c15_i32_0 = arith.constant 15 : i32
    %5 = vector.broadcast %c15_i32_0 : i32 to vector<1x512xi32>
    %6 = arith.andi %4, %5 : vector<1x512xi32>
    %c1_i32 = arith.constant 1 : i32
    %7 = vector.broadcast %c1_i32 : i32 to vector<1x512xi32>
    %8 = arith.cmpi sge, %6, %7 : vector<1x512xi32>
    %9 = arith.extui %8 : vector<1x512xi1> to vector<1x512xi32>
    %10 = arith.sitofp %9 : vector<1x512xi32> to vector<1x512xf32>
    %11 = vector.shape_cast %10 : vector<1x512xf32> to vector<1x512xf32>
    %12 = vector.broadcast %11 : vector<1x512xf32> to vector<32x512xf32>
    %c14_i32 = arith.constant 14 : i32
    %13 = vector.broadcast %c14_i32 : i32 to vector<1x512xi32>
    %14 = arith.cmpi sle, %6, %13 : vector<1x512xi32>
    %15 = arith.extui %14 : vector<1x512xi1> to vector<1x512xi32>
    %16 = arith.sitofp %15 : vector<1x512xi32> to vector<1x512xf32>
    %17 = vector.shape_cast %16 : vector<1x512xf32> to vector<1x512xf32>
    %18 = vector.broadcast %17 : vector<1x512xf32> to vector<32x512xf32>
    %c1_i32_1 = arith.constant 1 : i32
    %19 = vector.broadcast %c1_i32_1 : i32 to vector<1x512xi32>
    %20 = arith.cmpi sge, %2, %19 : vector<1x512xi32>
    %21 = arith.extui %20 : vector<1x512xi1> to vector<1x512xi32>
    %22 = arith.sitofp %21 : vector<1x512xi32> to vector<1x512xf32>
    %23 = vector.shape_cast %22 : vector<1x512xf32> to vector<1x512xf32>
    %24 = vector.broadcast %23 : vector<1x512xf32> to vector<32x512xf32>
    %c14_i32_2 = arith.constant 14 : i32
    %25 = vector.broadcast %c14_i32_2 : i32 to vector<1x512xi32>
    %26 = arith.cmpi sle, %2, %25 : vector<1x512xi32>
    %27 = arith.extui %26 : vector<1x512xi1> to vector<1x512xi32>
    %28 = arith.sitofp %27 : vector<1x512xi32> to vector<1x512xf32>
    %29 = vector.shape_cast %28 : vector<1x512xf32> to vector<1x512xf32>
    %30 = vector.broadcast %29 : vector<1x512xf32> to vector<32x512xf32>
    %c0 = arith.constant 0 : index
    %c0_3 = arith.constant 0 : index
    %31 = vector.load %arg2[%c0, %c0_3] : memref<32x4xf32, #tpu.memory_space<vmem>>, vector<32x1xf32>
    %c0_4 = arith.constant 0 : index
    %c1 = arith.constant 1 : index
    %32 = vector.load %arg2[%c0_4, %c1] : memref<32x4xf32, #tpu.memory_space<vmem>>, vector<32x1xf32>
    %c0_5 = arith.constant 0 : index
    %c2 = arith.constant 2 : index
    %33 = vector.load %arg2[%c0_5, %c2] : memref<32x4xf32, #tpu.memory_space<vmem>>, vector<16x1xf32>
    %c0_6 = arith.constant 0 : index
    %c3 = arith.constant 3 : index
    %34 = vector.load %arg2[%c0_6, %c3] : memref<32x4xf32, #tpu.memory_space<vmem>>, vector<16x1xf32>
    %c0_7 = arith.constant 0 : index
    %c0_8 = arith.constant 0 : index
    %35 = vector.load %arg0[%c0_7, %c0_8] : memref<8x512xf32, #tpu.memory_space<vmem>>, vector<8x512xf32>
    %c16_i32 = arith.constant 16 : i32
    %36 = tpu.dynamic_rotate %35 by %c16_i32 dim 1 : vector<8x512xf32>, i32 -> vector<8x512xf32>
    %37 = vector.extract_strided_slice %12 {offsets = [0, 0], sizes = [8, 512], strides = [1, 1]} : vector<32x512xf32> to vector<8x512xf32>
    %38 = arith.mulf %36, %37 : vector<8x512xf32>
    %c1_i32_9 = arith.constant 1 : i32
    %39 = tpu.dynamic_rotate %38 by %c1_i32_9 dim 1 : vector<8x512xf32>, i32 -> vector<8x512xf32>
    %40 = vector.extract_strided_slice %24 {offsets = [0, 0], sizes = [8, 512], strides = [1, 1]} : vector<32x512xf32> to vector<8x512xf32>
    %41 = arith.mulf %39, %40 : vector<8x512xf32>
    %c0_10 = arith.constant 0 : index
    %c0_11 = arith.constant 0 : index
    %42 = vector.load %arg1[%c0_10, %c0_11] : memref<32x800xf32, #tpu.memory_space<vmem>>, vector<32x8xf32>
    %cst = arith.constant dense<0.000000e+00> : vector<32x512xf32>
    %43 = tpu.matmul %42, %41, %cst {dimension_numbers = #tpu.dot_dimension_numbers<[1], [0], [0], [1], [0, 0, 1, 1], [], []>} : vector<32x8xf32>, vector<8x512xf32>, vector<32x512xf32> -> vector<32x512xf32>
    %c0_12 = arith.constant 0 : index
    %c8 = arith.constant 8 : index
    %44 = vector.load %arg1[%c0_12, %c8] : memref<32x800xf32, #tpu.memory_space<vmem>>, vector<32x8xf32>
    %cst_13 = arith.constant dense<0.000000e+00> : vector<32x512xf32>
    %45 = tpu.matmul %44, %38, %cst_13 {dimension_numbers = #tpu.dot_dimension_numbers<[1], [0], [0], [1], [0, 0, 1, 1], [], []>} : vector<32x8xf32>, vector<8x512xf32>, vector<32x512xf32> -> vector<32x512xf32>
    %46 = arith.addf %43, %45 : vector<32x512xf32>
    %c511_i32 = arith.constant 511 : i32
    %47 = tpu.dynamic_rotate %38 by %c511_i32 dim 1 : vector<8x512xf32>, i32 -> vector<8x512xf32>
    %48 = vector.extract_strided_slice %30 {offsets = [0, 0], sizes = [8, 512], strides = [1, 1]} : vector<32x512xf32> to vector<8x512xf32>
    %49 = arith.mulf %47, %48 : vector<8x512xf32>
    %c0_14 = arith.constant 0 : index
    %c16 = arith.constant 16 : index
    %50 = vector.load %arg1[%c0_14, %c16] : memref<32x800xf32, #tpu.memory_space<vmem>>, vector<32x8xf32>
    %cst_15 = arith.constant dense<0.000000e+00> : vector<32x512xf32>
    %51 = tpu.matmul %50, %49, %cst_15 {dimension_numbers = #tpu.dot_dimension_numbers<[1], [0], [0], [1], [0, 0, 1, 1], [], []>} : vector<32x8xf32>, vector<8x512xf32>, vector<32x512xf32> -> vector<32x512xf32>
    %52 = arith.addf %46, %51 : vector<32x512xf32>
    %c1_i32_16 = arith.constant 1 : i32
    %53 = tpu.dynamic_rotate %35 by %c1_i32_16 dim 1 : vector<8x512xf32>, i32 -> vector<8x512xf32>
    %54 = vector.extract_strided_slice %24 {offsets = [0, 0], sizes = [8, 512], strides = [1, 1]} : vector<32x512xf32> to vector<8x512xf32>
    %55 = arith.mulf %53, %54 : vector<8x512xf32>
    %c0_17 = arith.constant 0 : index
    %c24 = arith.constant 24 : index
    %56 = vector.load %arg1[%c0_17, %c24] : memref<32x800xf32, #tpu.memory_space<vmem>>, vector<32x8xf32>
    %cst_18 = arith.constant dense<0.000000e+00> : vector<32x512xf32>
    %57 = tpu.matmul %56, %55, %cst_18 {dimension_numbers = #tpu.dot_dimension_numbers<[1], [0], [0], [1], [0, 0, 1, 1], [], []>} : vector<32x8xf32>, vector<8x512xf32>, vector<32x512xf32> -> vector<32x512xf32>
    %58 = arith.addf %52, %57 : vector<32x512xf32>
    %c0_19 = arith.constant 0 : index
    %c32 = arith.constant 32 : index
    %59 = vector.load %arg1[%c0_19, %c32] : memref<32x800xf32, #tpu.memory_space<vmem>>, vector<32x8xf32>
    %cst_20 = arith.constant dense<0.000000e+00> : vector<32x512xf32>
    %60 = tpu.matmul %59, %35, %cst_20 {dimension_numbers = #tpu.dot_dimension_numbers<[1], [0], [0], [1], [0, 0, 1, 1], [], []>} : vector<32x8xf32>, vector<8x512xf32>, vector<32x512xf32> -> vector<32x512xf32>
    %61 = arith.addf %58, %60 : vector<32x512xf32>
    %c511_i32_21 = arith.constant 511 : i32
    %62 = tpu.dynamic_rotate %35 by %c511_i32_21 dim 1 : vector<8x512xf32>, i32 -> vector<8x512xf32>
    %63 = vector.extract_strided_slice %30 {offsets = [0, 0], sizes = [8, 512], strides = [1, 1]} : vector<32x512xf32> to vector<8x512xf32>
    %64 = arith.mulf %62, %63 : vector<8x512xf32>
    %c0_22 = arith.constant 0 : index
    %c40 = arith.constant 40 : index
    %65 = vector.load %arg1[%c0_22, %c40] : memref<32x800xf32, #tpu.memory_space<vmem>>, vector<32x8xf32>
    %cst_23 = arith.constant dense<0.000000e+00> : vector<32x512xf32>
    %66 = tpu.matmul %65, %64, %cst_23 {dimension_numbers = #tpu.dot_dimension_numbers<[1], [0], [0], [1], [0, 0, 1, 1], [], []>} : vector<32x8xf32>, vector<8x512xf32>, vector<32x512xf32> -> vector<32x512xf32>
    %67 = arith.addf %61, %66 : vector<32x512xf32>
    %c496_i32 = arith.constant 496 : i32
    %68 = tpu.dynamic_rotate %35 by %c496_i32 dim 1 : vector<8x512xf32>, i32 -> vector<8x512xf32>
    %69 = vector.extract_strided_slice %18 {offsets = [0, 0], sizes = [8, 512], strides = [1, 1]} : vector<32x512xf32> to vector<8x512xf32>
    %70 = arith.mulf %68, %69 : vector<8x512xf32>
    %c1_i32_24 = arith.constant 1 : i32
    %71 = tpu.dynamic_rotate %70 by %c1_i32_24 dim 1 : vector<8x512xf32>, i32 -> vector<8x512xf32>
    %72 = vector.extract_strided_slice %24 {offsets = [0, 0], sizes = [8, 512], strides = [1, 1]} : vector<32x512xf32> to vector<8x512xf32>
    %73 = arith.mulf %71, %72 : vector<8x512xf32>
    %c0_25 = arith.constant 0 : index
    %c48 = arith.constant 48 : index
    %74 = vector.load %arg1[%c0_25, %c48] : memref<32x800xf32, #tpu.memory_space<vmem>>, vector<32x8xf32>
    %cst_26 = arith.constant dense<0.000000e+00> : vector<32x512xf32>
    %75 = tpu.matmul %74, %73, %cst_26 {dimension_numbers = #tpu.dot_dimension_numbers<[1], [0], [0], [1], [0, 0, 1, 1], [], []>} : vector<32x8xf32>, vector<8x512xf32>, vector<32x512xf32> -> vector<32x512xf32>
    %76 = arith.addf %67, %75 : vector<32x512xf32>
    %c0_27 = arith.constant 0 : index
    %c56 = arith.constant 56 : index
    %77 = vector.load %arg1[%c0_27, %c56] : memref<32x800xf32, #tpu.memory_space<vmem>>, vector<32x8xf32>
    %cst_28 = arith.constant dense<0.000000e+00> : vector<32x512xf32>
    %78 = tpu.matmul %77, %70, %cst_28 {dimension_numbers = #tpu.dot_dimension_numbers<[1], [0], [0], [1], [0, 0, 1, 1], [], []>} : vector<32x8xf32>, vector<8x512xf32>, vector<32x512xf32> -> vector<32x512xf32>
    %79 = arith.addf %76, %78 : vector<32x512xf32>
    %c511_i32_29 = arith.constant 511 : i32
    %80 = tpu.dynamic_rotate %70 by %c511_i32_29 dim 1 : vector<8x512xf32>, i32 -> vector<8x512xf32>
    %81 = vector.extract_strided_slice %30 {offsets = [0, 0], sizes = [8, 512], strides = [1, 1]} : vector<32x512xf32> to vector<8x512xf32>
    %82 = arith.mulf %80, %81 : vector<8x512xf32>
    %c0_30 = arith.constant 0 : index
    %c64 = arith.constant 64 : index
    %83 = vector.load %arg1[%c0_30, %c64] : memref<32x800xf32, #tpu.memory_space<vmem>>, vector<32x8xf32>
    %cst_31 = arith.constant dense<0.000000e+00> : vector<32x512xf32>
    %84 = tpu.matmul %83, %82, %cst_31 {dimension_numbers = #tpu.dot_dimension_numbers<[1], [0], [0], [1], [0, 0, 1, 1], [], []>} : vector<32x8xf32>, vector<8x512xf32>, vector<32x512xf32> -> vector<32x512xf32>
    %85 = arith.addf %79, %84 : vector<32x512xf32>
    %86 = vector.broadcast %31 : vector<32x1xf32> to vector<32x512xf32>
    %87 = arith.addf %85, %86 : vector<32x512xf32>
    %cst_32 = arith.constant 0.000000e+00 : f32
    %88 = vector.broadcast %cst_32 : f32 to vector<32x512xf32>
    %89 = arith.maximumf %87, %88 : vector<32x512xf32>
    %c16_i32_33 = arith.constant 16 : i32
    %90 = tpu.dynamic_rotate %89 by %c16_i32_33 dim 1 : vector<32x512xf32>, i32 -> vector<32x512xf32>
    %91 = arith.mulf %90, %12 : vector<32x512xf32>
    %c1_i32_34 = arith.constant 1 : i32
    %92 = tpu.dynamic_rotate %91 by %c1_i32_34 dim 1 : vector<32x512xf32>, i32 -> vector<32x512xf32>
    %93 = arith.mulf %92, %24 : vector<32x512xf32>
    %c0_35 = arith.constant 0 : index
    %c128 = arith.constant 128 : index
    %94 = vector.load %arg1[%c0_35, %c128] : memref<32x800xf32, #tpu.memory_space<vmem>>, vector<32x32xf32>
    %cst_36 = arith.constant dense<0.000000e+00> : vector<32x512xf32>
    %95 = tpu.matmul %94, %93, %cst_36 {dimension_numbers = #tpu.dot_dimension_numbers<[1], [0], [0], [1], [0, 0, 1, 1], [], []>} : vector<32x32xf32>, vector<32x512xf32>, vector<32x512xf32> -> vector<32x512xf32>
    %c0_37 = arith.constant 0 : index
    %c160 = arith.constant 160 : index
    %96 = vector.load %arg1[%c0_37, %c160] : memref<32x800xf32, #tpu.memory_space<vmem>>, vector<32x32xf32>
    %cst_38 = arith.constant dense<0.000000e+00> : vector<32x512xf32>
    %97 = tpu.matmul %96, %91, %cst_38 {dimension_numbers = #tpu.dot_dimension_numbers<[1], [0], [0], [1], [0, 0, 1, 1], [], []>} : vector<32x32xf32>, vector<32x512xf32>, vector<32x512xf32> -> vector<32x512xf32>
    %98 = arith.addf %95, %97 : vector<32x512xf32>
    %c511_i32_39 = arith.constant 511 : i32
    %99 = tpu.dynamic_rotate %91 by %c511_i32_39 dim 1 : vector<32x512xf32>, i32 -> vector<32x512xf32>
    %100 = arith.mulf %99, %30 : vector<32x512xf32>
    %c0_40 = arith.constant 0 : index
    %c192 = arith.constant 192 : index
    %101 = vector.load %arg1[%c0_40, %c192] : memref<32x800xf32, #tpu.memory_space<vmem>>, vector<32x32xf32>
    %cst_41 = arith.constant dense<0.000000e+00> : vector<32x512xf32>
    %102 = tpu.matmul %101, %100, %cst_41 {dimension_numbers = #tpu.dot_dimension_numbers<[1], [0], [0], [1], [0, 0, 1, 1], [], []>} : vector<32x32xf32>, vector<32x512xf32>, vector<32x512xf32> -> vector<32x512xf32>
    %103 = arith.addf %98, %102 : vector<32x512xf32>
    %c1_i32_42 = arith.constant 1 : i32
    %104 = tpu.dynamic_rotate %89 by %c1_i32_42 dim 1 : vector<32x512xf32>, i32 -> vector<32x512xf32>
    %105 = arith.mulf %104, %24 : vector<32x512xf32>
    %c0_43 = arith.constant 0 : index
    %c224 = arith.constant 224 : index
    %106 = vector.load %arg1[%c0_43, %c224] : memref<32x800xf32, #tpu.memory_space<vmem>>, vector<32x32xf32>
    %cst_44 = arith.constant dense<0.000000e+00> : vector<32x512xf32>
    %107 = tpu.matmul %106, %105, %cst_44 {dimension_numbers = #tpu.dot_dimension_numbers<[1], [0], [0], [1], [0, 0, 1, 1], [], []>} : vector<32x32xf32>, vector<32x512xf32>, vector<32x512xf32> -> vector<32x512xf32>
    %108 = arith.addf %103, %107 : vector<32x512xf32>
    %c0_45 = arith.constant 0 : index
    %c256 = arith.constant 256 : index
    %109 = vector.load %arg1[%c0_45, %c256] : memref<32x800xf32, #tpu.memory_space<vmem>>, vector<32x32xf32>
    %cst_46 = arith.constant dense<0.000000e+00> : vector<32x512xf32>
    %110 = tpu.matmul %109, %89, %cst_46 {dimension_numbers = #tpu.dot_dimension_numbers<[1], [0], [0], [1], [0, 0, 1, 1], [], []>} : vector<32x32xf32>, vector<32x512xf32>, vector<32x512xf32> -> vector<32x512xf32>
    %111 = arith.addf %108, %110 : vector<32x512xf32>
    %c511_i32_47 = arith.constant 511 : i32
    %112 = tpu.dynamic_rotate %89 by %c511_i32_47 dim 1 : vector<32x512xf32>, i32 -> vector<32x512xf32>
    %113 = arith.mulf %112, %30 : vector<32x512xf32>
    %c0_48 = arith.constant 0 : index
    %c288 = arith.constant 288 : index
    %114 = vector.load %arg1[%c0_48, %c288] : memref<32x800xf32, #tpu.memory_space<vmem>>, vector<32x32xf32>
    %cst_49 = arith.constant dense<0.000000e+00> : vector<32x512xf32>
    %115 = tpu.matmul %114, %113, %cst_49 {dimension_numbers = #tpu.dot_dimension_numbers<[1], [0], [0], [1], [0, 0, 1, 1], [], []>} : vector<32x32xf32>, vector<32x512xf32>, vector<32x512xf32> -> vector<32x512xf32>
    %116 = arith.addf %111, %115 : vector<32x512xf32>
    %c496_i32_50 = arith.constant 496 : i32
    %117 = tpu.dynamic_rotate %89 by %c496_i32_50 dim 1 : vector<32x512xf32>, i32 -> vector<32x512xf32>
    %118 = arith.mulf %117, %18 : vector<32x512xf32>
    %c1_i32_51 = arith.constant 1 : i32
    %119 = tpu.dynamic_rotate %118 by %c1_i32_51 dim 1 : vector<32x512xf32>, i32 -> vector<32x512xf32>
    %120 = arith.mulf %119, %24 : vector<32x512xf32>
    %c0_52 = arith.constant 0 : index
    %c320 = arith.constant 320 : index
    %121 = vector.load %arg1[%c0_52, %c320] : memref<32x800xf32, #tpu.memory_space<vmem>>, vector<32x32xf32>
    %cst_53 = arith.constant dense<0.000000e+00> : vector<32x512xf32>
    %122 = tpu.matmul %121, %120, %cst_53 {dimension_numbers = #tpu.dot_dimension_numbers<[1], [0], [0], [1], [0, 0, 1, 1], [], []>} : vector<32x32xf32>, vector<32x512xf32>, vector<32x512xf32> -> vector<32x512xf32>
    %123 = arith.addf %116, %122 : vector<32x512xf32>
    %c0_54 = arith.constant 0 : index
    %c352 = arith.constant 352 : index
    %124 = vector.load %arg1[%c0_54, %c352] : memref<32x800xf32, #tpu.memory_space<vmem>>, vector<32x32xf32>
    %cst_55 = arith.constant dense<0.000000e+00> : vector<32x512xf32>
    %125 = tpu.matmul %124, %118, %cst_55 {dimension_numbers = #tpu.dot_dimension_numbers<[1], [0], [0], [1], [0, 0, 1, 1], [], []>} : vector<32x32xf32>, vector<32x512xf32>, vector<32x512xf32> -> vector<32x512xf32>
    %126 = arith.addf %123, %125 : vector<32x512xf32>
    %c511_i32_56 = arith.constant 511 : i32
    %127 = tpu.dynamic_rotate %118 by %c511_i32_56 dim 1 : vector<32x512xf32>, i32 -> vector<32x512xf32>
    %128 = arith.mulf %127, %30 : vector<32x512xf32>
    %c0_57 = arith.constant 0 : index
    %c384 = arith.constant 384 : index
    %129 = vector.load %arg1[%c0_57, %c384] : memref<32x800xf32, #tpu.memory_space<vmem>>, vector<32x32xf32>
    %cst_58 = arith.constant dense<0.000000e+00> : vector<32x512xf32>
    %130 = tpu.matmul %129, %128, %cst_58 {dimension_numbers = #tpu.dot_dimension_numbers<[1], [0], [0], [1], [0, 0, 1, 1], [], []>} : vector<32x32xf32>, vector<32x512xf32>, vector<32x512xf32> -> vector<32x512xf32>
    %131 = arith.addf %126, %130 : vector<32x512xf32>
    %132 = vector.broadcast %32 : vector<32x1xf32> to vector<32x512xf32>
    %133 = arith.addf %131, %132 : vector<32x512xf32>
    %cst_59 = arith.constant 0.000000e+00 : f32
    %134 = vector.broadcast %cst_59 : f32 to vector<32x512xf32>
    %135 = arith.maximumf %133, %134 : vector<32x512xf32>
    %c16_i32_60 = arith.constant 16 : i32
    %136 = tpu.dynamic_rotate %135 by %c16_i32_60 dim 1 : vector<32x512xf32>, i32 -> vector<32x512xf32>
    %137 = arith.mulf %136, %12 : vector<32x512xf32>
    %c1_i32_61 = arith.constant 1 : i32
    %138 = tpu.dynamic_rotate %137 by %c1_i32_61 dim 1 : vector<32x512xf32>, i32 -> vector<32x512xf32>
    %139 = arith.mulf %138, %24 : vector<32x512xf32>
    %c0_62 = arith.constant 0 : index
    %c512 = arith.constant 512 : index
    %140 = vector.load %arg1[%c0_62, %c512] : memref<32x800xf32, #tpu.memory_space<vmem>>, vector<16x32xf32>
    %cst_63 = arith.constant dense<0.000000e+00> : vector<16x512xf32>
    %141 = tpu.matmul %140, %139, %cst_63 {dimension_numbers = #tpu.dot_dimension_numbers<[1], [0], [0], [1], [0, 0, 1, 1], [], []>} : vector<16x32xf32>, vector<32x512xf32>, vector<16x512xf32> -> vector<16x512xf32>
    %c0_64 = arith.constant 0 : index
    %c544 = arith.constant 544 : index
    %142 = vector.load %arg1[%c0_64, %c544] : memref<32x800xf32, #tpu.memory_space<vmem>>, vector<16x32xf32>
    %cst_65 = arith.constant dense<0.000000e+00> : vector<16x512xf32>
    %143 = tpu.matmul %142, %137, %cst_65 {dimension_numbers = #tpu.dot_dimension_numbers<[1], [0], [0], [1], [0, 0, 1, 1], [], []>} : vector<16x32xf32>, vector<32x512xf32>, vector<16x512xf32> -> vector<16x512xf32>
    %144 = arith.addf %141, %143 : vector<16x512xf32>
    %c511_i32_66 = arith.constant 511 : i32
    %145 = tpu.dynamic_rotate %137 by %c511_i32_66 dim 1 : vector<32x512xf32>, i32 -> vector<32x512xf32>
    %146 = arith.mulf %145, %30 : vector<32x512xf32>
    %c0_67 = arith.constant 0 : index
    %c576 = arith.constant 576 : index
    %147 = vector.load %arg1[%c0_67, %c576] : memref<32x800xf32, #tpu.memory_space<vmem>>, vector<16x32xf32>
    %cst_68 = arith.constant dense<0.000000e+00> : vector<16x512xf32>
    %148 = tpu.matmul %147, %146, %cst_68 {dimension_numbers = #tpu.dot_dimension_numbers<[1], [0], [0], [1], [0, 0, 1, 1], [], []>} : vector<16x32xf32>, vector<32x512xf32>, vector<16x512xf32> -> vector<16x512xf32>
    %149 = arith.addf %144, %148 : vector<16x512xf32>
    %c1_i32_69 = arith.constant 1 : i32
    %150 = tpu.dynamic_rotate %135 by %c1_i32_69 dim 1 : vector<32x512xf32>, i32 -> vector<32x512xf32>
    %151 = arith.mulf %150, %24 : vector<32x512xf32>
    %c0_70 = arith.constant 0 : index
    %c608 = arith.constant 608 : index
    %152 = vector.load %arg1[%c0_70, %c608] : memref<32x800xf32, #tpu.memory_space<vmem>>, vector<16x32xf32>
    %cst_71 = arith.constant dense<0.000000e+00> : vector<16x512xf32>
    %153 = tpu.matmul %152, %151, %cst_71 {dimension_numbers = #tpu.dot_dimension_numbers<[1], [0], [0], [1], [0, 0, 1, 1], [], []>} : vector<16x32xf32>, vector<32x512xf32>, vector<16x512xf32> -> vector<16x512xf32>
    %154 = arith.addf %149, %153 : vector<16x512xf32>
    %c0_72 = arith.constant 0 : index
    %c640 = arith.constant 640 : index
    %155 = vector.load %arg1[%c0_72, %c640] : memref<32x800xf32, #tpu.memory_space<vmem>>, vector<16x32xf32>
    %cst_73 = arith.constant dense<0.000000e+00> : vector<16x512xf32>
    %156 = tpu.matmul %155, %135, %cst_73 {dimension_numbers = #tpu.dot_dimension_numbers<[1], [0], [0], [1], [0, 0, 1, 1], [], []>} : vector<16x32xf32>, vector<32x512xf32>, vector<16x512xf32> -> vector<16x512xf32>
    %157 = arith.addf %154, %156 : vector<16x512xf32>
    %c511_i32_74 = arith.constant 511 : i32
    %158 = tpu.dynamic_rotate %135 by %c511_i32_74 dim 1 : vector<32x512xf32>, i32 -> vector<32x512xf32>
    %159 = arith.mulf %158, %30 : vector<32x512xf32>
    %c0_75 = arith.constant 0 : index
    %c672 = arith.constant 672 : index
    %160 = vector.load %arg1[%c0_75, %c672] : memref<32x800xf32, #tpu.memory_space<vmem>>, vector<16x32xf32>
    %cst_76 = arith.constant dense<0.000000e+00> : vector<16x512xf32>
    %161 = tpu.matmul %160, %159, %cst_76 {dimension_numbers = #tpu.dot_dimension_numbers<[1], [0], [0], [1], [0, 0, 1, 1], [], []>} : vector<16x32xf32>, vector<32x512xf32>, vector<16x512xf32> -> vector<16x512xf32>
    %162 = arith.addf %157, %161 : vector<16x512xf32>
    %c496_i32_77 = arith.constant 496 : i32
    %163 = tpu.dynamic_rotate %135 by %c496_i32_77 dim 1 : vector<32x512xf32>, i32 -> vector<32x512xf32>
    %164 = arith.mulf %163, %18 : vector<32x512xf32>
    %c1_i32_78 = arith.constant 1 : i32
    %165 = tpu.dynamic_rotate %164 by %c1_i32_78 dim 1 : vector<32x512xf32>, i32 -> vector<32x512xf32>
    %166 = arith.mulf %165, %24 : vector<32x512xf32>
    %c0_79 = arith.constant 0 : index
    %c704 = arith.constant 704 : index
    %167 = vector.load %arg1[%c0_79, %c704] : memref<32x800xf32, #tpu.memory_space<vmem>>, vector<16x32xf32>
    %cst_80 = arith.constant dense<0.000000e+00> : vector<16x512xf32>
    %168 = tpu.matmul %167, %166, %cst_80 {dimension_numbers = #tpu.dot_dimension_numbers<[1], [0], [0], [1], [0, 0, 1, 1], [], []>} : vector<16x32xf32>, vector<32x512xf32>, vector<16x512xf32> -> vector<16x512xf32>
    %169 = arith.addf %162, %168 : vector<16x512xf32>
    %c0_81 = arith.constant 0 : index
    %c736 = arith.constant 736 : index
    %170 = vector.load %arg1[%c0_81, %c736] : memref<32x800xf32, #tpu.memory_space<vmem>>, vector<16x32xf32>
    %cst_82 = arith.constant dense<0.000000e+00> : vector<16x512xf32>
    %171 = tpu.matmul %170, %164, %cst_82 {dimension_numbers = #tpu.dot_dimension_numbers<[1], [0], [0], [1], [0, 0, 1, 1], [], []>} : vector<16x32xf32>, vector<32x512xf32>, vector<16x512xf32> -> vector<16x512xf32>
    %172 = arith.addf %169, %171 : vector<16x512xf32>
    %c511_i32_83 = arith.constant 511 : i32
    %173 = tpu.dynamic_rotate %164 by %c511_i32_83 dim 1 : vector<32x512xf32>, i32 -> vector<32x512xf32>
    %174 = arith.mulf %173, %30 : vector<32x512xf32>
    %c0_84 = arith.constant 0 : index
    %c768 = arith.constant 768 : index
    %175 = vector.load %arg1[%c0_84, %c768] : memref<32x800xf32, #tpu.memory_space<vmem>>, vector<16x32xf32>
    %cst_85 = arith.constant dense<0.000000e+00> : vector<16x512xf32>
    %176 = tpu.matmul %175, %174, %cst_85 {dimension_numbers = #tpu.dot_dimension_numbers<[1], [0], [0], [1], [0, 0, 1, 1], [], []>} : vector<16x32xf32>, vector<32x512xf32>, vector<16x512xf32> -> vector<16x512xf32>
    %177 = arith.addf %172, %176 : vector<16x512xf32>
    %178 = vector.broadcast %33 : vector<16x1xf32> to vector<16x512xf32>
    %179 = arith.addf %177, %178 : vector<16x512xf32>
    %180 = vector.extract_strided_slice %179 {offsets = [0, 0], sizes = [16, 256], strides = [1, 1]} : vector<16x512xf32> to vector<16x256xf32>
    %cst_86 = arith.constant dense<0xFF800000> : vector<16xf32>
    %181 = vector.multi_reduction <maximumf>, %180, %cst_86 [1] : vector<16x256xf32> to vector<16xf32>
    %182 = vector.shape_cast %181 : vector<16xf32> to vector<16x1xf32>
    %183 = vector.extract_strided_slice %179 {offsets = [0, 256], sizes = [16, 256], strides = [1, 1]} : vector<16x512xf32> to vector<16x256xf32>
    %cst_87 = arith.constant dense<0xFF800000> : vector<16xf32>
    %184 = vector.multi_reduction <maximumf>, %183, %cst_87 [1] : vector<16x256xf32> to vector<16xf32>
    %185 = vector.shape_cast %184 : vector<16xf32> to vector<16x1xf32>
    %186 = tpu.concatenate %182, %185 in 1 : vector<16x1xf32>, vector<16x1xf32> -> vector<16x2xf32>
    %c0_88 = arith.constant 0 : index
    %c0_89 = arith.constant 0 : index
    %187 = vector.load %arg3[%c0_88, %c0_89] : memref<1x5xf32, #tpu.memory_space<vmem>>, vector<1x2xf32>
    %c0_90 = arith.constant 0 : index
    %c2_91 = arith.constant 2 : index
    %188 = vector.load %arg3[%c0_90, %c2_91] : memref<1x5xf32, #tpu.memory_space<vmem>>, vector<1x1xf32>
    %c0_92 = arith.constant 0 : index
    %c3_93 = arith.constant 3 : index
    %189 = vector.load %arg3[%c0_92, %c3_93] : memref<1x5xf32, #tpu.memory_space<vmem>>, vector<1x1xf32>
    %c0_94 = arith.constant 0 : index
    %c4 = arith.constant 4 : index
    %190 = vector.load %arg3[%c0_94, %c4] : memref<1x5xf32, #tpu.memory_space<vmem>>, vector<1x1xf32>
    %191 = vector.broadcast %34 : vector<16x1xf32> to vector<16x2xf32>
    %192 = arith.mulf %191, %186 : vector<16x2xf32>
    %cst_95 = arith.constant dense<0.000000e+00> : vector<2xf32>
    %193 = vector.multi_reduction <add>, %192, %cst_95 [0] : vector<16x2xf32> to vector<2xf32>
    %194 = vector.shape_cast %193 : vector<2xf32> to vector<1x2xf32>
    %195 = vector.broadcast %188 : vector<1x1xf32> to vector<1x2xf32>
    %196 = arith.mulf %187, %195 : vector<1x2xf32>
    %197 = arith.addf %194, %196 : vector<1x2xf32>
    %198 = vector.broadcast %189 : vector<1x1xf32> to vector<1x2xf32>
    %199 = arith.addf %197, %198 : vector<1x2xf32>
    %200 = math.tanh %199 : vector<1x2xf32>
    %201 = math.exp %190 : vector<1x1xf32>
    %202 = vector.shape_cast %201 : vector<1x1xf32> to vector<1x1xf32>
    %203 = vector.broadcast %202 : vector<1x1xf32> to vector<1x2xf32>
    %204 = tpu.concatenate %200, %203 in 0 : vector<1x2xf32>, vector<1x2xf32> -> vector<2x2xf32>
    %c0_96 = arith.constant 0 : index
    %c0_97 = arith.constant 0 : index
    %205 = vector.load %arg4[%c0_96, %c0_97] : memref<2x2xf32, #tpu.memory_space<vmem>>, vector<2x2xf32>
    tpu.vector_store %arg4[%c0_96, %c0_97], %204 {strides = array<i32>} : memref<2x2xf32, #tpu.memory_space<vmem>>, vector<2x2xf32>,
    return
  }
}

</mosaic_0001>

<bundles_post_ra>
// kernel: ratio_decider_forward.1
= control target key start
LH: loop header
LB: loop body
LE: loop exit
PB: predicated region body
PF: predicated region fallthrough
CT: control target
= control target key end

     0   :  { %v10675_v2 = vmov 0.0   ;;  %s7523_s19 = smov 16   ;;  %s7524_s28 = smov 120   ;;  %v10674_v8 = vlaneseq  ;;  %vm140_vm5 = vcmask 64512   ;;  %s10669_s0 = inlined_call_operand.vmem [shape: f32[8,512], index: 0, kind: input, shape index: {}]   ;;  %s10670_s1 = inlined_call_operand.vmem [shape: f32[32,800], index: 1, kind: input, shape index: {}]   ;;  %s10671_s2 = inlined_call_operand.vmem [shape: f32[32,4], index: 2, kind: input, shape index: {}]   ;;  %s10672_s3 = inlined_call_operand.vmem [shape: f32[1,5], index: 3, kind: input, shape index: {}]   ;;  %s10673_s4 = inlined_call_operand.vmem [shape: f32[2,2], index: 4, kind: output, shape index: {}]  }
   0x1   :  { %v7568_v0 = vld [vmem:[%s10669_s0 + $0x10] sm:$0xff]  ;;  %v7573_v1 = vld [vmem:[%s10669_s0] sm:$0xff]  ;;  %213 = vmatprep.mubr.f32.mxu0 %v10675_v2  ;;  %302 = vmatprep.mubr.f32.mxu1 %v10675_v2  ;;  %v7584_v3 = vld [vmem:[%s10669_s0 + $0x18] sm:$0xff]  ;;  %s7525_s30 = smov 1   ;;  %s7526_s7 = smov 112  }
   0x2   :  { %94 = vrot.lane.b32.xlu1 %v7568_v0, %s7523_s19  ;;  %90 = vrot.lane.b32.xlu0 %v7573_v1, %s7523_s19  ;;  %v7589_v4 = vld [vmem:[%s10669_s0 + $0x8] sm:$0xff]  ;;  %v7598_v5 = vld [vmem:[%s10670_s1] sm:$0xff]  ;;  %v7617_v9 = vand.u32 127, %v10674_v8  ;;  %s7527_s8 = smov 127   ;;  %s7528_s9 = smov 104  }
   0x3   :  { %v7603_v6 = vld [vmem:[%s10670_s1 + $0x38] sm:$0xff]  ;;  %v7612_v7 = vld [vmem:[%s10670_s1 + $0x70] sm:$0xff]  ;;  %v7679_v39 = vld [vmem:[%s10670_s1 + $0xa8] sm:$0xff]  ;;  %s7529_s10 = smov 96   ;;  %s7530_s11 = smov 88  }
   0x4   :  { %v7620_v10 = vadd.s32 384, %v7617_v9  ;;  %v7623_v11 = vadd.s32 128, %v7617_v9  ;;  %v7626_v12 = vadd.s32 256, %v7617_v9  ;;  %v26_v14 = vshra.s32 %v7617_v9, 4  ;;  %s7531_s12 = smov 80   ;;  %s7532_s13 = smov 72  }
   0x5   :  { %vm98_vm4 = vcmp.lt.s32.totalorder %v7617_v9, 16  ;;  %v22_v42 = vand.u32 15, %v7617_v9  ;;  %vm115_vm7 = vcmp.lt.s32.totalorder %v7617_v9, 1  ;;  %vm1410_vm13 = vcmp.lt.s32.totalorder %v7617_v9, 112  ;;  %s7533_s14 = smov 64   ;;  %s7535_s6 = smov 32  }
   0x6   :  { %96 = vrot.lane.b32.xlu1 %v7584_v3, %s7523_s19  ;;  %92 = vrot.lane.b32.xlu0 %v7589_v4, %s7523_s19  ;;  %v29_v13 = vshra.s32 %v7620_v10, 4  ;;  %v27_v15 = vshra.s32 %v7623_v11, 4  ;;  %v28_v16 = vshra.s32 %v7626_v12, 4  ;;  %v7634_v18 = vand.u32 15, %v26_v14 }
   0x7   :  { %v23_v41 = vand.u32 15, %v7623_v11  ;;  %v25_v43 = vand.u32 15, %v7620_v10  ;;  %v24_v44 = vand.u32 15, %v7626_v12  ;;  %vm58_vm8 = vcmp.ge.s32.totalorder %v22_v42, 1 }
   0x8   :  { %v7632_v17 = vand.u32 15, %v29_v13  ;;  %v7636_v19 = vand.u32 15, %v27_v15  ;;  %v7638_v20 = vand.u32 15, %v28_v16  ;;  %vm34_vm1 = vcmp.ge.s32.totalorder %v7634_v18, 1 }
   0x9   :  { %v7649_v24 = vsel %vm34_vm1, 1.0, %v10675_v2  ;;  %vm59_vm6 = vcmp.ge.s32.totalorder %v23_v41, 1  ;;  %vm61_vm9 = vcmp.ge.s32.totalorder %v25_v43, 1  ;;  %vm60_vm10 = vcmp.ge.s32.totalorder %v24_v44, 1 }
   0xa   :  { %132 = vrot.lane.b32.xlu0 %v7598_v5, %s7524_s28  ;;  %134 = vrot.lane.b32.xlu1 %v7603_v6, %s7524_s28  ;;  %vm37_vm0 = vcmp.ge.s32.totalorder %v7632_v17, 1  ;;  %vm35_vm2 = vcmp.ge.s32.totalorder %v7636_v19, 1  ;;  %vm36_vm3 = vcmp.ge.s32.totalorder %v7638_v20, 1  ;;  %10797 = vst [vmem:[#allocation3_spill] sm:$0xff] %v7649_v24  ;;  %v7752_v45 = vsel %vm59_vm6, 1.0, %v10675_v2 }
   0xb   :  { %v7646_v23 = vsel %vm37_vm0, 1.0, %v10675_v2  ;;  %v7652_v25 = vsel %vm35_vm2, 1.0, %v10675_v2  ;;  %v7655_v26 = vsel %vm36_vm3, 1.0, %v10675_v2  ;;  %v7758_v50 = vsel %vm58_vm8, 1.0, %v10675_v2 }
   0xc   :  { %10796 = vst [vmem:[#allocation2_spill] sm:$0xff] %v7646_v23  ;;  %10798 = vst [vmem:[#allocation4_spill] sm:$0xff] %v7652_v25  ;;  %v7761_v51 = vsel %vm61_vm9, 1.0, %v10675_v2  ;;  %v7764_v52 = vsel %vm60_vm10, 1.0, %v10675_v2  ;;  %vm46_vm11 = vcmp.le.s32.totalorder %v7634_v18, 14  ;;  %vm47_vm12 = vcmp.le.s32.totalorder %v7636_v19, 14 }
   0xd   :  { %10799 = vst [vmem:[#allocation5_spill] sm:$0xff] %v7655_v26  ;;  %v7781_v63 = vsel %vm46_vm11, 1.0, %v10675_v2  ;;  %v7785_v11 = vsel %vm47_vm12, 1.0, %v10675_v2  ;;  %vm73_vm14 = vcmp.le.s32.totalorder %v25_v43, 14  ;;  %vm71_vm15 = vcmp.le.s32.totalorder %v23_v41, 14 }
   0xe   :  { %136 = vrot.lane.b32.xlu0 %v7612_v7, %s7524_s28  ;;  %10800 = vst [vmem:[#allocation6_spill] sm:$0xff] %v7781_v63  ;;  %10801 = vst [vmem:[#allocation7_spill] sm:$0xff] %v7785_v11  ;;  %vm72_vm0 = vcmp.le.s32.totalorder %v24_v44, 14  ;;  %vm70_vm1 = vcmp.le.s32.totalorder %v22_v42, 14  ;;  %vm521_vm2 = vcmp.lt.s32.totalorder %v7617_v9, 127  ;;  %vm49_vm3 = vcmp.le.s32.totalorder %v7632_v17, 14 }
   0xf   :  { %vm48_vm6 = vcmp.le.s32.totalorder %v7638_v20, 14  ;;  %vm6662_vm8 = vcmask 1040384   ;;  %vm6664_vm9 = vcmask 9216  }
  0x74   :  { %v95_v21 = vpop.permute.xlu1 %94  ;;  %v91_v22 = vpop.permute.xlu0 %90 }
  0x78   :  { %v97_v27 = vpop.permute.xlu1 %96  ;;  %v93_v28 = vpop.permute.xlu0 %92 }
  0x79   :  { %v99_v29 = vsel %vm98_vm4, %v95_v21, %v97_v27  ;;  %v102_v30 = vsel %vm98_vm4, %v97_v27, %v91_v22  ;;  %v100_v31 = vsel %vm98_vm4, %v93_v28, %v95_v21  ;;  %v101_v32 = vsel %vm98_vm4, %v91_v22, %v93_v28 }
  0x7a   :  { %v106_v33 = vmul.f32 %v7646_v23, %v99_v29  ;;  %v103_v34 = vmul.f32 %v7649_v24, %v102_v30  ;;  %v104_v35 = vmul.f32 %v7652_v25, %v101_v32  ;;  %v105_v36 = vmul.f32 %v7655_v26, %v100_v31 }
  0x7b   :  { %v7814_v21 = vsel %vm73_vm14, 1.0, %v10675_v2  ;;  %v7819_v22 = vsel %vm71_vm15, 1.0, %v10675_v2  ;;  %v7822_v27 = vsel %vm72_vm0, 1.0, %v10675_v2  ;;  %v7827_v29 = vsel %vm70_vm1, 1.0, %v10675_v2 }
  0x7c   :  { %238 = vmatprep.subr.mxu1 %v106_v33  ;;  %107 = vrot.lane.b32.xlu1 %v103_v34, %s7525_s30  ;;  %v133_v37 = vpop.permute.xlu0 %132  ;;  %v135_v38 = vpop.permute.xlu1 %134 }
  0x7d   :  { %109 = vrot.lane.b32.xlu0 %v104_v35, %s7525_s30  ;;  %149 = vmatprep.subr.mxu0 %v104_v35 }
  0x7e   :  { %150 = vmatpush1.msra.mxu0 %v103_v34  ;;  %239 = vmatpush1.msra.mxu1 %v105_v36 }
  0x7f   :  { %6686 = vmatmul.mubr.msk.f32.vlgmr.msra.gmra.mrb[0].mxu0 %vm140_vm5, %v133_v37  ;;  %6690 = vmatmul.mubr.msk.f32.vlgmr.msra.gmra.mrb[0].mxu1 %vm140_vm5, %v133_v37  ;;  %v7848_v37 = vsel %vm48_vm6, 1.0, %v10675_v2 }
  0x80   :  { %111 = vrot.lane.b32.xlu1 %v105_v36, %s7525_s30  ;;  %219 = vmatprep.mubr.f32.mxu0 %v10675_v2  ;;  %v137_v40 = vpop.permute.xlu0 %136  ;;  %10803 = vst [vmem:[#allocation9_spill] sm:$0xff] %v7848_v37 }
  0x81   :  { %113 = vrot.lane.b32.xlu0 %v106_v33, %s7525_s30  ;;  %308 = vmatprep.mubr.f32.mxu1 %v10675_v2 }
  0x83   :  { %6687 = vmatmul.mubr.msk.f32.gmra.mrb[2].mxu0 %vm140_vm5, %v135_v38  ;;  %6691 = vmatmul.mubr.msk.f32.gmra.mrb[2].mxu1 %vm140_vm5, %v135_v38 }
  0x84   :  { %138 = vrot.lane.b32.xlu1 %v7679_v39, %s7524_s28  ;;  %225 = vmatprep.mubr.f32.mxu0 %v10675_v2 }
  0x85   :  { %1402 = vrot.lane.b32.xlu0 %v7573_v1, %s7526_s7  ;;  %314 = vmatprep.mubr.f32.mxu1 %v10675_v2 }
  0x87   :  { %6688 = vmatmul.mubr.msk.f32.gmra.mrb[4].mxu0 %vm140_vm5, %v137_v40  ;;  %6692 = vmatmul.mubr.msk.f32.gmra.mrb[4].mxu1 %vm140_vm5, %v137_v40 }
  0x88   :  { %1404 = vrot.lane.b32.xlu1 %v7589_v4, %s7526_s7  ;;  %231 = vmatprep.mubr.f32.mxu0 %v10675_v2 }
  0x89   :  { %1406 = vrot.lane.b32.xlu0 %v7568_v0, %s7526_s7  ;;  %320 = vmatprep.mubr.f32.mxu1 %v10675_v2 }
  0x8c   :  { %515 = vrot.lane.b32.xlu1 %v104_v35, %s7527_s8 }
  0x8d   :  { %513 = vrot.lane.b32.xlu0 %v103_v34, %s7527_s8 }
  0x90   :  { %519 = vrot.lane.b32.xlu1 %v106_v33, %s7527_s8 }
  0x91   :  { %517 = vrot.lane.b32.xlu0 %v105_v36, %s7527_s8  ;;  %v7845_v36 = vsel %vm49_vm3, 1.0, %v10675_v2 }
  0x92   :  { %10802 = vst [vmem:[#allocation8_spill] sm:$0xff] %v7845_v36 }
  0x94   :  { %1408 = vrot.lane.b32.xlu1 %v7584_v3, %s7526_s7 }
  0x95   :  { %530 = vrot.lane.b32.xlu0 %v7598_v5, %s7526_s7 }
  0x98   :  { %532 = vrot.lane.b32.xlu1 %v7603_v6, %s7526_s7 }
  0x99   :  { %534 = vrot.lane.b32.xlu0 %v7612_v7, %s7526_s7 }
  0x9c   :  { %740 = vrot.lane.b32.xlu1 %v7573_v1, %s7525_s30 }
  0x9d   :  { %742 = vrot.lane.b32.xlu0 %v7589_v4, %s7525_s30 }
  0xa0   :  { %744 = vrot.lane.b32.xlu1 %v7568_v0, %s7525_s30 }
  0xa1   :  { %746 = vrot.lane.b32.xlu0 %v7584_v3, %s7525_s30 }
  0xa4   :  { %536 = vrot.lane.b32.xlu1 %v7679_v39, %s7526_s7 }
  0xa5   :  { %756 = vrot.lane.b32.xlu0 %v7598_v5, %s7528_s9 }
  0xa8   :  { %758 = vrot.lane.b32.xlu1 %v7603_v6, %s7528_s9 }
  0xa9   :  { %760 = vrot.lane.b32.xlu0 %v7612_v7, %s7528_s9 }
  0xac   :  { %762 = vrot.lane.b32.xlu1 %v7679_v39, %s7528_s9 }
  0xad   :  { %966 = vrot.lane.b32.xlu0 %v7598_v5, %s7529_s10 }
  0xb0   :  { %968 = vrot.lane.b32.xlu1 %v7603_v6, %s7529_s10 }
  0xb1   :  { %970 = vrot.lane.b32.xlu0 %v7612_v7, %s7529_s10 }
  0xb4   :  { %1176 = vrot.lane.b32.xlu1 %v7573_v1, %s7527_s8 }
  0xb5   :  { %1178 = vrot.lane.b32.xlu0 %v7589_v4, %s7527_s8 }
  0xb8   :  { %1180 = vrot.lane.b32.xlu1 %v7568_v0, %s7527_s8 }
  0xb9   :  { %1182 = vrot.lane.b32.xlu0 %v7584_v3, %s7527_s8 }
  0xbc   :  { %972 = vrot.lane.b32.xlu1 %v7679_v39, %s7529_s10 }
  0xbd   :  { %1192 = vrot.lane.b32.xlu0 %v7598_v5, %s7530_s11 }
  0xc0   :  { %1194 = vrot.lane.b32.xlu1 %v7603_v6, %s7530_s11 }
  0xc1   :  { %1196 = vrot.lane.b32.xlu0 %v7612_v7, %s7530_s11 }
  0xee   :  { %v108_v46 = vpop.permute.xlu1 %107 }
  0xef   :  { %v110_v47 = vpop.permute.xlu0 %109 }
  0xf0   :  { %v118_v48 = vsel %vm115_vm7, %v108_v46, %v110_v47 }
  0xf1   :  { %v121_v49 = vmul.f32 %v7752_v45, %v118_v48 }
  0xf2   :  { %v112_v53 = vpop.permute.xlu1 %111 }
  0xf3   :  { %v117_v54 = vsel %vm115_vm7, %v110_v47, %v112_v53  ;;  %335 = vmatprep.subr.mxu0 %v121_v49  ;;  %v114_v55 = vpop.permute.xlu0 %113 }
  0xf4   :  { %v116_v56 = vsel %vm115_vm7, %v112_v53, %v114_v55  ;;  %v119_v57 = vsel %vm115_vm7, %v114_v55, %v108_v46  ;;  %v122_v58 = vmul.f32 %v7764_v52, %v117_v54 }
  0xf5   :  { %v120_v59 = vmul.f32 %v7758_v50, %v119_v57  ;;  %v123_v60 = vmul.f32 %v7761_v51, %v116_v56 }
  0xf6   :  { %v139_v61 = vpop.permute.xlu1 %138 }
  0xf7   :  { %336 = vmatpush1.msra.mxu0 %v120_v59  ;;  %424 = vmatprep.subr.mxu1 %v123_v60  ;;  %v1403_v62 = vpop.permute.xlu0 %1402 }
  0xf8   :  { %6689 = vmatmul.mubr.msk.f32.gmra.mrb[6].mxu0 %vm140_vm5, %v139_v61  ;;  %6693 = vmatmul.mubr.msk.f32.gmra.mrb[6].mxu1 %vm140_vm5, %v139_v61 }
  0xf9   :  { %425 = vmatpush1.msra.mxu1 %v122_v58  ;;  %399 = vmatprep.mubr.f32.mxu0 %v10675_v2 }
  0xfa   :  { %v1405_v10 = vpop.permute.xlu1 %1404  ;;  %488 = vmatprep.mubr.f32.mxu1 %v10675_v2 }
  0xfb   :  { %v1413_v12 = vsel %vm1410_vm13, %v1403_v62, %v1405_v10  ;;  %v1407_v13 = vpop.permute.xlu0 %1406 }
  0xfc   :  { %v1412_v14 = vsel %vm1410_vm13, %v1405_v10, %v1407_v13  ;;  %v7793_v15 = vmul.f32 %v7781_v63, %v1413_v12  ;;  %6694 = vmatmul.mubr.msk.f32.vlgmr.msra.gmra.mrb[0].mxu0 %vm140_vm5, %v7598_v5  ;;  %6698 = vmatmul.mubr.msk.f32.vlgmr.msra.gmra.mrb[0].mxu1 %vm140_vm5, %v7598_v5 }
  0xfd   :  { %v7800_v16 = vmul.f32 %v7785_v11, %v1412_v14  ;;  %405 = vmatprep.mubr.f32.mxu0 %v10675_v2  ;;  %494 = vmatprep.mubr.f32.mxu1 %v10675_v2 }
  0xfe   :  { %v516_v18 = vpop.permute.xlu1 %515  ;;  %1419 = vrot.lane.b32.xlu1 %v7793_v15, %s7525_s30 }
  0xff   :  { %1421 = vrot.lane.b32.xlu0 %v7800_v16, %s7525_s30  ;;  %v514_v19 = vpop.permute.xlu0 %513 }
 0x100   :  { %6695 = vmatmul.mubr.msk.f32.gmra.mrb[2].mxu0 %vm140_vm5, %v7603_v6  ;;  %6699 = vmatmul.mubr.msk.f32.gmra.mrb[2].mxu1 %vm140_vm5, %v7603_v6  ;;  %v524_v30 = vsel %vm521_vm2, %v514_v19, %v516_v18 }
 0x101   :  { %411 = vmatprep.mubr.f32.mxu0 %v10675_v2  ;;  %500 = vmatprep.mubr.f32.mxu1 %v10675_v2  ;;  %v526_v38 = vmul.f32 %v7827_v29, %v524_v30 }
 0x102   :  { %v520_v28 = vpop.permute.xlu1 %519 }
 0x103   :  { %v525_v31 = vsel %vm521_vm2, %v520_v28, %v514_v19  ;;  %v518_v32 = vpop.permute.xlu0 %517 }
 0x104   :  { %v522_v33 = vsel %vm521_vm2, %v518_v32, %v520_v28  ;;  %v523_v34 = vsel %vm521_vm2, %v516_v18, %v518_v32  ;;  %v529_v17 = vmul.f32 %v7814_v21, %v525_v31  ;;  %6696 = vmatmul.mubr.msk.f32.gmra.mrb[4].mxu0 %vm140_vm5, %v7612_v7  ;;  %6700 = vmatmul.mubr.msk.f32.gmra.mrb[4].mxu1 %vm140_vm5, %v7612_v7 }
 0x105   :  { %v528_v20 = vmul.f32 %v7822_v27, %v522_v33  ;;  %v527_v35 = vmul.f32 %v7819_v22, %v523_v34  ;;  %417 = vmatprep.mubr.f32.mxu0 %v10675_v2  ;;  %506 = vmatprep.mubr.f32.mxu1 %v10675_v2 }
 0x106   :  { %v1409_v40 = vpop.permute.xlu1 %1408  ;;  %635 = vmatprep.subr.mxu1 %v529_v17 }
 0x107   :  { %v1411_v41 = vsel %vm1410_vm13, %v1407_v13, %v1409_v40  ;;  %v1414_v42 = vsel %vm1410_vm13, %v1409_v40, %v1403_v62  ;;  %546 = vmatprep.subr.mxu0 %v527_v35  ;;  %636 = vmatpush1.msra.mxu1 %v528_v20  ;;  %v531_v43 = vpop.permute.xlu0 %530  ;;  %v7534_v35 = vmov 0   ;;  %v85_v40 = vld [vmem:[%s10671_s2 + $0x18] sm:$0xff] }
 0x108   :  { %547 = vmatpush1.msra.mxu0 %v526_v38  ;;  %v7858_v44 = vmul.f32 %v7845_v36, %v1414_v42  ;;  %v7861_v46 = vmul.f32 %v7848_v37, %v1411_v41  ;;  %6701 = vmatmul.mubr.msk.f32.gmra.mrb[6].mxu1 %vm140_vm5, %v7679_v39  ;;  %v83_v38 = vld [vmem:[%s10671_s2 + $0x8] sm:$0xff]  ;;  %v84_v42 = vld [vmem:[%s10671_s2 + $0x10] sm:$0xff] }
 0x109   :  { %6697 = vmatmul.mubr.msk.f32.gmra.mrb[6].mxu0 %vm140_vm5, %v7679_v39  ;;  %699 = vmatprep.mubr.f32.mxu1 %v10675_v2 }
 0x10a   :  { %1425 = vrot.lane.b32.xlu0 %v7858_v44, %s7525_s30  ;;  %1423 = vrot.lane.b32.xlu1 %v7861_v46, %s7525_s30  ;;  %v533_v47 = vpop.permute.xlu1 %532 }
 0x10b   :  { %610 = vmatprep.mubr.f32.mxu0 %v10675_v2  ;;  %v535_v48 = vpop.permute.xlu0 %534  ;;  %7492 = vset.pattern.permute.xlu0 %v7534_v35 }
 0x10c   :  { %6706 = vmatmul.mubr.msk.f32.vlgmr.msra.gmra.mrb[0].mxu1 %vm140_vm5, %v531_v43  ;;  %7493 = vset.pattern.permute.xlu1 %v7534_v35 }
 0x10d   :  { %6702 = vmatmul.mubr.msk.f32.vlgmr.msra.gmra.mrb[0].mxu0 %vm140_vm5, %v531_v43  ;;  %705 = vmatprep.mubr.f32.mxu1 %v10675_v2  ;;  %v2262_v43 = vld [vmem:[%s10670_s1 + $0x40] sm:$0xff] }
 0x10e   :  { %1435 = vrot.lane.b32.xlu0 %v7598_v5, %s7531_s12  ;;  %1198 = vrot.lane.b32.xlu1 %v7679_v39, %s7530_s11  ;;  %v741_v49 = vpop.permute.xlu1 %740 }
 0x10f   :  { %616 = vmatprep.mubr.f32.mxu0 %v10675_v2  ;;  %v743_v53 = vpop.permute.xlu0 %742 }
 0x110   :  { %6707 = vmatmul.mubr.msk.f32.gmra.mrb[2].mxu1 %vm140_vm5, %v533_v47  ;;  %v750_v54 = vsel %vm115_vm7, %v741_v49, %v743_v53 }
 0x111   :  { %6703 = vmatmul.mubr.msk.f32.gmra.mrb[2].mxu0 %vm140_vm5, %v533_v47  ;;  %711 = vmatprep.mubr.f32.mxu1 %v10675_v2  ;;  %v753_v55 = vmul.f32 %v7752_v45, %v750_v54  ;;  %v2263_v54 = vld [vmem:[%s10670_s1 + $0x78] sm:$0xff] }
 0x112   :  { %1439 = vrot.lane.b32.xlu0 %v7612_v7, %s7531_s12  ;;  %1437 = vrot.lane.b32.xlu1 %v7603_v6, %s7531_s12  ;;  %v745_v56 = vpop.permute.xlu1 %744 }
 0x113   :  { %v749_v57 = vsel %vm115_vm7, %v743_v53, %v745_v56  ;;  %622 = vmatprep.mubr.f32.mxu0 %v10675_v2  ;;  %v747_v58 = vpop.permute.xlu0 %746  ;;  %772 = vmatprep.subr.mxu0 %v753_v55 }
 0x114   :  { %6708 = vmatmul.mubr.msk.f32.gmra.mrb[4].mxu1 %vm140_vm5, %v535_v48  ;;  %v748_v59 = vsel %vm115_vm7, %v745_v56, %v747_v58  ;;  %v751_v60 = vsel %vm115_vm7, %v747_v58, %v741_v49  ;;  %v754_v61 = vmul.f32 %v7764_v52, %v749_v57  ;;  %v2264_v49 = vld [vmem:[%s10670_s1 + $0xb0] sm:$0xff] }
 0x115   :  { %6704 = vmatmul.mubr.msk.f32.gmra.mrb[4].mxu0 %vm140_vm5, %v535_v48  ;;  %v752_v62 = vmul.f32 %v7758_v50, %v751_v60  ;;  %717 = vmatprep.mubr.f32.mxu1 %v10675_v2  ;;  %v755_v10 = vmul.f32 %v7761_v51, %v748_v59  ;;  %v2261_v48 = vld [vmem:[%s10670_s1 + $0x8] sm:$0xff] }
 0x116   :  { %1645 = vrot.lane.b32.xlu0 %v7598_v5, %s7532_s13  ;;  %1441 = vrot.lane.b32.xlu1 %v7679_v39, %s7531_s12  ;;  %v537_v12 = vpop.permute.xlu1 %536 }
 0x117   :  { %628 = vmatprep.mubr.f32.mxu0 %v10675_v2  ;;  %861 = vmatprep.subr.mxu1 %v755_v10  ;;  %v757_v13 = vpop.permute.xlu0 %756 }
 0x118   :  { %6709 = vmatmul.mubr.msk.f32.gmra.mrb[6].mxu1 %vm140_vm5, %v537_v12  ;;  %773 = vmatpush1.msra.mxu0 %v752_v62 }
 0x119   :  { %6705 = vmatmul.mubr.msk.f32.gmra.mrb[6].mxu0 %vm140_vm5, %v537_v12  ;;  %862 = vmatpush1.msra.mxu1 %v754_v61 }
 0x11a   :  { %1649 = vrot.lane.b32.xlu0 %v7612_v7, %s7532_s13  ;;  %1647 = vrot.lane.b32.xlu1 %v7603_v6, %s7532_s13  ;;  %v759_v14 = vpop.permute.xlu1 %758 }
 0x11b   :  { %836 = vmatprep.mubr.f32.mxu0 %v10675_v2  ;;  %925 = vmatprep.mubr.f32.mxu1 %v10675_v2  ;;  %v761_v18 = vpop.permute.xlu0 %760 }
 0x11c   :  { %6714 = vmatmul.mubr.msk.f32.vlgmr.msra.gmra.mrb[0].mxu1 %vm140_vm5, %v757_v13  ;;  %982 = vmatprep.subr.mxu0 %v7589_v4 }
 0x11d   :  { %6710 = vmatmul.mubr.msk.f32.vlgmr.msra.gmra.mrb[0].mxu0 %vm140_vm5, %v757_v13  ;;  %931 = vmatprep.mubr.f32.mxu1 %v10675_v2 }
 0x11e   :  { %1857 = vrot.lane.b32.xlu0 %v7800_v16, %s7527_s8  ;;  %1855 = vrot.lane.b32.xlu1 %v7793_v15, %s7527_s8  ;;  %v763_v19 = vpop.permute.xlu1 %762 }
 0x11f   :  { %842 = vmatprep.mubr.f32.mxu0 %v10675_v2  ;;  %v967_v28 = vpop.permute.xlu0 %966  ;;  %1071 = vmatprep.subr.mxu1 %v7584_v3 }
 0x120   :  { %6715 = vmatmul.mubr.msk.f32.gmra.mrb[2].mxu1 %vm140_vm5, %v759_v14  ;;  %983 = vmatpush1.msra.mxu0 %v7573_v1 }
 0x121   :  { %6711 = vmatmul.mubr.msk.f32.gmra.mrb[2].mxu0 %vm140_vm5, %v759_v14  ;;  %937 = vmatprep.mubr.f32.mxu1 %v10675_v2 }
 0x122   :  { %1861 = vrot.lane.b32.xlu0 %v7858_v44, %s7527_s8  ;;  %1859 = vrot.lane.b32.xlu1 %v7861_v46, %s7527_s8  ;;  %v969_v4 = vpop.permute.xlu1 %968 }
 0x123   :  { %848 = vmatprep.mubr.f32.mxu0 %v10675_v2  ;;  %1072 = vmatpush1.msra.mxu1 %v7568_v0  ;;  %v971_v3 = vpop.permute.xlu0 %970 }
 0x124   :  { %6716 = vmatmul.mubr.msk.f32.gmra.mrb[4].mxu1 %vm140_vm5, %v761_v18 }
 0x125   :  { %6712 = vmatmul.mubr.msk.f32.gmra.mrb[4].mxu0 %vm140_vm5, %v761_v18  ;;  %943 = vmatprep.mubr.f32.mxu1 %v10675_v2 }
 0x126   :  { %1651 = vrot.lane.b32.xlu1 %v7679_v39, %s7532_s13  ;;  %1871 = vrot.lane.b32.xlu0 %v7598_v5, %s7533_s14  ;;  %v1177_v1 = vpop.permute.xlu1 %1176 }
 0x127   :  { %854 = vmatprep.mubr.f32.mxu0 %v10675_v2  ;;  %v1179_v30 = vpop.permute.xlu0 %1178 }
 0x128   :  { %6717 = vmatmul.mubr.msk.f32.gmra.mrb[6].mxu1 %vm140_vm5, %v763_v19  ;;  %v1186_v0 = vsel %vm521_vm2, %v1177_v1, %v1179_v30 }
 0x129   :  { %6713 = vmatmul.mubr.msk.f32.gmra.mrb[6].mxu0 %vm140_vm5, %v763_v19  ;;  %1135 = vmatprep.mubr.f32.mxu1 %v10675_v2  ;;  %v1188_v33 = vmul.f32 %v7827_v29, %v1186_v0 }
 0x12a   :  { %1873 = vrot.lane.b32.xlu1 %v7603_v6, %s7533_s14  ;;  %1875 = vrot.lane.b32.xlu0 %v7612_v7, %s7533_s14  ;;  %v1181_v5 = vpop.permute.xlu1 %1180 }
 0x12b   :  { %1046 = vmatprep.mubr.f32.mxu0 %v10675_v2  ;;  %v1185_v31 = vsel %vm521_vm2, %v1179_v30, %v1181_v5  ;;  %v1183_v32 = vpop.permute.xlu0 %1182 }
 0x12c   :  { %6722 = vmatmul.mubr.msk.f32.vlgmr.msra.gmra.mrb[0].mxu1 %vm140_vm5, %v967_v28  ;;  %v1184_v34 = vsel %vm521_vm2, %v1181_v5, %v1183_v32  ;;  %v1187_v6 = vsel %vm521_vm2, %v1183_v32, %v1177_v1  ;;  %v1189_v17 = vmul.f32 %v7819_v22, %v1185_v31 }
 0x12d   :  { %6718 = vmatmul.mubr.msk.f32.vlgmr.msra.gmra.mrb[0].mxu0 %vm140_vm5, %v967_v28  ;;  %1141 = vmatprep.mubr.f32.mxu1 %v10675_v2  ;;  %v1191_v7 = vmul.f32 %v7814_v21, %v1187_v6  ;;  %v1190_v20 = vmul.f32 %v7822_v27, %v1184_v34 }
 0x12e   :  { %1877 = vrot.lane.b32.xlu1 %v7679_v39, %s7533_s14  ;;  %1052 = vmatprep.mubr.f32.mxu0 %v10675_v2  ;;  %v82_v39 = vld [vmem:[%s10671_s2] sm:$0xff]  ;;  %v973_v41 = vpop.permute.xlu1 %972 }
 0x12f   :  { %1208 = vmatprep.subr.mxu0 %v1189_v17  ;;  %1297 = vmatprep.subr.mxu1 %v1191_v7  ;;  %v1193_v47 = vpop.permute.xlu0 %1192 }
 0x130   :  { %6723 = vmatmul.mubr.msk.f32.gmra.mrb[2].mxu1 %vm140_vm5, %v969_v4  ;;  %1209 = vmatpush1.msra.mxu0 %v1188_v33 }
 0x131   :  { %6719 = vmatmul.mubr.msk.f32.gmra.mrb[2].mxu0 %vm140_vm5, %v969_v4  ;;  %1147 = vmatprep.mubr.f32.mxu1 %v10675_v2 }
 0x132   :  { %1058 = vmatprep.mubr.f32.mxu0 %v10675_v2  ;;  %1298 = vmatpush1.msra.mxu1 %v1190_v20  ;;  %v1195_v53 = vpop.permute.xlu1 %1194 }
 0x133   :  { %2083 = vperm.xlu0 %7492, %v82_v39   ;;  %2088 = vperm.xlu1 %7493, %v83_v38   ;;  %v1197_v55 = vpop.permute.xlu0 %1196 }
 0x134   :  { %6724 = vmatmul.mubr.msk.f32.gmra.mrb[4].mxu1 %vm140_vm5, %v971_v3 }
 0x135   :  { %6720 = vmatmul.mubr.msk.f32.gmra.mrb[4].mxu0 %vm140_vm5, %v971_v3  ;;  %1153 = vmatprep.mubr.f32.mxu1 %v10675_v2 }
 0x136   :  { %1064 = vmatprep.mubr.f32.mxu0 %v10675_v2 }
 0x137   :  { %2098 = vperm.xlu0 %7492, %v85_v40   ;;  %2093 = vperm.xlu1 %7493, %v84_v42  }
 0x138   :  { %6725 = vmatmul.mubr.msk.f32.gmra.mrb[6].mxu1 %vm140_vm5, %v973_v41 }
 0x139   :  { %6721 = vmatmul.mubr.msk.f32.gmra.mrb[6].mxu0 %vm140_vm5, %v973_v41  ;;  %1361 = vmatprep.mubr.f32.mxu1 %v10675_v2 }
 0x13a   :  { %1272 = vmatprep.mubr.f32.mxu0 %v10675_v2 }
 0x13b   :  { %2271 = vrot.lane.b32.xlu0 %v2262_v43, %s7529_s10  ;;  %2269 = vrot.lane.b32.xlu1 %v2261_v48, %s7529_s10 }
 0x13c   :  { %6730 = vmatmul.mubr.msk.f32.vlgmr.msra.gmra.mrb[0].mxu1 %vm140_vm5, %v1193_v47 }
 0x13d   :  { %6726 = vmatmul.mubr.msk.f32.vlgmr.msra.gmra.mrb[0].mxu0 %vm140_vm5, %v1193_v47  ;;  %1367 = vmatprep.mubr.f32.mxu1 %v10675_v2 }
 0x13e   :  { %1278 = vmatprep.mubr.f32.mxu0 %v10675_v2 }
 0x13f   :  { %2275 = vrot.lane.b32.xlu0 %v2264_v49, %s7529_s10  ;;  %2273 = vrot.lane.b32.xlu1 %v2263_v54, %s7529_s10 }
 0x140   :  { %6731 = vmatmul.mubr.msk.f32.gmra.mrb[2].mxu1 %vm140_vm5, %v1195_v53 }
 0x141   :  { %6727 = vmatmul.mubr.msk.f32.gmra.mrb[2].mxu0 %vm140_vm5, %v1195_v53  ;;  %1373 = vmatprep.mubr.f32.mxu1 %v10675_v2 }
 0x142   :  { %1284 = vmatprep.mubr.f32.mxu0 %v10675_v2 }
 0x143   :  { %2716 = vrot.lane.b32.xlu0 %v2262_v43, %s7533_s14  ;;  %2714 = vrot.lane.b32.xlu1 %v2261_v48, %s7533_s14 }
 0x144   :  { %6732 = vmatmul.mubr.msk.f32.gmra.mrb[4].mxu1 %vm140_vm5, %v1197_v55 }
 0x145   :  { %6728 = vmatmul.mubr.msk.f32.gmra.mrb[4].mxu0 %vm140_vm5, %v1197_v55  ;;  %1379 = vmatprep.mubr.f32.mxu1 %v10675_v2 }
 0x146   :  { %1290 = vmatprep.mubr.f32.mxu0 %v10675_v2 }
 0x147   :  { %2720 = vrot.lane.b32.xlu0 %v2264_v49, %s7533_s14  ;;  %2718 = vrot.lane.b32.xlu1 %v2263_v54, %s7533_s14 }
 0x14b   :  { %2990 = vrot.lane.b32.xlu0 %v2262_v43, %s7535_s6  ;;  %2988 = vrot.lane.b32.xlu1 %v2261_v48, %s7535_s6 }
 0x14f   :  { %2994 = vrot.lane.b32.xlu0 %v2264_v49, %s7535_s6  ;;  %2992 = vrot.lane.b32.xlu1 %v2263_v54, %s7535_s6 }
 0x170   :  { %v1420_v56 = vpop.permute.xlu1 %1419 }
 0x171   :  { %v1422_v57 = vpop.permute.xlu0 %1421 }
 0x172   :  { %v1429_v58 = vsel %vm115_vm7, %v1420_v56, %v1422_v57 }
 0x173   :  { %v1432_v59 = vmul.f32 %v7752_v45, %v1429_v58 }
 0x175   :  { %1451 = vmatprep.subr.mxu0 %v1432_v59 }
 0x17c   :  { %v1424_v60 = vpop.permute.xlu1 %1423  ;;  %v1426_v61 = vpop.permute.xlu0 %1425 }
 0x17d   :  { %v1428_v62 = vsel %vm115_vm7, %v1422_v57, %v1424_v60  ;;  %v1427_v10 = vsel %vm115_vm7, %v1424_v60, %v1426_v61  ;;  %v1430_v12 = vsel %vm115_vm7, %v1426_v61, %v1420_v56 }
 0x17e   :  { %v1433_v13 = vmul.f32 %v7764_v52, %v1428_v62  ;;  %v1431_v14 = vmul.f32 %v7758_v50, %v1430_v12  ;;  %v1434_v18 = vmul.f32 %v7761_v51, %v1427_v10 }
 0x180   :  { %v1199_v19 = vpop.permute.xlu1 %1198  ;;  %1452 = vmatpush1.msra.mxu0 %v1431_v14  ;;  %1540 = vmatprep.subr.mxu1 %v1434_v18  ;;  %v1436_v28 = vpop.permute.xlu0 %1435 }
 0x181   :  { %6729 = vmatmul.mubr.msk.f32.gmra.mrb[6].mxu0 %vm140_vm5, %v1199_v19  ;;  %6733 = vmatmul.mubr.msk.f32.gmra.mrb[6].mxu1 %vm140_vm5, %v1199_v19 }
 0x182   :  { %1541 = vmatpush1.msra.mxu1 %v1433_v13  ;;  %1661 = vmatprep.subr.mxu0 %v7800_v16 }
 0x183   :  { %1750 = vmatprep.subr.mxu1 %v7858_v44  ;;  %1515 = vmatprep.mubr.f32.mxu0 %v10675_v2 }
 0x184   :  { %v1438_v4 = vpop.permute.xlu1 %1437  ;;  %1604 = vmatprep.mubr.f32.mxu1 %v10675_v2  ;;  %v1440_v3 = vpop.permute.xlu0 %1439 }
 0x185   :  { %6734 = vmatmul.mubr.msk.f32.vlgmr.msra.gmra.mrb[0].mxu0 %vm140_vm5, %v1436_v28  ;;  %6738 = vmatmul.mubr.msk.f32.vlgmr.msra.gmra.mrb[0].mxu1 %vm140_vm5, %v1436_v28 }
 0x186   :  { %1662 = vmatpush1.msra.mxu0 %v7793_v15  ;;  %1751 = vmatpush1.msra.mxu1 %v7861_v46 }
 0x187   :  { %1521 = vmatprep.mubr.f32.mxu0 %v10675_v2  ;;  %1610 = vmatprep.mubr.f32.mxu1 %v10675_v2 }
 0x188   :  { %v1442_v16 = vpop.permute.xlu1 %1441  ;;  %v1646_v44 = vpop.permute.xlu0 %1645 }
 0x189   :  { %6735 = vmatmul.mubr.msk.f32.gmra.mrb[2].mxu0 %vm140_vm5, %v1438_v4  ;;  %6739 = vmatmul.mubr.msk.f32.gmra.mrb[2].mxu1 %vm140_vm5, %v1438_v4 }
 0x18a   :  { %1527 = vmatprep.mubr.f32.mxu0 %v10675_v2  ;;  %1616 = vmatprep.mubr.f32.mxu1 %v10675_v2 }
 0x18c   :  { %v1648_v1 = vpop.permute.xlu1 %1647  ;;  %v1650_v30 = vpop.permute.xlu0 %1649 }
 0x18d   :  { %6736 = vmatmul.mubr.msk.f32.gmra.mrb[4].mxu0 %vm140_vm5, %v1440_v3  ;;  %6740 = vmatmul.mubr.msk.f32.gmra.mrb[4].mxu1 %vm140_vm5, %v1440_v3 }
 0x18e   :  { %1533 = vmatprep.mubr.f32.mxu0 %v10675_v2  ;;  %1622 = vmatprep.mubr.f32.mxu1 %v10675_v2 }
 0x190   :  { %v1856_v15 = vpop.permute.xlu1 %1855  ;;  %v1858_v46 = vpop.permute.xlu0 %1857 }
 0x191   :  { %6737 = vmatmul.mubr.msk.f32.gmra.mrb[6].mxu0 %vm140_vm5, %v1442_v16  ;;  %6741 = vmatmul.mubr.msk.f32.gmra.mrb[6].mxu1 %vm140_vm5, %v1442_v16  ;;  %v1865_v0 = vsel %vm521_vm2, %v1856_v15, %v1858_v46 }
 0x192   :  { %1725 = vmatprep.mubr.f32.mxu0 %v10675_v2  ;;  %1814 = vmatprep.mubr.f32.mxu1 %v10675_v2  ;;  %v1867_v20 = vmul.f32 %v7827_v29, %v1865_v0 }
 0x194   :  { %v1860_v5 = vpop.permute.xlu1 %1859  ;;  %v1862_v31 = vpop.permute.xlu0 %1861 }
 0x195   :  { %v1864_v32 = vsel %vm521_vm2, %v1858_v46, %v1860_v5  ;;  %v1863_v33 = vsel %vm521_vm2, %v1860_v5, %v1862_v31  ;;  %v1866_v34 = vsel %vm521_vm2, %v1862_v31, %v1856_v15  ;;  %6742 = vmatmul.mubr.msk.f32.vlgmr.msra.gmra.mrb[0].mxu0 %vm140_vm5, %v1646_v44  ;;  %6746 = vmatmul.mubr.msk.f32.vlgmr.msra.gmra.mrb[0].mxu1 %vm140_vm5, %v1646_v44 }
 0x196   :  { %v1869_v6 = vmul.f32 %v7822_v27, %v1863_v33  ;;  %1731 = vmatprep.mubr.f32.mxu0 %v10675_v2  ;;  %1820 = vmatprep.mubr.f32.mxu1 %v10675_v2  ;;  %v1868_v17 = vmul.f32 %v7819_v22, %v1864_v32  ;;  %v1870_v7 = vmul.f32 %v7814_v21, %v1866_v34 }
 0x198   :  { %1887 = vmatprep.subr.mxu0 %v1868_v17  ;;  %1976 = vmatprep.subr.mxu1 %v1870_v7  ;;  %v1652_v39 = vpop.permute.xlu1 %1651  ;;  %v1872_v35 = vpop.permute.xlu0 %1871 }
 0x199   :  { %6743 = vmatmul.mubr.msk.f32.gmra.mrb[2].mxu0 %vm140_vm5, %v1648_v1  ;;  %6747 = vmatmul.mubr.msk.f32.gmra.mrb[2].mxu1 %vm140_vm5, %v1648_v1 }
 0x19a   :  { %1888 = vmatpush1.msra.mxu0 %v1867_v20  ;;  %1977 = vmatpush1.msra.mxu1 %v1869_v6 }
 0x19b   :  { %1737 = vmatprep.mubr.f32.mxu0 %v10675_v2  ;;  %1826 = vmatprep.mubr.f32.mxu1 %v10675_v2 }
 0x19c   :  { %v1874_v38 = vpop.permute.xlu1 %1873  ;;  %v1876_v40 = vpop.permute.xlu0 %1875 }
 0x19d   :  { %6744 = vmatmul.mubr.msk.f32.gmra.mrb[4].mxu0 %vm140_vm5, %v1650_v30  ;;  %6748 = vmatmul.mubr.msk.f32.gmra.mrb[4].mxu1 %vm140_vm5, %v1650_v30 }
 0x19e   :  { %1743 = vmatprep.mubr.f32.mxu0 %v10675_v2  ;;  %1832 = vmatprep.mubr.f32.mxu1 %v10675_v2 }
 0x1a0   :  { %v1878_v41 = vpop.permute.xlu1 %1877 }
 0x1a1   :  { %6745 = vmatmul.mubr.msk.f32.gmra.mrb[6].mxu0 %vm140_vm5, %v1652_v39  ;;  %6749 = vmatmul.mubr.msk.f32.gmra.mrb[6].mxu1 %vm140_vm5, %v1652_v39 }
 0x1a2   :  { %1951 = vmatprep.mubr.f32.mxu0 %v10675_v2  ;;  %2040 = vmatprep.mubr.f32.mxu1 %v10675_v2 }
 0x1a5   :  { %6750 = vmatmul.mubr.msk.f32.vlgmr.msra.gmra.mrb[0].mxu0 %vm140_vm5, %v1872_v35  ;;  %6754 = vmatmul.mubr.msk.f32.vlgmr.msra.gmra.mrb[0].mxu1 %vm140_vm5, %v1872_v35 }
 0x1a6   :  { %1957 = vmatprep.mubr.f32.mxu0 %v10675_v2  ;;  %2046 = vmatprep.mubr.f32.mxu1 %v10675_v2 }
 0x1a9   :  { %6751 = vmatmul.mubr.msk.f32.gmra.mrb[2].mxu0 %vm140_vm5, %v1874_v38  ;;  %6755 = vmatmul.mubr.msk.f32.gmra.mrb[2].mxu1 %vm140_vm5, %v1874_v38 }
 0x1aa   :  { %1963 = vmatprep.mubr.f32.mxu0 %v10675_v2  ;;  %2052 = vmatprep.mubr.f32.mxu1 %v10675_v2 }
 0x1ad   :  { %6752 = vmatmul.mubr.msk.f32.gmra.mrb[4].mxu0 %vm140_vm5, %v1876_v40  ;;  %6756 = vmatmul.mubr.msk.f32.gmra.mrb[4].mxu1 %vm140_vm5, %v1876_v40 }
 0x1ae   :  { %1969 = vmatprep.mubr.f32.mxu0 %v10675_v2  ;;  %2058 = vmatprep.mubr.f32.mxu1 %v10675_v2 }
 0x1b1   :  { %6753 = vmatmul.mubr.msk.f32.gmra.mrb[6].mxu0 %vm140_vm5, %v1878_v41  ;;  %6757 = vmatmul.mubr.msk.f32.gmra.mrb[6].mxu1 %vm140_vm5, %v1878_v41  ;;  %vm2277_vm5 = vcmask 261120  }
 0x1b2   :  { %2350 = vmatprep.mubr.f32.mxu0 %v10675_v2  ;;  %2439 = vmatprep.mubr.f32.mxu1 %v10675_v2  ;;  %v2084_v42 = vpop.permute.xlu0 %2083  ;;  %v2089_v54 = vpop.permute.xlu1 %2088 }
 0x1b6   :  { %v2094_v7 = vpop.permute.xlu1 %2093  ;;  %v2099_v20 = vpop.permute.xlu0 %2098 }
 0x278   :  { %v1953_v43 = vpop.f32.mrb[0].mxu0  ;;  %v2042_v47 = vpop.f32.mrb[0].mxu1 }
 0x279   :  { %v2101_v48 = vadd.f32 %v2084_v42, %v1953_v43  ;;  %v1955_v49 = vpop.f32.mrb[1].mxu0  ;;  %v2044_v53 = vpop.f32.mrb[1].mxu1  ;;  %v2103_v55 = vadd.f32 %v2084_v42, %v2042_v47 }
 0x27a   :  { %v2102_v57 = vadd.f32 %v2084_v42, %v1955_v49  ;;  %v2104_v58 = vadd.f32 %v2084_v42, %v2044_v53  ;;  %v8225_v49 = vpop.permute.xlu0 %2271 }
 0x27b   :  { %v8107_v56 = vmax.f32 %v2101_v48, 0.0  ;;  %v8113_v18 = vmax.f32 %v2103_v55, 0.0  ;;  %v8223_v48 = vpop.permute.xlu1 %2269 }
 0x27c   :  { %v1959_v59 = vpop.f32.mrb[2].mxu0  ;;  %v2048_v60 = vpop.f32.mrb[2].mxu1  ;;  %v8119_v4 = vmax.f32 %v2102_v57, 0.0  ;;  %v8121_v3 = vmax.f32 %v2104_v58, 0.0 }
 0x27d   :  { %10804 = vst [vmem:[#allocation10_spill] sm:$0xff] %v8107_v56  ;;  %v2105_v61 = vadd.f32 %v2089_v54, %v1959_v59  ;;  %v2107_v62 = vadd.f32 %v2089_v54, %v2048_v60  ;;  %v1961_v10 = vpop.f32.mrb[3].mxu0  ;;  %v2050_v12 = vpop.f32.mrb[3].mxu1  ;;  %2924 = vrot.lane.b32.xlu0 %v8107_v56, %s7525_s30  ;;  %2133 = vrot.lane.b32.xlu1 %v8107_v56, %s7523_s19  ;;  %10805 = vst [vmem:[#allocation11_spill] sm:$0xff] %v8113_v18 }
 0x27e   :  { %v2106_v13 = vadd.f32 %v2089_v54, %v1961_v10  ;;  %v2108_v14 = vadd.f32 %v2089_v54, %v2050_v12  ;;  %10808 = vst [vmem:[#allocation14_spill] sm:$0xff] %v8119_v4  ;;  %10809 = vst [vmem:[#allocation15_spill] sm:$0xff] %v8121_v3  ;;  %v8237_v54 = vpop.permute.xlu0 %2275 }
 0x27f   :  { %v8115_v19 = vmax.f32 %v2105_v61, 0.0  ;;  %v8117_v28 = vmax.f32 %v2107_v62, 0.0  ;;  %v8235_v53 = vpop.permute.xlu1 %2273 }
 0x280   :  { %v8123_v16 = vmax.f32 %v2106_v13, 0.0  ;;  %v8125_v44 = vmax.f32 %v2108_v14, 0.0  ;;  %v1965_v1 = vpop.f32.mrb[4].mxu0  ;;  %v2054_v30 = vpop.f32.mrb[4].mxu1 }
 0x281   :  { %10806 = vst [vmem:[#allocation12_spill] sm:$0xff] %v8115_v19  ;;  %10807 = vst [vmem:[#allocation13_spill] sm:$0xff] %v8117_v28  ;;  %v8127_v15 = vpop.f32.mrb[5].mxu0  ;;  %v8129_v46 = vpop.f32.mrb[5].mxu1  ;;  %2940 = vrot.lane.b32.xlu0 %v8113_v18, %s7525_s30  ;;  %2149 = vrot.lane.b32.xlu1 %v8113_v18, %s7523_s19  ;;  %v2109_v39 = vadd.f32 %v2094_v7, %v1965_v1  ;;  %v2111_v40 = vadd.f32 %v2094_v7, %v2054_v30 }
 0x282   :  { %10810 = vst [vmem:[#allocation16_spill] sm:$0xff] %v8123_v16  ;;  %10811 = vst [vmem:[#allocation17_spill] sm:$0xff] %v8125_v44  ;;  %v2110_v55 = vadd.f32 %v2094_v7, %v8127_v15  ;;  %v2112_v59 = vadd.f32 %v2094_v7, %v8129_v46  ;;  %v8251_v10 = vpop.permute.xlu0 %2716 }
 0x283   :  { %v8199_v38 = vmax.f32 %v2109_v39, 0.0  ;;  %v8207_v43 = vmax.f32 %v2111_v40, 0.0  ;;  %v8249_v62 = vpop.permute.xlu1 %2714  ;;  %10819 = vst [vmem:[#allocation25_spill] sm:$0xff] %v8251_v10 }
 0x284   :  { %v1971_v33 = vpop.f32.mrb[6].mxu0  ;;  %v2060_v34 = vpop.f32.mrb[6].mxu1  ;;  %v8244_v58 = vmax.f32 %v2110_v55, 0.0  ;;  %10818 = vst [vmem:[#allocation24_spill] sm:$0xff] %v8249_v62  ;;  %v8257_v12 = vmax.f32 %v2112_v59, 0.0 }
 0x285   :  { %v1973_v6 = vpop.f32.mrb[7].mxu0  ;;  %v2062_v17 = vpop.f32.mrb[7].mxu1  ;;  %2932 = vrot.lane.b32.xlu0 %v8119_v4, %s7525_s30  ;;  %3682 = vrot.lane.b32.xlu1 %v8107_v56, %s7526_s7  ;;  %v2113_v35 = vadd.f32 %v2099_v20, %v1971_v33  ;;  %10812 = vst [vmem:[#allocation18_spill] sm:$0xff] %v8199_v38  ;;  %v2115_v42 = vadd.f32 %v2099_v20, %v2060_v34  ;;  %10814 = vst [vmem:[#allocation20_spill] sm:$0xff] %v8207_v43 }
 0x286   :  { %v2114_v57 = vadd.f32 %v2099_v20, %v1973_v6  ;;  %10816 = vst [vmem:[#allocation22_spill] sm:$0xff] %v8244_v58  ;;  %v2116_v61 = vadd.f32 %v2099_v20, %v2062_v17  ;;  %10820 = vst [vmem:[#allocation26_spill] sm:$0xff] %v8257_v12  ;;  %v8267_v1 = vpop.permute.xlu0 %2720 }
 0x287   :  { %v8201_v41 = vmax.f32 %v2113_v35, 0.0  ;;  %v8209_v47 = vmax.f32 %v2115_v42, 0.0  ;;  %v8265_v14 = vpop.permute.xlu1 %2718  ;;  %10823 = vst [vmem:[#allocation29_spill] sm:$0xff] %v8267_v1 }
 0x288   :  { %v8247_v60 = vmax.f32 %v2114_v57, 0.0  ;;  %v8259_v13 = vmax.f32 %v2116_v61, 0.0  ;;  %10822 = vst [vmem:[#allocation28_spill] sm:$0xff] %v8265_v14 }
 0x289   :  { %2948 = vrot.lane.b32.xlu0 %v8121_v3, %s7525_s30  ;;  %3698 = vrot.lane.b32.xlu1 %v8113_v18, %s7526_s7  ;;  %10813 = vst [vmem:[#allocation19_spill] sm:$0xff] %v8201_v41  ;;  %10815 = vst [vmem:[#allocation21_spill] sm:$0xff] %v8209_v47 }
 0x28a   :  { %10817 = vst [vmem:[#allocation23_spill] sm:$0xff] %v8247_v60  ;;  %10821 = vst [vmem:[#allocation27_spill] sm:$0xff] %v8259_v13  ;;  %v8275_v15 = vpop.permute.xlu0 %2990 }
 0x28b   :  { %v8273_v30 = vpop.permute.xlu1 %2988  ;;  %10825 = vst [vmem:[#allocation31_spill] sm:$0xff] %v8275_v15 }
 0x28c   :  { %10824 = vst [vmem:[#allocation30_spill] sm:$0xff] %v8273_v30 }
 0x28d   :  { %2135 = vrot.lane.b32.xlu0 %v8115_v19, %s7523_s19  ;;  %3408 = vrot.lane.b32.xlu1 %v8107_v56, %s7527_s8 }
 0x28e   :  { %v8287_v33 = vpop.permute.xlu0 %2994 }
 0x28f   :  { %v8285_v46 = vpop.permute.xlu1 %2992  ;;  %10827 = vst [vmem:[#allocation33_spill] sm:$0xff] %v8287_v33 }
 0x290   :  { %10826 = vst [vmem:[#allocation32_spill] sm:$0xff] %v8285_v46 }
 0x291   :  { %2151 = vrot.lane.b32.xlu0 %v8117_v28, %s7523_s19  ;;  %3424 = vrot.lane.b32.xlu1 %v8113_v18, %s7527_s8 }
 0x295   :  { %3684 = vrot.lane.b32.xlu0 %v8115_v19, %s7526_s7  ;;  %2141 = vrot.lane.b32.xlu1 %v8119_v4, %s7523_s19 }
 0x299   :  { %3700 = vrot.lane.b32.xlu0 %v8117_v28, %s7526_s7  ;;  %2157 = vrot.lane.b32.xlu1 %v8121_v3, %s7523_s19 }
 0x29d   :  { %3410 = vrot.lane.b32.xlu0 %v8115_v19, %s7527_s8  ;;  %3690 = vrot.lane.b32.xlu1 %v8119_v4, %s7526_s7 }
 0x2a1   :  { %3426 = vrot.lane.b32.xlu0 %v8117_v28, %s7527_s8  ;;  %3706 = vrot.lane.b32.xlu1 %v8121_v3, %s7526_s7 }
 0x2a5   :  { %2143 = vrot.lane.b32.xlu0 %v8123_v16, %s7523_s19  ;;  %3416 = vrot.lane.b32.xlu1 %v8119_v4, %s7527_s8 }
 0x2a9   :  { %2159 = vrot.lane.b32.xlu0 %v8125_v44, %s7523_s19  ;;  %3432 = vrot.lane.b32.xlu1 %v8121_v3, %s7527_s8 }
 0x2ad   :  { %3692 = vrot.lane.b32.xlu0 %v8123_v16, %s7526_s7  ;;  %2926 = vrot.lane.b32.xlu1 %v8115_v19, %s7525_s30 }
 0x2b1   :  { %3708 = vrot.lane.b32.xlu0 %v8125_v44, %s7526_s7  ;;  %2942 = vrot.lane.b32.xlu1 %v8117_v28, %s7525_s30 }
 0x2b5   :  { %3418 = vrot.lane.b32.xlu0 %v8123_v16, %s7527_s8  ;;  %2934 = vrot.lane.b32.xlu1 %v8123_v16, %s7525_s30 }
 0x2b9   :  { %3434 = vrot.lane.b32.xlu0 %v8125_v44, %s7527_s8  ;;  %2950 = vrot.lane.b32.xlu1 %v8125_v44, %s7525_s30 }
 0x2bd   :  { %2137 = vrot.lane.b32.xlu1 %v8199_v38, %s7523_s19  ;;  %2139 = vrot.lane.b32.xlu0 %v8201_v41, %s7523_s19 }
 0x2c1   :  { %2153 = vrot.lane.b32.xlu1 %v8207_v43, %s7523_s19  ;;  %2155 = vrot.lane.b32.xlu0 %v8209_v47, %s7523_s19 }
 0x2c5   :  { %3686 = vrot.lane.b32.xlu1 %v8199_v38, %s7526_s7  ;;  %3688 = vrot.lane.b32.xlu0 %v8201_v41, %s7526_s7 }
 0x2c9   :  { %3702 = vrot.lane.b32.xlu1 %v8207_v43, %s7526_s7  ;;  %3704 = vrot.lane.b32.xlu0 %v8209_v47, %s7526_s7 }
 0x2cd   :  { %2928 = vrot.lane.b32.xlu1 %v8199_v38, %s7525_s30  ;;  %2930 = vrot.lane.b32.xlu0 %v8201_v41, %s7525_s30 }
 0x2d1   :  { %2944 = vrot.lane.b32.xlu1 %v8207_v43, %s7525_s30  ;;  %2946 = vrot.lane.b32.xlu0 %v8209_v47, %s7525_s30 }
 0x2d5   :  { %3412 = vrot.lane.b32.xlu1 %v8199_v38, %s7527_s8  ;;  %3414 = vrot.lane.b32.xlu0 %v8201_v41, %s7527_s8 }
 0x2d9   :  { %2145 = vrot.lane.b32.xlu1 %v8244_v58, %s7523_s19  ;;  %2147 = vrot.lane.b32.xlu0 %v8247_v60, %s7523_s19 }
 0x2dd   :  { %2161 = vrot.lane.b32.xlu1 %v8257_v12, %s7523_s19  ;;  %2163 = vrot.lane.b32.xlu0 %v8259_v13, %s7523_s19 }
 0x2e1   :  { %3694 = vrot.lane.b32.xlu1 %v8244_v58, %s7526_s7  ;;  %3696 = vrot.lane.b32.xlu0 %v8247_v60, %s7526_s7 }
 0x2e5   :  { %3710 = vrot.lane.b32.xlu1 %v8257_v12, %s7526_s7  ;;  %3712 = vrot.lane.b32.xlu0 %v8259_v13, %s7526_s7 }
 0x2e9   :  { %2936 = vrot.lane.b32.xlu1 %v8244_v58, %s7525_s30  ;;  %2938 = vrot.lane.b32.xlu0 %v8247_v60, %s7525_s30 }
 0x2ed   :  { %2952 = vrot.lane.b32.xlu1 %v8257_v12, %s7525_s30  ;;  %2954 = vrot.lane.b32.xlu0 %v8259_v13, %s7525_s30 }
 0x2ef   :  { %v2134_v34 = vpop.permute.xlu1 %2133  ;;  %v8293_v6 = vpop.permute.xlu0 %2924 }
 0x2f3   :  { %v2150_v17 = vpop.permute.xlu1 %2149  ;;  %v8295_v7 = vpop.permute.xlu0 %2940 }
 0x2f7   :  { %v8297_v20 = vpop.permute.xlu1 %3682  ;;  %v8299_v39 = vpop.permute.xlu0 %2932 }
 0x2fb   :  { %v8301_v35 = vpop.permute.xlu1 %3698  ;;  %v8303_v40 = vpop.permute.xlu0 %2948 }
 0x2ff   :  { %v8305_v42 = vpop.permute.xlu1 %3408  ;;  %v2136_v55 = vpop.permute.xlu0 %2135 }
 0x300   :  { %10828 = vst [vmem:[#allocation34_spill] sm:$0xff] %v8305_v42 }
 0x303   :  { %v8307_v57 = vpop.permute.xlu1 %3424  ;;  %v2152_v59 = vpop.permute.xlu0 %2151 }
 0x304   :  { %10829 = vst [vmem:[#allocation35_spill] sm:$0xff] %v8307_v57 }
 0x307   :  { %v2142_v61 = vpop.permute.xlu1 %2141  ;;  %v8309_v8 = vpop.permute.xlu0 %3684 }
 0x308   :  { %v2173_v2 = vsel %vm98_vm4, %v2134_v34, %v2142_v61  ;;  %v2169_v41 = vsel %vm98_vm4, %v2142_v61, %v2150_v17 }
 0x309   :  { %v2182_v15 = vmul.f32 %v7652_v25, %v2173_v2 }
 0x30b   :  { %v2158_v32 = vpop.permute.xlu1 %2157  ;;  %v8311_v0 = vpop.permute.xlu0 %3700 }
 0x30c   :  { %v2177_v31 = vsel %vm98_vm4, %v2158_v32, %v2134_v34  ;;  %v2183_v34 = vmul.f32 %v7655_v26, %v2169_v41  ;;  %v2165_v18 = vsel %vm98_vm4, %v2150_v17, %v2158_v32 }
 0x30d   :  { %v2181_v5 = vmul.f32 %v7649_v24, %v2177_v31  ;;  %v2184_v56 = vmul.f32 %v7646_v23, %v2165_v18 }
 0x30f   :  { %2650 = vrot.lane.b32.xlu1 %v2181_v5, %s7527_s8  ;;  %v8319_v33 = vpop.permute.xlu1 %3690  ;;  %2197 = vrot.lane.b32.xlu0 %v2181_v5, %s7525_s30  ;;  %v8322_v46 = vpop.permute.xlu0 %3410 }
 0x310   :  { %10830 = vst [vmem:[#allocation36_spill] sm:$0xff] %v8322_v46 }
 0x313   :  { %2658 = vrot.lane.b32.xlu1 %v2182_v15, %s7527_s8  ;;  %v8328_v38 = vpop.permute.xlu1 %3706  ;;  %2205 = vrot.lane.b32.xlu0 %v2182_v15, %s7525_s30  ;;  %v8331_v31 = vpop.permute.xlu0 %3426 }
 0x314   :  { %10831 = vst [vmem:[#allocation37_spill] sm:$0xff] %v8331_v31 }
 0x317   :  { %2666 = vrot.lane.b32.xlu1 %v2183_v34, %s7527_s8  ;;  %v8337_v28 = vpop.permute.xlu1 %3416  ;;  %2213 = vrot.lane.b32.xlu0 %v2183_v34, %s7525_s30  ;;  %v2144_v2 = vpop.permute.xlu0 %2143 }
 0x318   :  { %10832 = vst [vmem:[#allocation38_spill] sm:$0xff] %v8337_v28  ;;  %v2174_v61 = vsel %vm98_vm4, %v2136_v55, %v2144_v2  ;;  %v2170_v19 = vsel %vm98_vm4, %v2144_v2, %v2152_v59 }
 0x319   :  { %v2186_v41 = vmul.f32 %v7652_v25, %v2174_v61  ;;  %v2187_v30 = vmul.f32 %v7655_v26, %v2170_v19 }
 0x31b   :  { %2674 = vrot.lane.b32.xlu1 %v2184_v56, %s7527_s8  ;;  %v8347_v32 = vpop.permute.xlu1 %3432  ;;  %2221 = vrot.lane.b32.xlu0 %v2184_v56, %s7525_s30  ;;  %v2160_v17 = vpop.permute.xlu0 %2159  ;;  %v6866_v42 = vpack.c.bf16 %v2186_v41, %v2182_v15  ;;  %v6876_v57 = vpack.c.bf16 %v2187_v30, %v2183_v34 }
 0x31c   :  { %10833 = vst [vmem:[#allocation39_spill] sm:$0xff] %v8347_v32  ;;  %v2166_v46 = vsel %vm98_vm4, %v2152_v59, %v2160_v17  ;;  %v2178_v18 = vsel %vm98_vm4, %v2160_v17, %v2136_v55 }
 0x31d   :  { %v2185_v2 = vmul.f32 %v7649_v24, %v2178_v18  ;;  %v2188_v61 = vmul.f32 %v7646_v23, %v2166_v46  ;;  %6867 = vmatprep.subr.bf16.mxu0 %v6866_v42 }
 0x31f   :  { %v8357_v28 = vpop.permute.xlu1 %2926  ;;  %2652 = vrot.lane.b32.xlu0 %v2185_v2, %s7527_s8  ;;  %2199 = vrot.lane.b32.xlu1 %v2185_v2, %s7525_s30  ;;  %v8361_v15 = vpop.permute.xlu0 %3692  ;;  %v6868_v19 = vpack.c.bf16 %v2185_v2, %v2181_v5  ;;  %v6874_v32 = vpack.c.bf16 %v2188_v61, %v2184_v56 }
 0x321   :  { %6869 = vmatpush1.bf16.msra.mxu0 %v6868_v19  ;;  %6875 = vmatprep.subr.bf16.mxu1 %v6874_v32 }
 0x322   :  { %6877 = vmatpush1.bf16.msra.mxu1 %v6876_v57 }
 0x323   :  { %v8363_v55 = vpop.permute.xlu1 %2942  ;;  %2660 = vrot.lane.b32.xlu0 %v2186_v41, %s7527_s8  ;;  %2207 = vrot.lane.b32.xlu1 %v2186_v41, %s7525_s30  ;;  %v8367_v46 = vpop.permute.xlu0 %3708 }
 0x327   :  { %v8369_v42 = vpop.permute.xlu1 %2934  ;;  %2668 = vrot.lane.b32.xlu0 %v2187_v30, %s7527_s8  ;;  %2215 = vrot.lane.b32.xlu1 %v2187_v30, %s7525_s30  ;;  %v8373_v5 = vpop.permute.xlu0 %3418 }
 0x328   :  { %10834 = vst [vmem:[#allocation40_spill] sm:$0xff] %v8373_v5 }
 0x32b   :  { %v8375_v56 = vpop.permute.xlu1 %2950  ;;  %2676 = vrot.lane.b32.xlu0 %v2188_v61, %s7527_s8  ;;  %2223 = vrot.lane.b32.xlu1 %v2188_v61, %s7525_s30  ;;  %v8379_v57 = vpop.permute.xlu0 %3434 }
 0x32c   :  { %10835 = vst [vmem:[#allocation41_spill] sm:$0xff] %v8375_v56  ;;  %10836 = vst [vmem:[#allocation42_spill] sm:$0xff] %v8379_v57 }
 0x32f   :  { %v2138_v59 = vpop.permute.xlu1 %2137  ;;  %v2140_v34 = vpop.permute.xlu0 %2139 }
 0x333   :  { %v2154_v41 = vpop.permute.xlu1 %2153  ;;  %v2156_v32 = vpop.permute.xlu0 %2155 }
 0x337   :  { %v8381_v17 = vpop.permute.xlu1 %3686  ;;  %v8383_v18 = vpop.permute.xlu0 %3688 }
 0x33b   :  { %v8385_v2 = vpop.permute.xlu1 %3702  ;;  %v8387_v30 = vpop.permute.xlu0 %3704 }
 0x33f   :  { %v8389_v19 = vpop.permute.xlu1 %2928  ;;  %v8391_v5 = vpop.permute.xlu0 %2930 }
 0x340   :  { %10837 = vst [vmem:[#allocation43_spill] sm:$0xff] %v8389_v19  ;;  %10838 = vst [vmem:[#allocation44_spill] sm:$0xff] %v8391_v5 }
 0x343   :  { %v8393_v31 = vpop.permute.xlu1 %2944  ;;  %v8395_v61 = vpop.permute.xlu0 %2946 }
 0x344   :  { %10839 = vst [vmem:[#allocation45_spill] sm:$0xff] %v8393_v31  ;;  %10840 = vst [vmem:[#allocation46_spill] sm:$0xff] %v8395_v61 }
 0x347   :  { %v8397_v57 = vpop.permute.xlu1 %3412  ;;  %v8399_v1 = vpop.permute.xlu0 %3414 }
 0x348   :  { %10841 = vst [vmem:[#allocation47_spill] sm:$0xff] %v8397_v57  ;;  %10842 = vst [vmem:[#allocation48_spill] sm:$0xff] %v8399_v1 }
 0x34b   :  { %v2146_v14 = vpop.permute.xlu1 %2145  ;;  %v2148_v3 = vpop.permute.xlu0 %2147 }
 0x34c   :  { %v2171_v44 = vsel %vm98_vm4, %v2146_v14, %v2154_v41  ;;  %v2175_v4 = vsel %vm98_vm4, %v2138_v59, %v2146_v14  ;;  %v2172_v16 = vsel %vm98_vm4, %v2148_v3, %v2156_v32  ;;  %v2176_v10 = vsel %vm98_vm4, %v2140_v34, %v2148_v3 }
 0x34d   :  { %v2190_v62 = vmul.f32 %v7652_v25, %v2175_v4  ;;  %v2194_v57 = vmul.f32 %v7652_v25, %v2176_v10  ;;  %v2191_v1 = vmul.f32 %v7655_v26, %v2171_v44  ;;  %v2195_v61 = vmul.f32 %v7655_v26, %v2172_v16 }
 0x34f   :  { %v2162_v31 = vpop.permute.xlu1 %2161  ;;  %v2164_v5 = vpop.permute.xlu0 %2163  ;;  %v6870_v19 = vpack.c.bf16 %v2194_v57, %v2190_v62 }
 0x350   :  { %v2167_v14 = vsel %vm98_vm4, %v2154_v41, %v2162_v31  ;;  %v2179_v56 = vsel %vm98_vm4, %v2162_v31, %v2138_v59  ;;  %v2168_v3 = vsel %vm98_vm4, %v2156_v32, %v2164_v5  ;;  %v2180_v4 = vsel %vm98_vm4, %v2164_v5, %v2140_v34 }
 0x351   :  { %v2189_v10 = vmul.f32 %v7649_v24, %v2179_v56  ;;  %v2192_v44 = vmul.f32 %v7646_v23, %v2167_v14  ;;  %v2193_v16 = vmul.f32 %v7649_v24, %v2180_v4  ;;  %v2196_v26 = vmul.f32 %v7646_v23, %v2168_v3  ;;  %6871 = vmatprep.subr.bf16.mxu0 %v6870_v19  ;;  %v8494_v56 = vld [vmem:[%s10670_s1 + $0x10] sm:$0xff] }
 0x352   :  { %v6880_v41 = vpack.c.bf16 %v2195_v61, %v2191_v1  ;;  %v10843_v5 = vmov 0.0   ;;  %v3723_v32 = vsel %vm1410_vm13, %v8309_v8, %v8361_v15  ;;  %v3718_v19 = vsel %vm1410_vm13, %v8319_v33, %v8301_v35 }
 0x353   :  { %2201 = vrot.lane.b32.xlu1 %v2189_v10, %s7525_s30  ;;  %2203 = vrot.lane.b32.xlu0 %v2193_v16, %s7525_s30  ;;  %v6872_v31 = vpack.c.bf16 %v2193_v16, %v2189_v10  ;;  %v6878_v59 = vpack.c.bf16 %v2196_v26, %v2192_v44  ;;  %v8519_v3 = vmul.f32 %v7785_v11, %v3718_v19 }
 0x354   :  { %v3719_v4 = vsel %vm1410_vm13, %v8361_v15, %v8311_v0 }
 0x355   :  { %6873 = vmatpush1.bf16.msra.mxu0 %v6872_v31  ;;  %6879 = vmatprep.subr.bf16.mxu1 %v6878_v59  ;;  %v3715_v31 = vsel %vm1410_vm13, %v8311_v0, %v8367_v46  ;;  %v3726_v59 = vsel %vm1410_vm13, %v8328_v38, %v8297_v20  ;;  %v3727_v0 = vsel %vm1410_vm13, %v8367_v46, %v8309_v8 }
 0x356   :  { %6881 = vmatpush1.bf16.msra.mxu1 %v6880_v41  ;;  %v8556_v41 = vmul.f32 %v7848_v37, %v3715_v31  ;;  %v8594_v31 = vld [vmem:[%s10670_s1 + $0xb8] sm:$0xff] }
 0x357   :  { %2209 = vrot.lane.b32.xlu1 %v2190_v62, %s7525_s30  ;;  %2211 = vrot.lane.b32.xlu0 %v2194_v57, %s7525_s30 }
 0x358   :  { %6758 = vmatmul.mubr.msk.f32.vlgmr.msra.gmra.mrb[8].mxu0 %vm2277_vm5, %v8223_v48 }
 0x359   :  { %6762 = vmatmul.mubr.msk.f32.vlgmr.msra.gmra.mrb[8].mxu1 %vm2277_vm5, %v8223_v48  ;;  %2356 = vmatprep.mubr.f32.mxu0 %v10843_v5  ;;  %v3695_v48 = vpop.permute.xlu1 %3694 }
 0x35a   :  { %2445 = vmatprep.mubr.f32.mxu1 %v10843_v5  ;;  %v3724_v8 = vsel %vm1410_vm13, %v8381_v17, %v3695_v48 }
 0x35b   :  { %2217 = vrot.lane.b32.xlu1 %v2191_v1, %s7525_s30  ;;  %2219 = vrot.lane.b32.xlu0 %v2195_v61, %s7525_s30  ;;  %v8589_v46 = vmul.f32 %v7781_v63, %v3724_v8 }
 0x35c   :  { %6759 = vmatmul.mubr.msk.f32.gmra.mrb[10].mxu0 %vm2277_vm5, %v8225_v49 }
 0x35d   :  { %6763 = vmatmul.mubr.msk.f32.gmra.mrb[10].mxu1 %vm2277_vm5, %v8225_v49  ;;  %2362 = vmatprep.mubr.f32.mxu0 %v10843_v5  ;;  %v8464_v49 = vpop.permute.xlu0 %3696  ;;  %10845 = vst [vmem:[#allocation50_spill] sm:$0xff] %v8589_v46 }
 0x35e   :  { %2451 = vmatprep.mubr.f32.mxu1 %v10843_v5 }
 0x35f   :  { %2225 = vrot.lane.b32.xlu1 %v2192_v44, %s7525_s30  ;;  %2227 = vrot.lane.b32.xlu0 %v2196_v26, %s7525_s30 }
 0x360   :  { %6760 = vmatmul.mubr.msk.f32.gmra.mrb[12].mxu0 %vm2277_vm5, %v8235_v53 }
 0x361   :  { %6764 = vmatmul.mubr.msk.f32.gmra.mrb[12].mxu1 %vm2277_vm5, %v8235_v53  ;;  %2368 = vmatprep.mubr.f32.mxu0 %v10843_v5  ;;  %v8467_v53 = vpop.permute.xlu1 %3710 }
 0x362   :  { %2457 = vmatprep.mubr.f32.mxu1 %v10843_v5  ;;  %v3716_v24 = vsel %vm1410_vm13, %v8385_v2, %v8467_v53 }
 0x363   :  { %2654 = vrot.lane.b32.xlu1 %v2189_v10, %s7527_s8  ;;  %2656 = vrot.lane.b32.xlu0 %v2193_v16, %s7527_s8  ;;  %v3714_v10 = vsel %vm1410_vm13, %v8301_v35, %v8328_v38 }
 0x364   :  { %6761 = vmatmul.mubr.msk.f32.gmra.mrb[14].mxu0 %vm2277_vm5, %v8237_v54  ;;  %v8541_v15 = vmul.f32 %v7848_v37, %v3714_v10 }
 0x365   :  { %6765 = vmatmul.mubr.msk.f32.gmra.mrb[14].mxu1 %vm2277_vm5, %v8237_v54  ;;  %2536 = vmatprep.mubr.f32.mxu0 %v10843_v5  ;;  %v8473_v54 = vpop.permute.xlu0 %3712 }
 0x366   :  { %2625 = vmatprep.mubr.f32.mxu1 %v10843_v5 }
 0x367   :  { %2662 = vrot.lane.b32.xlu1 %v2190_v62, %s7527_s8  ;;  %2664 = vrot.lane.b32.xlu0 %v2194_v57, %s7527_s8  ;;  %v8475_v62 = vpop.permute.xlu1 %2936 }
 0x36b   :  { %2670 = vrot.lane.b32.xlu1 %v2191_v1, %s7527_s8  ;;  %2672 = vrot.lane.b32.xlu0 %v2195_v61, %s7527_s8  ;;  %v8487_v1 = vpop.permute.xlu0 %2938  ;;  %v8496_v57 = vpop.permute.xlu1 %2952  ;;  %v8514_v61 = vmul.f32 %v7781_v63, %v3723_v32  ;;  %v8561_v32 = vmul.f32 %v7845_v36, %v3726_v59  ;;  %v3720_v59 = vsel %vm1410_vm13, %v3695_v48, %v8385_v2 }
 0x36c   :  { %v8606_v8 = vmul.f32 %v7785_v11, %v3720_v59  ;;  %v8621_v59 = vmul.f32 %v7848_v37, %v3716_v24  ;;  %v3728_v2 = vsel %vm1410_vm13, %v8467_v53, %v8381_v17 }
 0x36e   :  { %10846 = vst [vmem:[#allocation51_spill] sm:$0xff] %v8621_v59 }
 0x36f   :  { %2678 = vrot.lane.b32.xlu1 %v2192_v44, %s7527_s8  ;;  %2680 = vrot.lane.b32.xlu0 %v2196_v26, %s7527_s8  ;;  %v3722_v26 = vsel %vm1410_vm13, %v8297_v20, %v8319_v33  ;;  %v8525_v33 = vpop.permute.xlu0 %2954  ;;  %v8536_v44 = vmul.f32 %v7785_v11, %v3719_v4  ;;  %v8572_v20 = vmul.f32 %v7845_v36, %v3727_v0  ;;  %v8579_v4 = vld [vmem:[%s10670_s1 + $0x48] sm:$0xff] }
 0x370   :  { %v8499_v34 = vmul.f32 %v7781_v63, %v3722_v26  ;;  %10844 = vst [vmem:[#allocation49_spill] sm:$0xff] %v8525_v33 }
 0x373   :  { %3420 = vrot.lane.b32.xlu1 %v8244_v58, %s7527_s8  ;;  %3422 = vrot.lane.b32.xlu0 %v8247_v60, %s7527_s8 }
 0x377   :  { %3428 = vrot.lane.b32.xlu1 %v8207_v43, %s7527_s8  ;;  %3430 = vrot.lane.b32.xlu0 %v8209_v47, %s7527_s8 }
 0x37b   :  { %3436 = vrot.lane.b32.xlu1 %v8257_v12, %s7527_s8  ;;  %3438 = vrot.lane.b32.xlu0 %v8259_v13, %s7527_s8 }
 0x37f   :  { %3472 = vrot.lane.b32.xlu1 %v8494_v56, %s7529_s10  ;;  %3746 = vrot.lane.b32.xlu0 %v8499_v34, %s7525_s30 }
 0x381   :  { %v8516_v14 = vpop.permute.xlu1 %2650  ;;  %v2198_v35 = vpop.permute.xlu0 %2197 }
 0x383   :  { %3748 = vrot.lane.b32.xlu1 %v8514_v61, %s7525_s30  ;;  %3754 = vrot.lane.b32.xlu0 %v8519_v3, %s7525_s30 }
 0x385   :  { %v8538_v16 = vpop.permute.xlu1 %2658  ;;  %v2206_v38 = vpop.permute.xlu0 %2205 }
 0x386   :  { %v2237_v23 = vsel %vm115_vm7, %v2198_v35, %v2206_v38 }
 0x387   :  { %3756 = vrot.lane.b32.xlu1 %v8536_v44, %s7525_s30  ;;  %3762 = vrot.lane.b32.xlu0 %v8541_v15, %s7525_s30  ;;  %v2246_v47 = vmul.f32 %v7752_v45, %v2237_v23 }
 0x389   :  { %v8558_v26 = vpop.permute.xlu1 %2666  ;;  %v2214_v0 = vpop.permute.xlu0 %2213 }
 0x38b   :  { %3764 = vrot.lane.b32.xlu1 %v8556_v41, %s7525_s30  ;;  %3770 = vrot.lane.b32.xlu0 %v8561_v32, %s7525_s30 }
 0x38d   :  { %v8574_v19 = vpop.permute.xlu1 %2674  ;;  %v2222_v13 = vpop.permute.xlu0 %2221 }
 0x38e   :  { %v2241_v23 = vsel %vm115_vm7, %v2222_v13, %v2198_v35 }
 0x38f   :  { %3772 = vrot.lane.b32.xlu1 %v8572_v20, %s7525_s30  ;;  %3474 = vrot.lane.b32.xlu0 %v8579_v4, %s7529_s10 }
 0x391   :  { %v2200_v10 = vpop.permute.xlu1 %2199 }
 0x393   :  { %3750 = vrot.lane.b32.xlu1 %v8589_v46, %s7525_s30  ;;  %3478 = vrot.lane.b32.xlu0 %v8594_v31, %s7529_s10 }
 0x395   :  { %v2208_v25 = vpop.permute.xlu1 %2207 }
 0x396   :  { %v2238_v48 = vsel %vm115_vm7, %v2200_v10, %v2208_v25 }
 0x397   :  { %v2250_v43 = vmul.f32 %v7752_v45, %v2238_v48  ;;  %3758 = vrot.lane.b32.xlu1 %v8606_v8, %s7525_s30  ;;  %3812 = vrot.lane.b32.xlu0 %v8579_v4, %s7533_s14  ;;  %v2229_v48 = vsel %vm115_vm7, %v2214_v0, %v2222_v13  ;;  %v2245_v13 = vmul.f32 %v7758_v50, %v2241_v23 }
 0x398   :  { %v2248_v35 = vmul.f32 %v7761_v51, %v2229_v48  ;;  %v3721_v48 = vsel %vm1410_vm13, %v8464_v49, %v8387_v30 }
 0x399   :  { %v2216_v12 = vpop.permute.xlu1 %2215  ;;  %v6882_v60 = vpack.c.bf16 %v2250_v43, %v2246_v47  ;;  %v3725_v43 = vsel %vm1410_vm13, %v8383_v18, %v8464_v49  ;;  %v8642_v47 = vmul.f32 %v7845_v36, %v3728_v2  ;;  %v3729_v49 = vsel %vm1410_vm13, %v8473_v54, %v8383_v18 }
 0x39a   :  { %v2234_v24 = vsel %vm115_vm7, %v2208_v25, %v2216_v12  ;;  %v8666_v23 = vmul.f32 %v7781_v63, %v3725_v43  ;;  %v3717_v43 = vsel %vm1410_vm13, %v8387_v30, %v8473_v54  ;;  %v8699_v30 = vmul.f32 %v7845_v36, %v3729_v49 }
 0x39b   :  { %3766 = vrot.lane.b32.xlu1 %v8621_v59, %s7525_s30  ;;  %6883 = vmatprep.subr.bf16.mxu0 %v6882_v60  ;;  %10847 = vst [vmem:[#allocation52_spill] sm:$0xff] %v8642_v47  ;;  %v2233_v60 = vsel %vm115_vm7, %v2206_v38, %v2214_v0  ;;  %v2251_v58 = vmul.f32 %v7764_v52, %v2234_v24 }
 0x39c   :  { %3816 = vrot.lane.b32.xlu0 %v8594_v31, %s7533_s14  ;;  %v2247_v38 = vmul.f32 %v7764_v52, %v2233_v60  ;;  %10848 = vst [vmem:[#allocation53_spill] sm:$0xff] %v8666_v23  ;;  %10850 = vst [vmem:[#allocation55_spill] sm:$0xff] %v8699_v30 }
 0x39d   :  { %v2224_v17 = vpop.permute.xlu1 %2223 }
 0x39e   :  { %v2230_v25 = vsel %vm115_vm7, %v2216_v12, %v2224_v17  ;;  %v2242_v53 = vsel %vm115_vm7, %v2224_v17, %v2200_v10  ;;  %v8662_v12 = vld [vmem:[%s10670_s1 + $0x80] sm:$0xff]  ;;  %v6892_v24 = vpack.c.bf16 %v2251_v58, %v2247_v38  ;;  %v8688_v58 = vmul.f32 %v7848_v37, %v3717_v43  ;;  %v2653_v17 = vpop.permute.xlu0 %2652 }
 0x39f   :  { %v2249_v33 = vmul.f32 %v7758_v50, %v2242_v53  ;;  %v2252_v2 = vmul.f32 %v7761_v51, %v2230_v25  ;;  %3774 = vrot.lane.b32.xlu1 %v8642_v47, %s7525_s30 }
 0x3a0   :  { %4230 = vrot.lane.b32.xlu0 %v8499_v34, %s7527_s8  ;;  %10849 = vst [vmem:[#allocation54_spill] sm:$0xff] %v8688_v58 }
 0x3a1   :  { %v6884_v10 = vpack.c.bf16 %v2249_v33, %v2245_v13  ;;  %v6890_v0 = vpack.c.bf16 %v2252_v2, %v2248_v35  ;;  %v8677_v33 = vmul.f32 %v7785_v11, %v3721_v48 }
 0x3a2   :  { %v2661_v18 = vpop.permute.xlu0 %2660 }
 0x3a3   :  { %3476 = vrot.lane.b32.xlu1 %v8662_v12, %s7529_s10  ;;  %6885 = vmatpush1.bf16.msra.mxu0 %v6884_v10 }
 0x3a4   :  { %3752 = vrot.lane.b32.xlu0 %v8666_v23, %s7525_s30  ;;  %6891 = vmatprep.subr.bf16.mxu1 %v6890_v0 }
 0x3a5   :  { %6893 = vmatpush1.bf16.msra.mxu1 %v6892_v24 }
 0x3a6   :  { %v2669_v54 = vpop.permute.xlu0 %2668 }
 0x3a7   :  { %3810 = vrot.lane.b32.xlu1 %v8494_v56, %s7533_s14  ;;  %v2687_v24 = vsel %vm521_vm2, %v2661_v18, %v2669_v54 }
 0x3a8   :  { %3760 = vrot.lane.b32.xlu0 %v8677_v33, %s7525_s30 }
 0x3aa   :  { %v2677_v60 = vpop.permute.xlu0 %2676 }
 0x3ab   :  { %3814 = vrot.lane.b32.xlu1 %v8662_v12, %s7533_s14 }
 0x3ac   :  { %3768 = vrot.lane.b32.xlu0 %v8688_v58, %s7525_s30 }
 0x3af   :  { %4020 = vrot.lane.b32.xlu1 %v8494_v56, %s7535_s6 }
 0x3b0   :  { %3776 = vrot.lane.b32.xlu0 %v8699_v30, %s7525_s30 }
 0x3b3   :  { %4232 = vrot.lane.b32.xlu1 %v8514_v61, %s7527_s8 }
 0x3b4   :  { %4238 = vrot.lane.b32.xlu0 %v8519_v3, %s7527_s8 }
 0x3b7   :  { %4240 = vrot.lane.b32.xlu1 %v8536_v44, %s7527_s8 }
 0x3b8   :  { %4246 = vrot.lane.b32.xlu0 %v8541_v15, %s7527_s8 }
 0x3bb   :  { %4248 = vrot.lane.b32.xlu1 %v8556_v41, %s7527_s8 }
 0x3bc   :  { %4254 = vrot.lane.b32.xlu0 %v8561_v32, %s7527_s8 }
 0x3bf   :  { %4256 = vrot.lane.b32.xlu1 %v8572_v20, %s7527_s8 }
 0x3c0   :  { %4022 = vrot.lane.b32.xlu0 %v8579_v4, %s7535_s6 }
 0x3c3   :  { %4234 = vrot.lane.b32.xlu1 %v8589_v46, %s7527_s8  ;;  %v10884_v46 = vld [vmem:[#allocation11_spill] sm:$0xff] }
 0x3c4   :  { %4236 = vrot.lane.b32.xlu0 %v8666_v23, %s7527_s8 }
 0x3c5   :  { %v2202_v13 = vpop.permute.xlu1 %2201  ;;  %v2204_v25 = vpop.permute.xlu0 %2203 }
 0x3c7   :  { %4242 = vrot.lane.b32.xlu1 %v8606_v8, %s7527_s8 }
 0x3c8   :  { %4244 = vrot.lane.b32.xlu0 %v8677_v33, %s7527_s8 }
 0x3c9   :  { %v2210_v53 = vpop.permute.xlu1 %2209  ;;  %v2212_v2 = vpop.permute.xlu0 %2211 }
 0x3ca   :  { %v2239_v35 = vsel %vm115_vm7, %v2202_v13, %v2210_v53  ;;  %v2240_v10 = vsel %vm115_vm7, %v2204_v25, %v2212_v2 }
 0x3cb   :  { %v2254_v38 = vmul.f32 %v7752_v45, %v2239_v35  ;;  %4250 = vrot.lane.b32.xlu1 %v8621_v59, %s7527_s8  ;;  %v2258_v0 = vmul.f32 %v7752_v45, %v2240_v10  ;;  %v2686_v10 = vsel %vm521_vm2, %v8538_v16, %v8558_v26 }
 0x3cc   :  { %4252 = vrot.lane.b32.xlu0 %v8688_v58, %s7527_s8 }
 0x3cd   :  { %v2218_v48 = vpop.permute.xlu1 %2217  ;;  %v2220_v43 = vpop.permute.xlu0 %2219  ;;  %v6886_v49 = vpack.c.bf16 %v2258_v0, %v2254_v38  ;;  %v2703_v38 = vmul.f32 %v7819_v22, %v2687_v24  ;;  %v2695_v0 = vsel %vm521_vm2, %v2677_v60, %v2653_v17 }
 0x3ce   :  { %v2235_v35 = vsel %vm115_vm7, %v2210_v53, %v2218_v48  ;;  %v2236_v36 = vsel %vm115_vm7, %v2212_v2, %v2220_v43  ;;  %v2694_v53 = vsel %vm521_vm2, %v8574_v19, %v8516_v14  ;;  %v2691_v2 = vsel %vm521_vm2, %v2653_v17, %v2661_v18 }
 0x3cf   :  { %4258 = vrot.lane.b32.xlu1 %v8642_v47, %s7527_s8  ;;  %6887 = vmatprep.subr.bf16.mxu0 %v6886_v49  ;;  %v2255_v11 = vmul.f32 %v7764_v52, %v2235_v35  ;;  %v2259_v63 = vmul.f32 %v7764_v52, %v2236_v36  ;;  %v2683_v36 = vsel %vm521_vm2, %v2669_v54, %v2677_v60 }
 0x3d0   :  { %4260 = vrot.lane.b32.xlu0 %v8699_v30, %s7527_s8  ;;  %v2682_v54 = vsel %vm521_vm2, %v8558_v26, %v8574_v19  ;;  %v2964_v26 = vsel %vm115_vm7, %v8293_v6, %v8299_v39  ;;  %v2965_v19 = vsel %vm115_vm7, %v8357_v28, %v8369_v42 }
 0x3d1   :  { %v2226_v37 = vpop.permute.xlu1 %2225  ;;  %v2228_v59 = vpop.permute.xlu0 %2227 }
 0x3d2   :  { %v2231_v49 = vsel %vm115_vm7, %v2218_v48, %v2226_v37  ;;  %v2243_v58 = vsel %vm115_vm7, %v2226_v37, %v2202_v13  ;;  %v2232_v24 = vsel %vm115_vm7, %v2220_v43, %v2228_v59  ;;  %v2244_v17 = vsel %vm115_vm7, %v2228_v59, %v2204_v25 }
 0x3d3   :  { %v2253_v23 = vmul.f32 %v7758_v50, %v2243_v58  ;;  %v2256_v18 = vmul.f32 %v7761_v51, %v2231_v49  ;;  %4024 = vrot.lane.b32.xlu1 %v8662_v12, %s7535_s6  ;;  %v2705_v48 = vmul.f32 %v7814_v21, %v2695_v0  ;;  %v2257_v37 = vmul.f32 %v7758_v50, %v2244_v17 }
 0x3d4   :  { %v2260_v58 = vmul.f32 %v7761_v51, %v2232_v24  ;;  %4026 = vrot.lane.b32.xlu0 %v8594_v31, %s7535_s6  ;;  %v2690_v59 = vsel %vm521_vm2, %v8516_v14, %v8538_v16  ;;  %v2699_v13 = vmul.f32 %v7819_v22, %v2686_v10  ;;  %v2701_v25 = vmul.f32 %v7814_v21, %v2694_v53 }
 0x3d5   :  { %v8792_v60 = vpop.permute.xlu1 %2654  ;;  %v2702_v43 = vmul.f32 %v7827_v29, %v2691_v2  ;;  %v6888_v35 = vpack.c.bf16 %v2257_v37, %v2253_v23  ;;  %v8796_v0 = vpop.permute.xlu0 %2656  ;;  %v2704_v24 = vmul.f32 %v7822_v27, %v2683_v36  ;;  %v6896_v14 = vpack.c.bf16 %v2259_v63, %v2255_v11 }
 0x3d6   :  { %v6894_v49 = vpack.c.bf16 %v2260_v58, %v2256_v18  ;;  %v6898_v16 = vpack.c.bf16 %v2703_v38, %v2699_v13  ;;  %v2698_v10 = vmul.f32 %v7827_v29, %v2690_v59  ;;  %v6906_v17 = vpack.c.bf16 %v2705_v48, %v2701_v25  ;;  %v10851_v25 = vld [vmem:[#allocation41_spill] sm:$0xff] }
 0x3d7   :  { %6889 = vmatpush1.bf16.msra.mxu0 %v6888_v35  ;;  %v2700_v23 = vmul.f32 %v7822_v27, %v2682_v54  ;;  %v8813_v11 = vsel %vm115_vm7, %v8299_v39, %v8295_v7  ;;  %v2968_v53 = vsel %vm115_vm7, %v8303_v40, %v8293_v6  ;;  %v7508_v39 = vld [vmem:[%s10670_s1 + $0x8] sm:$0xff]  ;;  %v7536_v37 = vmov 1  }
 0x3d8   :  { %6895 = vmatprep.subr.bf16.mxu1 %v6894_v49  ;;  %6899 = vmatprep.subr.bf16.mxu0 %v6898_v16  ;;  %v6900_v2 = vpack.c.bf16 %v2702_v43, %v2698_v10  ;;  %v2973_v6 = vmul.f32 %v7752_v45, %v2964_v26  ;;  %v2956_v58 = vsel %vm115_vm7, %v8295_v7, %v8303_v40  ;;  %v7510_v10 = vld [vmem:[%s10670_s1 + $0x40] sm:$0xff] }
 0x3d9   :  { %6897 = vmatpush1.bf16.msra.mxu1 %v6896_v14  ;;  %v2663_v63 = vpop.permute.xlu1 %2662  ;;  %v2665_v38 = vpop.permute.xlu0 %2664  ;;  %v6908_v18 = vpack.c.bf16 %v2704_v24, %v2700_v23  ;;  %7494 = vset.pattern.permute.xlu1 %v7536_v37  ;;  %v2977_v59 = vmul.f32 %v7752_v45, %v2965_v19  ;;  %v8837_v13 = vmul.f32 %v7758_v50, %v2968_v53  ;;  %v10852_v53 = vld [vmem:[#allocation43_spill] sm:$0xff] }
 0x3da   :  { %6907 = vmatprep.subr.bf16.mxu1 %v6906_v17  ;;  %v2692_v36 = vsel %vm521_vm2, %v8792_v60, %v2663_v63  ;;  %v2693_v48 = vsel %vm521_vm2, %v8796_v0, %v2665_v38  ;;  %6766 = vmatmul.mubr.msk.f32.vlgmr.msra.gmra.mrb[8].mxu0 %vm2277_vm5, %v7508_v39  ;;  %v2961_v54 = vsel %vm115_vm7, %v8369_v42, %v8363_v55  ;;  %v7509_v42 = vld [vmem:[%s10671_s2] sm:$0xff] }
 0x3db   :  { %6901 = vmatpush1.bf16.msra.mxu0 %v6900_v2  ;;  %v2957_v43 = vsel %vm115_vm7, %v8363_v55, %v10851_v25  ;;  %2542 = vmatprep.mubr.f32.mxu0 %v10843_v5  ;;  %v2706_v40 = vmul.f32 %v7827_v29, %v2692_v36  ;;  %v2710_v35 = vmul.f32 %v7827_v29, %v2693_v48 }
 0x3dc   :  { %6770 = vmatmul.mubr.msk.f32.vlgmr.msra.gmra.mrb[8].mxu1 %vm2277_vm5, %v7508_v39  ;;  %4505 = vperm.xlu1 %7494, %v7509_v42   ;;  %v8857_v55 = vmul.f32 %v7761_v51, %v2956_v58  ;;  %v8867_v17 = vmul.f32 %v7764_v52, %v2961_v54  ;;  %v6914_v19 = vpack.c.bf16 %v2977_v59, %v2973_v6  ;;  %v7512_v6 = vld [vmem:[%s10671_s2 + $0x10] sm:$0xff]  ;;  %v10855_v42 = vld [vmem:[#allocation49_spill] sm:$0xff] }
 0x3dd   :  { %6909 = vmatpush1.bf16.msra.mxu1 %v6908_v18  ;;  %v2671_v7 = vpop.permute.xlu1 %2670  ;;  %v2673_v24 = vpop.permute.xlu0 %2672  ;;  %2631 = vmatprep.mubr.f32.mxu1 %v10843_v5  ;;  %v2969_v23 = vsel %vm115_vm7, %v10851_v25, %v8357_v28  ;;  %v2966_v2 = vsel %vm115_vm7, %v10852_v53, %v8475_v62  ;;  %v7511_v18 = vld [vmem:[%s10671_s2 + $0x8] sm:$0xff]  ;;  %v6904_v36 = vpack.c.bf16 %v2710_v35, %v2706_v40 }
 0x3de   :  { %v2688_v49 = vsel %vm521_vm2, %v2663_v63, %v2671_v7  ;;  %v2689_v16 = vsel %vm521_vm2, %v2665_v38, %v2673_v24  ;;  %6767 = vmatmul.mubr.msk.f32.gmra.mrb[10].mxu0 %vm2277_vm5, %v7510_v10  ;;  %7495 = vset.pattern.permute.xlu0 %v7536_v37  ;;  %v2979_v63 = vmul.f32 %v7761_v51, %v2957_v43  ;;  %v10853_v43 = vld [vmem:[#allocation44_spill] sm:$0xff] }
 0x3df   :  { %v2707_v14 = vmul.f32 %v7819_v22, %v2688_v49  ;;  %v2711_v26 = vmul.f32 %v7819_v22, %v2689_v16  ;;  %2548 = vmatprep.mubr.f32.mxu0 %v10843_v5  ;;  %4509 = vperm.xlu0 %7495, %v7511_v18   ;;  %v10854_v49 = vld [vmem:[#allocation45_spill] sm:$0xff] }
 0x3e0   :  { %6771 = vmatmul.mubr.msk.f32.gmra.mrb[10].mxu1 %vm2277_vm5, %v7510_v10  ;;  %4513 = vperm.xlu1 %7494, %v7512_v6   ;;  %v2974_v6 = vmul.f32 %v7764_v52, %v8813_v11 }
 0x3e1   :  { %v2679_v38 = vpop.permute.xlu1 %2678  ;;  %2637 = vmatprep.mubr.f32.mxu1 %v10843_v5  ;;  %v2681_v39 = vpop.permute.xlu0 %2680  ;;  %v6902_v37 = vpack.c.bf16 %v2711_v26, %v2707_v14  ;;  %v10856_v14 = vld [vmem:[#allocation46_spill] sm:$0xff]  ;;  %v2981_v26 = vmul.f32 %v7752_v45, %v2966_v2  ;;  %v7515_v2 = vld [vmem:[%s10671_s2 + $0x18] sm:$0xff] }
 0x3e2   :  { %v2684_v48 = vsel %vm521_vm2, %v2671_v7, %v2679_v38  ;;  %v2696_v28 = vsel %vm521_vm2, %v2679_v38, %v8792_v60  ;;  %v2685_v54 = vsel %vm521_vm2, %v2673_v24, %v2681_v39  ;;  %v2697_v25 = vsel %vm521_vm2, %v2681_v39, %v8796_v0  ;;  %v7513_v60 = vld [vmem:[%s10670_s1 + $0x78] sm:$0xff] }
 0x3e3   :  { %v2708_v58 = vmul.f32 %v7822_v27, %v2684_v48  ;;  %v2709_v59 = vmul.f32 %v7814_v21, %v2696_v28  ;;  %6768 = vmatmul.mubr.msk.f32.gmra.mrb[12].mxu0 %vm2277_vm5, %v7513_v60  ;;  %v2967_v7 = vsel %vm115_vm7, %v10853_v43, %v8487_v1  ;;  %v2712_v40 = vmul.f32 %v7822_v27, %v2685_v54 }
 0x3e4   :  { %v2713_v35 = vmul.f32 %v7814_v21, %v2697_v25  ;;  %6772 = vmatmul.mubr.msk.f32.gmra.mrb[12].mxu1 %vm2277_vm5, %v7513_v60  ;;  %6903 = vmatprep.subr.bf16.mxu0 %v6902_v37  ;;  %v2976_v0 = vmul.f32 %v7758_v50, %v2969_v23  ;;  %v2958_v24 = vsel %vm115_vm7, %v10854_v49, %v8496_v57  ;;  %v4680_v37 = vld [vmem:[%s10670_s1 + $0x20] sm:$0xff]  ;;  %v10857_v60 = vld [vmem:[#allocation24_spill] sm:$0xff] }
 0x3e5   :  { %v2959_v16 = vsel %vm115_vm7, %v10856_v14, %v10855_v42  ;;  %6905 = vmatpush1.bf16.msra.mxu0 %v6904_v36  ;;  %v8920_v10 = vpop.permute.xlu1 %3420  ;;  %2554 = vmatprep.mubr.f32.mxu0 %v10843_v5  ;;  %v6912_v38 = vpack.c.bf16 %v2712_v40, %v2708_v58  ;;  %v8924_v23 = vpop.permute.xlu0 %3422  ;;  %v2985_v48 = vmul.f32 %v7752_v45, %v2967_v7 }
 0x3e6   :  { %6915 = vmatprep.subr.bf16.mxu0 %v6914_v19  ;;  %2643 = vmatprep.mubr.f32.mxu1 %v10843_v5  ;;  %v6910_v18 = vpack.c.bf16 %v2713_v35, %v2709_v59  ;;  %v2970_v36 = vsel %vm115_vm7, %v8496_v57, %v10852_v53  ;;  %v2971_v28 = vsel %vm115_vm7, %v10855_v42, %v10853_v43  ;;  %v7514_v19 = vld [vmem:[%s10670_s1 + $0xb0] sm:$0xff]  ;;  %v10860_v42 = vld [vmem:[#allocation14_spill] sm:$0xff] }
 0x3e7   :  { %6769 = vmatmul.mubr.msk.f32.gmra.mrb[14].mxu0 %vm2277_vm5, %v7514_v19  ;;  %4517 = vperm.xlu1 %7494, %v7515_v2   ;;  %v2983_v39 = vmul.f32 %v7761_v51, %v2958_v24  ;;  %v2987_v57 = vmul.f32 %v7761_v51, %v2959_v16  ;;  %v6922_v53 = vpack.c.bf16 %v2979_v63, %v8857_v55  ;;  %v10859_v24 = vld [vmem:[#allocation16_spill] sm:$0xff] }
 0x3e8   :  { %6773 = vmatmul.mubr.msk.f32.gmra.mrb[14].mxu1 %vm2277_vm5, %v7514_v19  ;;  %6911 = vmatprep.subr.bf16.mxu1 %v6910_v18  ;;  %v2962_v58 = vsel %vm115_vm7, %v8475_v62, %v10854_v49  ;;  %v2963_v59 = vsel %vm115_vm7, %v8487_v1, %v10856_v14  ;;  %v6916_v55 = vpack.c.bf16 %v2976_v0, %v8837_v13  ;;  %v10858_v0 = vld [vmem:[#allocation25_spill] sm:$0xff] }
 0x3e9   :  { %6913 = vmatpush1.bf16.msra.mxu1 %v6912_v38  ;;  %v8960_v54 = vpop.permute.xlu1 %3428  ;;  %2794 = vmatprep.mubr.f32.mxu0 %v10843_v5  ;;  %v2980_v63 = vmul.f32 %v7758_v50, %v2970_v36  ;;  %v2984_v11 = vmul.f32 %v7758_v50, %v2971_v28  ;;  %v8966_v25 = vpop.permute.xlu0 %3430  ;;  %v6924_v62 = vpack.c.bf16 %v8867_v17, %v2974_v6  ;;  %v4681_v38 = vld [vmem:[%s10670_s1 + $0x58] sm:$0xff]  ;;  %v10865_v28 = vld [vmem:[#allocation28_spill] sm:$0xff] }
 0x3ea   :  { %6923 = vmatprep.subr.bf16.mxu1 %v6922_v53  ;;  %2883 = vmatprep.mubr.f32.mxu1 %v10843_v5  ;;  %v6918_v1 = vpack.c.bf16 %v2985_v48, %v2981_v26  ;;  %v2982_v43 = vmul.f32 %v7764_v52, %v2962_v58  ;;  %v2986_v13 = vmul.f32 %v7764_v52, %v2963_v59  ;;  %v10862_v18 = vld [vmem:[#allocation17_spill] sm:$0xff]  ;;  %v10863_v48 = vld [vmem:[#allocation15_spill] sm:$0xff]  ;;  %v10868_v53 = vld [vmem:[#allocation40_spill] sm:$0xff] }
 0x3eb   :  { %6774 = vmatmul.mubr.msk.f32.vlgmr.msra.gmra.mrb[8].mxu0 %vm2277_vm5, %v10857_v60  ;;  %4684 = vrot.lane.b32.xlu0 %v4680_v37, %s7529_s10  ;;  %v6926_v7 = vpack.c.bf16 %v2987_v57, %v2983_v39  ;;  %v6920_v17 = vpack.c.bf16 %v2984_v11, %v2980_v63  ;;  %v10861_v14 = vpack.c.bf16 %v10859_v24, %v10860_v42  ;;  %v10866_v39 = vld [vmem:[#allocation29_spill] sm:$0xff]  ;;  %v10869_v59 = vld [vmem:[#allocation35_spill] sm:$0xff]  ;;  %v10871_v11 = vld [vmem:[#allocation36_spill] sm:$0xff] }
 0x3ec   :  { %6917 = vmatpush1.bf16.msra.mxu0 %v6916_v55  ;;  %6778 = vmatmul.mubr.msk.f32.vlgmr.msra.gmra.mrb[8].mxu1 %vm2277_vm5, %v10857_v60  ;;  %v6928_v49 = vpack.c.bf16 %v2986_v13, %v2982_v43  ;;  %v10864_v36 = vpack.c.bf16 %v10862_v18, %v10863_v48  ;;  %v10867_v57 = vld [vmem:[#allocation37_spill] sm:$0xff]  ;;  %v10870_v55 = vld [vmem:[#allocation38_spill] sm:$0xff]  ;;  %v10877_v24 = vld [vmem:[#allocation39_spill] sm:$0xff] }
 0x3ed   :  { %6919 = vmatprep.subr.bf16.mxu0 %v6918_v1  ;;  %6925 = vmatpush1.bf16.msra.mxu1 %v6924_v62  ;;  %v8977_v40 = vpop.permute.xlu1 %3436  ;;  %v8980_v35 = vpop.permute.xlu0 %3438  ;;  %v3445_v6 = vsel %vm521_vm2, %v10868_v53, %v10867_v57  ;;  %v3444_v63 = vsel %vm521_vm2, %v10870_v55, %v10869_v59  ;;  %v10872_v62 = vld [vmem:[#allocation42_spill] sm:$0xff] }
 0x3ee   :  { %2800 = vmatprep.mubr.f32.mxu0 %v10843_v5  ;;  %6927 = vmatprep.subr.bf16.mxu1 %v6926_v7  ;;  %v3453_v60 = vsel %vm521_vm2, %v10872_v62, %v10871_v11  ;;  %v3461_v43 = vmul.f32 %v7819_v22, %v3445_v6  ;;  %v10873_v13 = vld [vmem:[#allocation30_spill] sm:$0xff] }
 0x3ef   :  { %6775 = vmatmul.mubr.msk.f32.gmra.mrb[10].mxu0 %vm2277_vm5, %v10858_v0  ;;  %2889 = vmatprep.mubr.f32.mxu1 %v10843_v5  ;;  %v10874_v7 = vld [vmem:[#allocation22_spill] sm:$0xff] }
 0x3f0   :  { %6921 = vmatpush1.bf16.msra.mxu0 %v6920_v17  ;;  %6779 = vmatmul.mubr.msk.f32.gmra.mrb[10].mxu1 %vm2277_vm5, %v10858_v0  ;;  %v10875_v17 = vld [vmem:[#allocation23_spill] sm:$0xff]  ;;  %v10879_v18 = vld [vmem:[#allocation10_spill] sm:$0xff] }
 0x3f1   :  { %6931 = vmatprep.subr.bf16.mxu0 %v10861_v14  ;;  %v8990_v16 = vpop.permute.xlu1 %3472  ;;  %6929 = vmatpush1.bf16.msra.mxu1 %v6928_v49  ;;  %v8993_v26 = vpop.permute.xlu0 %3746  ;;  %v6934_v0 = vpack.c.bf16 %v10875_v17, %v10874_v7  ;;  %v10876_v49 = vld [vmem:[#allocation34_spill] sm:$0xff]  ;;  %v10878_v14 = vld [vmem:[#allocation12_spill] sm:$0xff]  ;;  %v10883_v17 = vld [vmem:[#allocation13_spill] sm:$0xff] }
 0x3f2   :  { %2806 = vmatprep.mubr.f32.mxu0 %v10843_v5  ;;  %6939 = vmatprep.subr.bf16.mxu1 %v10864_v36  ;;  %v3452_v42 = vsel %vm521_vm2, %v10877_v24, %v10876_v49  ;;  %v10880_v48 = vpack.c.bf16 %v10878_v14, %v10879_v18  ;;  %v3463_v36 = vmul.f32 %v7814_v21, %v3453_v60  ;;  %v10887_v18 = vld [vmem:[#allocation19_spill] sm:$0xff] }
 0x3f3   :  { %6776 = vmatmul.mubr.msk.f32.gmra.mrb[12].mxu0 %vm2277_vm5, %v10865_v28  ;;  %2895 = vmatprep.mubr.f32.mxu1 %v10843_v5  ;;  %v10885_v30 = vpack.c.bf16 %v10883_v17, %v10884_v46  ;;  %v3449_v46 = vsel %vm521_vm2, %v10871_v11, %v10868_v53  ;;  %v3448_v53 = vsel %vm521_vm2, %v10876_v49, %v10870_v55 }
 0x3f4   :  { %2812 = vmatprep.mubr.f32.mxu0 %v10843_v5  ;;  %6780 = vmatmul.mubr.msk.f32.gmra.mrb[12].mxu1 %vm2277_vm5, %v10865_v28  ;;  %v10881_v28 = vld [vmem:[#allocation26_spill] sm:$0xff]  ;;  %v3441_v11 = vsel %vm521_vm2, %v10867_v57, %v10872_v62  ;;  %v3447_v55 = vsel %vm521_vm2, %v8924_v23, %v8966_v25  ;;  %v3440_v57 = vsel %vm521_vm2, %v10869_v59, %v10877_v24 }
 0x3f5   :  { %v9007_v19 = vpop.permute.xlu1 %3748  ;;  %4686 = vrot.lane.b32.xlu1 %v4681_v38, %s7529_s10  ;;  %v9010_v2 = vpop.permute.xlu0 %3754  ;;  %2901 = vmatprep.mubr.f32.mxu1 %v10843_v5  ;;  %v3456_v49 = vmul.f32 %v7827_v29, %v3448_v53  ;;  %v3462_v17 = vmul.f32 %v7822_v27, %v3441_v11  ;;  %v3443_v53 = vsel %vm521_vm2, %v8966_v25, %v8980_v35 }
 0x3f6   :  { %5068 = vrot.lane.b32.xlu0 %v4680_v37, %s7533_s14 }
 0x3f7   :  { %6777 = vmatmul.mubr.msk.f32.gmra.mrb[14].mxu0 %vm2277_vm5, %v10866_v39 }
 0x3f8   :  { %3068 = vmatprep.mubr.f32.mxu0 %v10843_v5  ;;  %6781 = vmatmul.mubr.msk.f32.gmra.mrb[14].mxu1 %vm2277_vm5, %v10866_v39  ;;  %v10882_v39 = vld [vmem:[#allocation27_spill] sm:$0xff] }
 0x3f9   :  { %v9023_v58 = vpop.permute.xlu1 %3756  ;;  %5070 = vrot.lane.b32.xlu1 %v4681_v38, %s7533_s14  ;;  %v9034_v1 = vpop.permute.xlu0 %3762  ;;  %3157 = vmatprep.mubr.f32.mxu1 %v10843_v5  ;;  %v6942_v6 = vpack.c.bf16 %v10882_v39, %v10881_v28  ;;  %v10889_v28 = vld [vmem:[#allocation20_spill] sm:$0xff]  ;;  %v10890_v39 = vld [vmem:[#allocation21_spill] sm:$0xff] }
 0x3fa   :  { %5302 = vrot.lane.b32.xlu0 %v4680_v37, %s7535_s6  ;;  %v3457_v37 = vmul.f32 %v7819_v22, %v3444_v63  ;;  %v10886_v63 = vld [vmem:[#allocation18_spill] sm:$0xff]  ;;  %v6944_v47 = vpack.c.bf16 %v10890_v39, %v10889_v28  ;;  %v10894_v28 = vld [vmem:[#allocation33_spill] sm:$0xff]  ;;  %v3458_v39 = vmul.f32 %v7822_v27, %v3440_v57 }
 0x3fb   :  { %6782 = vmatmul.mubr.msk.f32.vlgmr.msra.gmra.mrb[8].mxu0 %vm2277_vm5, %v10873_v13  ;;  %v6936_v60 = vpack.c.bf16 %v10887_v18, %v10886_v63  ;;  %v10892_v63 = vld [vmem:[#allocation47_spill] sm:$0xff]  ;;  %v10893_v18 = vld [vmem:[#allocation48_spill] sm:$0xff] }
 0x3fc   :  { %6933 = vmatpush1.bf16.msra.mxu0 %v10880_v48  ;;  %3074 = vmatprep.mubr.f32.mxu0 %v10843_v5  ;;  %v3459_v48 = vmul.f32 %v7814_v21, %v3452_v42  ;;  %v3455_v59 = vsel %vm521_vm2, %v8980_v35, %v10893_v18 }
 0x3fd   :  { %6786 = vmatmul.mubr.msk.f32.vlgmr.msra.gmra.mrb[8].mxu1 %vm2277_vm5, %v10873_v13  ;;  %6935 = vmatprep.subr.bf16.mxu0 %v6934_v0  ;;  %v9057_v7 = vpop.permute.xlu1 %3764  ;;  %v9062_v14 = vpop.permute.xlu0 %3770  ;;  %v10888_v13 = vld [vmem:[#allocation31_spill] sm:$0xff]  ;;  %v6946_v0 = vpack.c.bf16 %v3461_v43, %v3457_v37  ;;  %v3471_v11 = vmul.f32 %v7814_v21, %v3455_v59 }
 0x3fe   :  { %6941 = vmatpush1.bf16.msra.mxu1 %v10885_v30  ;;  %3163 = vmatprep.mubr.f32.mxu1 %v10843_v5  ;;  %v6954_v30 = vpack.c.bf16 %v3463_v36, %v3459_v48  ;;  %v5472_v37 = vld [vmem:[%s10670_s1 + $0x28] sm:$0xff]  ;;  %v3460_v36 = vmul.f32 %v7827_v29, %v3449_v46  ;;  %v3451_v48 = vsel %vm521_vm2, %v10893_v18, %v8924_v23 }
 0x3ff   :  { %6943 = vmatprep.subr.bf16.mxu1 %v6942_v6  ;;  %6783 = vmatmul.mubr.msk.f32.gmra.mrb[10].mxu0 %vm2277_vm5, %v10888_v13  ;;  %v3446_v6 = vsel %vm521_vm2, %v8920_v10, %v8960_v54  ;;  %v3787_v23 = vsel %vm115_vm7, %v9007_v19, %v9023_v58 }
 0x400   :  { %6937 = vmatpush1.bf16.msra.mxu0 %v6936_v60  ;;  %3080 = vmatprep.mubr.f32.mxu0 %v10843_v5  ;;  %v3450_v60 = vsel %vm521_vm2, %v10892_v63, %v8920_v10  ;;  %v6948_v46 = vpack.c.bf16 %v3460_v36, %v3456_v49  ;;  %v3442_v10 = vsel %vm521_vm2, %v8960_v54, %v8977_v40 }
 0x401   :  { %6787 = vmatmul.mubr.msk.f32.gmra.mrb[10].mxu1 %vm2277_vm5, %v10888_v13  ;;  %6947 = vmatprep.subr.bf16.mxu0 %v6946_v0  ;;  %v9079_v42 = vpop.permute.xlu1 %3772  ;;  %v9081_v43 = vpop.permute.xlu0 %3474  ;;  %v3465_v13 = vmul.f32 %v7819_v22, %v3446_v6  ;;  %v3469_v0 = vmul.f32 %v7819_v22, %v3447_v55  ;;  %v3786_v36 = vsel %vm115_vm7, %v8993_v26, %v9010_v2 }
 0x402   :  { %6945 = vmatpush1.bf16.msra.mxu1 %v6944_v47  ;;  %3169 = vmatprep.mubr.f32.mxu1 %v10843_v5  ;;  %v10891_v47 = vld [vmem:[#allocation32_spill] sm:$0xff]  ;;  %v3779_v25 = vsel %vm115_vm7, %v9057_v7, %v9079_v42  ;;  %v6956_v6 = vpack.c.bf16 %v3462_v17, %v3458_v39  ;;  %v3466_v57 = vmul.f32 %v7822_v27, %v3442_v10 }
 0x403   :  { %6955 = vmatprep.subr.bf16.mxu1 %v6954_v30  ;;  %6784 = vmatmul.mubr.msk.f32.gmra.mrb[12].mxu0 %vm2277_vm5, %v10891_v47  ;;  %v6950_v55 = vpack.c.bf16 %v3469_v0, %v3465_v13  ;;  %v3470_v49 = vmul.f32 %v7822_v27, %v3443_v53  ;;  %v3795_v17 = vmul.f32 %v7752_v45, %v3786_v36 }
 0x404   :  { %3086 = vmatprep.mubr.f32.mxu0 %v10843_v5  ;;  %5304 = vrot.lane.b32.xlu1 %v4681_v38, %s7535_s6  ;;  %v3454_v38 = vsel %vm521_vm2, %v8977_v40, %v10892_v63  ;;  %v3464_v40 = vmul.f32 %v7827_v29, %v3450_v60  ;;  %v3778_v63 = vsel %vm115_vm7, %v9034_v1, %v9062_v14 }
 0x405   :  { %6788 = vmatmul.mubr.msk.f32.gmra.mrb[12].mxu1 %vm2277_vm5, %v10891_v47  ;;  %v9114_v62 = vpop.permute.xlu1 %3750  ;;  %5706 = vrot.lane.b32.xlu0 %v5472_v37, %s7529_s10  ;;  %v9127_v24 = vpop.permute.xlu0 %3478  ;;  %v3467_v30 = vmul.f32 %v7814_v21, %v3454_v38  ;;  %v3468_v47 = vmul.f32 %v7827_v29, %v3451_v48  ;;  %v3801_v38 = vmul.f32 %v7761_v51, %v3779_v25 }
 0x406   :  { %3175 = vmatprep.mubr.f32.mxu1 %v10843_v5  ;;  %v3797_v13 = vmul.f32 %v7761_v51, %v3778_v63  ;;  %v3791_v10 = vsel %vm115_vm7, %v9079_v42, %v9007_v19  ;;  %v3782_v53 = vsel %vm115_vm7, %v9010_v2, %v9034_v1 }
 0x407   :  { %6785 = vmatmul.mubr.msk.f32.gmra.mrb[14].mxu0 %vm2277_vm5, %v10894_v28  ;;  %v6958_v18 = vpack.c.bf16 %v3471_v11, %v3467_v30  ;;  %v6952_v60 = vpack.c.bf16 %v3468_v47, %v3464_v40  ;;  %v3798_v42 = vmul.f32 %v7758_v50, %v3791_v10  ;;  %v3796_v2 = vmul.f32 %v7764_v52, %v3782_v53  ;;  %v10898_v53 = vld [vmem:[#allocation53_spill] sm:$0xff] }
 0x408   :  { %3278 = vmatprep.mubr.f32.mxu0 %v10843_v5 }
 0x409   :  { %6789 = vmatmul.mubr.msk.f32.gmra.mrb[14].mxu1 %vm2277_vm5, %v10894_v28  ;;  %v9160_v54 = vpop.permute.xlu1 %3758  ;;  %6004 = vrot.lane.b32.xlu0 %v5472_v37, %s7533_s14  ;;  %v9173_v35 = vpop.permute.xlu0 %3812  ;;  %v3799_v37 = vmul.f32 %v7752_v45, %v3787_v23  ;;  %v6960_v28 = vpack.c.bf16 %v3470_v49, %v3466_v57  ;;  %v3790_v23 = vsel %vm115_vm7, %v9062_v14, %v8993_v26 }
 0x40a   :  { %3367 = vmatprep.mubr.f32.mxu1 %v10843_v5  ;;  %v3794_v26 = vmul.f32 %v7758_v50, %v3790_v23  ;;  %v6986_v23 = vpack.c.bf16 %v8572_v20, %v8561_v32  ;;  %v6988_v32 = vpack.c.bf16 %v8556_v41, %v8541_v15  ;;  %v10896_v20 = vld [vmem:[#allocation55_spill] sm:$0xff] }
 0x40b   :  { %6790 = vmatmul.mubr.msk.f32.vlgmr.msra.gmra.mrb[8].mxu0 %vm2277_vm5, %v8494_v56  ;;  %v6962_v0 = vpack.c.bf16 %v3799_v37, %v3795_v17 }
 0x40c   :  { %6949 = vmatpush1.bf16.msra.mxu0 %v6948_v46  ;;  %3284 = vmatprep.mubr.f32.mxu0 %v10843_v5  ;;  %v6964_v1 = vpack.c.bf16 %v3798_v42, %v3794_v26  ;;  %v6980_v42 = vpack.c.bf16 %v8514_v61, %v8499_v34  ;;  %v10895_v61 = vld [vmem:[#allocation52_spill] sm:$0xff] }
 0x40d   :  { %6794 = vmatmul.mubr.msk.f32.vlgmr.msra.gmra.mrb[8].mxu1 %vm2277_vm5, %v8494_v56  ;;  %6951 = vmatprep.subr.bf16.mxu0 %v6950_v55  ;;  %v9190_v59 = vpop.permute.xlu1 %3766  ;;  %v6970_v56 = vpack.c.bf16 %v3801_v38, %v3797_v13 }
 0x40e   :  { %6957 = vmatpush1.bf16.msra.mxu1 %v6956_v6  ;;  %v9192_v48 = vpop.permute.xlu0 %3816  ;;  %3373 = vmatprep.mubr.f32.mxu1 %v10843_v5 }
 0x40f   :  { %6959 = vmatprep.subr.bf16.mxu1 %v6958_v18  ;;  %6791 = vmatmul.mubr.msk.f32.gmra.mrb[10].mxu0 %vm2277_vm5, %v8579_v4 }
 0x410   :  { %6953 = vmatpush1.bf16.msra.mxu0 %v6952_v60  ;;  %3290 = vmatprep.mubr.f32.mxu0 %v10843_v5 }
 0x411   :  { %6795 = vmatmul.mubr.msk.f32.gmra.mrb[10].mxu1 %vm2277_vm5, %v8579_v4  ;;  %6963 = vmatprep.subr.bf16.mxu0 %v6962_v0  ;;  %v3775_v39 = vpop.permute.xlu1 %3774  ;;  %v3783_v4 = vsel %vm115_vm7, %v9023_v58, %v9057_v7 }
 0x412   :  { %6961 = vmatpush1.bf16.msra.mxu1 %v6960_v28  ;;  %v9201_v46 = vpop.permute.xlu0 %4230  ;;  %3379 = vmatprep.mubr.f32.mxu1 %v10843_v5  ;;  %v3800_v58 = vmul.f32 %v7764_v52, %v3783_v4  ;;  %v3792_v37 = vsel %vm115_vm7, %v3775_v39, %v9114_v62 }
 0x413   :  { %6971 = vmatprep.subr.bf16.mxu1 %v6970_v56  ;;  %6792 = vmatmul.mubr.msk.f32.gmra.mrb[12].mxu0 %vm2277_vm5, %v8662_v12  ;;  %v3802_v63 = vmul.f32 %v7758_v50, %v3792_v37 }
 0x414   :  { %3296 = vmatprep.mubr.f32.mxu0 %v10843_v5  ;;  %v6972_v40 = vpack.c.bf16 %v3800_v58, %v3796_v2 }
 0x415   :  { %6796 = vmatmul.mubr.msk.f32.gmra.mrb[12].mxu1 %vm2277_vm5, %v8662_v12  ;;  %v3477_v19 = vpop.permute.xlu1 %3476  ;;  %v3788_v12 = vsel %vm115_vm7, %v9114_v62, %v9160_v54  ;;  %v3784_v62 = vsel %vm115_vm7, %v9160_v54, %v9190_v59 }
 0x416   :  { %v3753_v30 = vpop.permute.xlu0 %3752  ;;  %3385 = vmatprep.mubr.f32.mxu1 %v10843_v5  ;;  %v3803_v47 = vmul.f32 %v7752_v45, %v3788_v12  ;;  %v10899_v12 = vld [vmem:[#allocation51_spill] sm:$0xff] }
 0x417   :  { %6793 = vmatmul.mubr.msk.f32.gmra.mrb[14].mxu0 %vm2277_vm5, %v8594_v31 }
 0x418   :  { %3552 = vmatprep.mubr.f32.mxu0 %v10843_v5 }
 0x419   :  { %6797 = vmatmul.mubr.msk.f32.gmra.mrb[14].mxu1 %vm2277_vm5, %v8594_v31  ;;  %v9238_v7 = vpop.permute.xlu1 %3810 }
 0x41a   :  { %v3761_v14 = vpop.permute.xlu0 %3760  ;;  %3641 = vmatprep.mubr.f32.mxu1 %v10843_v5 }
 0x41b   :  { %v3789_v11 = vsel %vm115_vm7, %v3753_v30, %v3761_v14  ;;  %6798 = vmatmul.mubr.msk.f32.vlgmr.msra.gmra.mrb[8].mxu0 %vm2277_vm5, %v8990_v16 }
 0x41c   :  { %v3807_v36 = vmul.f32 %v7752_v45, %v3789_v11  ;;  %6965 = vmatpush1.bf16.msra.mxu0 %v6964_v1  ;;  %3558 = vmatprep.mubr.f32.mxu0 %v10843_v5 }
 0x41d   :  { %6802 = vmatmul.mubr.msk.f32.vlgmr.msra.gmra.mrb[8].mxu1 %vm2277_vm5, %v8990_v16  ;;  %v9251_v31 = vpop.permute.xlu1 %3814  ;;  %v3780_v16 = vsel %vm115_vm7, %v9190_v59, %v3775_v39  ;;  %v3804_v59 = vmul.f32 %v7764_v52, %v3784_v62  ;;  %v6978_v39 = vpack.c.bf16 %v8536_v44, %v8519_v3  ;;  %v6982_v3 = vpack.c.bf16 %v8677_v33, %v8606_v8 }
 0x41e   :  { %6973 = vmatpush1.bf16.msra.mxu1 %v6972_v40  ;;  %v3769_v25 = vpop.permute.xlu0 %3768  ;;  %3647 = vmatprep.mubr.f32.mxu1 %v10843_v5  ;;  %v6966_v6 = vpack.c.bf16 %v3807_v36, %v3803_v47 }
 0x41f   :  { %6799 = vmatmul.mubr.msk.f32.gmra.mrb[10].mxu0 %vm2277_vm5, %v9081_v43  ;;  %v3785_v55 = vsel %vm115_vm7, %v3761_v14, %v3769_v25 }
 0x420   :  { %6967 = vmatprep.subr.bf16.mxu0 %v6966_v6  ;;  %3564 = vmatprep.mubr.f32.mxu0 %v10843_v5  ;;  %v3808_v18 = vmul.f32 %v7764_v52, %v3785_v55 }
 0x421   :  { %6803 = vmatmul.mubr.msk.f32.gmra.mrb[10].mxu1 %vm2277_vm5, %v9081_v43  ;;  %v9267_v57 = vpop.permute.xlu1 %4020  ;;  %v3805_v43 = vmul.f32 %v7761_v51, %v3780_v16 }
 0x422   :  { %v3777_v49 = vpop.permute.xlu0 %3776  ;;  %3653 = vmatprep.mubr.f32.mxu1 %v10843_v5  ;;  %v6976_v10 = vpack.c.bf16 %v3808_v18, %v3804_v59 }
 0x423   :  { %v3781_v17 = vsel %vm115_vm7, %v3769_v25, %v3777_v49  ;;  %v3793_v38 = vsel %vm115_vm7, %v3777_v49, %v3753_v30  ;;  %6800 = vmatmul.mubr.msk.f32.gmra.mrb[12].mxu0 %vm2277_vm5, %v3477_v19  ;;  %v10897_v30 = vld [vmem:[#allocation50_spill] sm:$0xff] }
 0x424   :  { %v3806_v60 = vmul.f32 %v7758_v50, %v3793_v38  ;;  %v3809_v13 = vmul.f32 %v7761_v51, %v3781_v17  ;;  %3570 = vmatprep.mubr.f32.mxu0 %v10843_v5  ;;  %v6984_v58 = vpack.c.bf16 %v10898_v53, %v10897_v30 }
 0x425   :  { %6804 = vmatmul.mubr.msk.f32.gmra.mrb[12].mxu1 %vm2277_vm5, %v3477_v19  ;;  %v4233_v54 = vpop.permute.xlu1 %4232 }
 0x426   :  { %v6968_v0 = vpack.c.bf16 %v3806_v60, %v3802_v63  ;;  %v4239_v28 = vpop.permute.xlu0 %4238  ;;  %3659 = vmatprep.mubr.f32.mxu1 %v10843_v5  ;;  %v6974_v56 = vpack.c.bf16 %v3809_v13, %v3805_v43 }
 0x427   :  { %6801 = vmatmul.mubr.msk.f32.gmra.mrb[14].mxu0 %vm2277_vm5, %v9127_v24 }
 0x428   :  { %6969 = vmatpush1.bf16.msra.mxu0 %v6968_v0  ;;  %6975 = vmatprep.subr.bf16.mxu1 %v6974_v56 }
 0x429   :  { %6805 = vmatmul.mubr.msk.f32.gmra.mrb[14].mxu1 %vm2277_vm5, %v9127_v24  ;;  %6979 = vmatprep.subr.bf16.mxu0 %v6978_v39  ;;  %v4241_v4 = vpop.permute.xlu1 %4240  ;;  %v6990_v24 = vpack.c.bf16 %v10896_v20, %v10895_v61 }
 0x42a   :  { %6977 = vmatpush1.bf16.msra.mxu1 %v6976_v10  ;;  %3890 = vmatprep.mubr.f32.mxu0 %v10843_v5  ;;  %v4247_v19 = vpop.permute.xlu0 %4246  ;;  %v4271_v47 = vsel %vm521_vm2, %v4233_v54, %v4241_v4 }
 0x42b   :  { %6987 = vmatprep.subr.bf16.mxu1 %v6986_v23  ;;  %6806 = vmatmul.mubr.msk.f32.vlgmr.msra.gmra.mrb[8].mxu0 %vm2277_vm5, %v9238_v7  ;;  %v4266_v44 = vsel %vm521_vm2, %v4239_v28, %v4247_v19  ;;  %v4282_v55 = vmul.f32 %v7827_v29, %v4271_v47 }
 0x42c   :  { %3979 = vmatprep.mubr.f32.mxu1 %v10843_v5  ;;  %6981 = vmatpush1.bf16.msra.mxu0 %v6980_v42  ;;  %v4279_v15 = vmul.f32 %v7819_v22, %v4266_v44 }
 0x42d   :  { %6810 = vmatmul.mubr.msk.f32.vlgmr.msra.gmra.mrb[8].mxu1 %vm2277_vm5, %v9238_v7  ;;  %6983 = vmatprep.subr.bf16.mxu0 %v6982_v3  ;;  %v4249_v34 = vpop.permute.xlu1 %4248  ;;  %v10900_v7 = vld [vmem:[#allocation54_spill] sm:$0xff] }
 0x42e   :  { %6989 = vmatpush1.bf16.msra.mxu1 %v6988_v32  ;;  %v4267_v8 = vsel %vm521_vm2, %v4241_v4, %v4249_v34  ;;  %3896 = vmatprep.mubr.f32.mxu0 %v10843_v5  ;;  %v4255_v33 = vpop.permute.xlu0 %4254  ;;  %v6992_v2 = vpack.c.bf16 %v10900_v7, %v10899_v12  ;;  %v9433_v12 = vld [vmem:[%s10670_s1 + $0x60] sm:$0xff] }
 0x42f   :  { %v4283_v41 = vmul.f32 %v7819_v22, %v4267_v8  ;;  %6991 = vmatprep.subr.bf16.mxu1 %v6990_v24  ;;  %6807 = vmatmul.mubr.msk.f32.gmra.mrb[10].mxu0 %vm2277_vm5, %v9173_v35  ;;  %v4274_v26 = vsel %vm521_vm2, %v4255_v33, %v9201_v46  ;;  %v4262_v62 = vsel %vm521_vm2, %v4247_v19, %v4255_v33 }
 0x430   :  { %3985 = vmatprep.mubr.f32.mxu1 %v10843_v5  ;;  %6985 = vmatpush1.bf16.msra.mxu0 %v6984_v58  ;;  %v4281_v36 = vmul.f32 %v7814_v21, %v4274_v26  ;;  %v4280_v38 = vmul.f32 %v7822_v27, %v4262_v62  ;;  %v4294_v58 = vld [vmem:[%s10670_s1 + $0x18] sm:$0xff]  ;;  %v4297_v26 = vld [vmem:[%s10670_s1 + $0xc0] sm:$0xff] }
 0x431   :  { %6811 = vmatmul.mubr.msk.f32.gmra.mrb[10].mxu1 %vm2277_vm5, %v9173_v35  ;;  %v4257_v1 = vpop.permute.xlu1 %4256  ;;  %3902 = vmatprep.mubr.f32.mxu0 %v10843_v5  ;;  %v6994_v14 = vpack.c.bf16 %v4283_v41, %v4279_v15  ;;  %v4270_v35 = vsel %vm521_vm2, %v9201_v46, %v4239_v28  ;;  %v4295_v15 = vld [vmem:[%s10670_s1 + $0x50] sm:$0xff]  ;;  %v4296_v41 = vld [vmem:[%s10670_s1 + $0x88] sm:$0xff] }
 0x432   :  { %6993 = vmatpush1.bf16.msra.mxu1 %v6992_v2  ;;  %v4275_v11 = vsel %vm521_vm2, %v4257_v1, %v4233_v54  ;;  %v4023_v40 = vpop.permute.xlu0 %4022  ;;  %3991 = vmatprep.mubr.f32.mxu1 %v10843_v5  ;;  %v4263_v6 = vsel %vm521_vm2, %v4249_v34, %v4257_v1  ;;  %v4278_v46 = vmul.f32 %v7827_v29, %v4270_v35 }
 0x433   :  { %v4285_v25 = vmul.f32 %v7814_v21, %v4275_v11  ;;  %6808 = vmatmul.mubr.msk.f32.gmra.mrb[12].mxu0 %vm2277_vm5, %v9251_v31  ;;  %6995 = vmatprep.subr.bf16.mxu0 %v6994_v14  ;;  %v4284_v63 = vmul.f32 %v7822_v27, %v4263_v6 }
 0x434   :  { %3908 = vmatprep.mubr.f32.mxu0 %v10843_v5  ;;  %v6996_v17 = vpack.c.bf16 %v4282_v55, %v4278_v46  ;;  %5708 = vrot.lane.b32.xlu1 %v9433_v12, %s7529_s10 }
 0x435   :  { %6812 = vmatmul.mubr.msk.f32.gmra.mrb[12].mxu1 %vm2277_vm5, %v9251_v31  ;;  %v4235_v37 = vpop.permute.xlu1 %4234  ;;  %v7002_v16 = vpack.c.bf16 %v4285_v25, %v4281_v36  ;;  %v7004_v13 = vpack.c.bf16 %v4284_v63, %v4280_v38 }
 0x436   :  { %v4237_v49 = vpop.permute.xlu0 %4236  ;;  %3997 = vmatprep.mubr.f32.mxu1 %v10843_v5 }
 0x437   :  { %6809 = vmatmul.mubr.msk.f32.gmra.mrb[14].mxu0 %vm2277_vm5, %v9192_v48  ;;  %7003 = vmatprep.subr.bf16.mxu1 %v7002_v16 }
 0x438   :  { %4100 = vmatprep.mubr.f32.mxu0 %v10843_v5 }
 0x439   :  { %6813 = vmatmul.mubr.msk.f32.gmra.mrb[14].mxu1 %vm2277_vm5, %v9192_v48  ;;  %v4243_v31 = vpop.permute.xlu1 %4242 }
 0x43a   :  { %v4245_v43 = vpop.permute.xlu0 %4244  ;;  %4189 = vmatprep.mubr.f32.mxu1 %v10843_v5  ;;  %v4272_v18 = vsel %vm521_vm2, %v4235_v37, %v4243_v31 }
 0x43b   :  { %v4273_v60 = vsel %vm521_vm2, %v4237_v49, %v4245_v43  ;;  %6814 = vmatmul.mubr.msk.f32.vlgmr.msra.gmra.mrb[8].mxu0 %vm2277_vm5, %v9267_v57  ;;  %v4286_v54 = vmul.f32 %v7827_v29, %v4272_v18 }
 0x43c   :  { %6997 = vmatpush1.bf16.msra.mxu0 %v6996_v17  ;;  %4106 = vmatprep.mubr.f32.mxu0 %v10843_v5  ;;  %v4290_v59 = vmul.f32 %v7827_v29, %v4273_v60 }
 0x43d   :  { %6818 = vmatmul.mubr.msk.f32.vlgmr.msra.gmra.mrb[8].mxu1 %vm2277_vm5, %v9267_v57  ;;  %v4251_v48 = vpop.permute.xlu1 %4250 }
 0x43e   :  { %7005 = vmatpush1.bf16.msra.mxu1 %v7004_v13  ;;  %v4268_v0 = vsel %vm521_vm2, %v4243_v31, %v4251_v48  ;;  %v4253_v28 = vpop.permute.xlu0 %4252  ;;  %4195 = vmatprep.mubr.f32.mxu1 %v10843_v5  ;;  %v7000_v4 = vpack.c.bf16 %v4290_v59, %v4286_v54 }
 0x43f   :  { %v4287_v56 = vmul.f32 %v7819_v22, %v4268_v0  ;;  %v4269_v39 = vsel %vm521_vm2, %v4245_v43, %v4253_v28  ;;  %6815 = vmatmul.mubr.msk.f32.gmra.mrb[10].mxu0 %vm2277_vm5, %v4023_v40 }
 0x440   :  { %v4291_v57 = vmul.f32 %v7819_v22, %v4269_v39  ;;  %4112 = vmatprep.mubr.f32.mxu0 %v10843_v5 }
 0x441   :  { %6819 = vmatmul.mubr.msk.f32.gmra.mrb[10].mxu1 %vm2277_vm5, %v4023_v40  ;;  %v4259_v10 = vpop.permute.xlu1 %4258 }
 0x442   :  { %v4264_v23 = vsel %vm521_vm2, %v4251_v48, %v4259_v10  ;;  %v4276_v19 = vsel %vm521_vm2, %v4259_v10, %v4235_v37  ;;  %v4261_v42 = vpop.permute.xlu0 %4260  ;;  %v6998_v3 = vpack.c.bf16 %v4291_v57, %v4287_v56  ;;  %4201 = vmatprep.mubr.f32.mxu1 %v10843_v5 }
 0x443   :  { %v4288_v44 = vmul.f32 %v7822_v27, %v4264_v23  ;;  %v4289_v32 = vmul.f32 %v7814_v21, %v4276_v19  ;;  %v4265_v34 = vsel %vm521_vm2, %v4253_v28, %v4261_v42  ;;  %v4277_v61 = vsel %vm521_vm2, %v4261_v42, %v4237_v49 }
 0x444   :  { %v4292_v20 = vmul.f32 %v7822_v27, %v4265_v34  ;;  %v4293_v24 = vmul.f32 %v7814_v21, %v4277_v61  ;;  %6999 = vmatprep.subr.bf16.mxu0 %v6998_v3 }
 0x445   :  { %7001 = vmatpush1.bf16.msra.mxu0 %v7000_v4  ;;  %v4025_v8 = vpop.permute.xlu1 %4024 }
 0x446   :  { %v7008_v33 = vpack.c.bf16 %v4292_v20, %v4288_v44  ;;  %6816 = vmatmul.mubr.msk.f32.gmra.mrb[12].mxu0 %vm2277_vm5, %v4025_v8  ;;  %6820 = vmatmul.mubr.msk.f32.gmra.mrb[12].mxu1 %vm2277_vm5, %v4025_v8  ;;  %v7006_v30 = vpack.c.bf16 %v4293_v24, %v4289_v32  ;;  %v4027_v53 = vpop.permute.xlu0 %4026 }
 0x447   :  { %4118 = vmatprep.mubr.f32.mxu0 %v10843_v5  ;;  %4207 = vmatprep.mubr.f32.mxu1 %v10843_v5 }
 0x448   :  { %7007 = vmatprep.subr.bf16.mxu1 %v7006_v30 }
 0x449   :  { %7009 = vmatpush1.bf16.msra.mxu1 %v7008_v33 }
 0x44a   :  { %6817 = vmatmul.mubr.msk.f32.gmra.mrb[14].mxu0 %vm2277_vm5, %v4027_v53  ;;  %6821 = vmatmul.mubr.msk.f32.gmra.mrb[14].mxu1 %vm2277_vm5, %v4027_v53 }
 0x44b   :  { %4374 = vmatprep.mubr.f32.mxu0 %v10843_v5  ;;  %4463 = vmatprep.mubr.f32.mxu1 %v10843_v5 }
 0x44e   :  { %6822 = vmatmul.mubr.msk.f32.vlgmr.msra.gmra.mrb[8].mxu0 %vm2277_vm5, %v4294_v58  ;;  %6826 = vmatmul.mubr.msk.f32.vlgmr.msra.gmra.mrb[8].mxu1 %vm2277_vm5, %v4294_v58 }
 0x44f   :  { %4380 = vmatprep.mubr.f32.mxu0 %v10843_v5  ;;  %4469 = vmatprep.mubr.f32.mxu1 %v10843_v5 }
 0x452   :  { %6823 = vmatmul.mubr.msk.f32.gmra.mrb[10].mxu0 %vm2277_vm5, %v4295_v15  ;;  %6827 = vmatmul.mubr.msk.f32.gmra.mrb[10].mxu1 %vm2277_vm5, %v4295_v15 }
 0x453   :  { %4386 = vmatprep.mubr.f32.mxu0 %v10843_v5  ;;  %4475 = vmatprep.mubr.f32.mxu1 %v10843_v5 }
 0x456   :  { %6824 = vmatmul.mubr.msk.f32.gmra.mrb[12].mxu0 %vm2277_vm5, %v4296_v41  ;;  %6828 = vmatmul.mubr.msk.f32.gmra.mrb[12].mxu1 %vm2277_vm5, %v4296_v41 }
 0x457   :  { %4392 = vmatprep.mubr.f32.mxu0 %v10843_v5  ;;  %4481 = vmatprep.mubr.f32.mxu1 %v10843_v5 }
 0x45a   :  { %6825 = vmatmul.mubr.msk.f32.gmra.mrb[14].mxu0 %vm2277_vm5, %v4297_v26  ;;  %6829 = vmatmul.mubr.msk.f32.gmra.mrb[14].mxu1 %vm2277_vm5, %v4297_v26 }
 0x45b   :  { %4756 = vmatprep.mubr.f32.mxu0 %v10843_v5  ;;  %4833 = vmatprep.mubr.f32.mxu1 %v10843_v5  ;;  %v4506_v7 = vpop.permute.xlu1 %4505 }
 0x45e   :  { %v4510_v47 = vpop.permute.xlu0 %4509 }
 0x45f   :  { %v4514_v3 = vpop.permute.xlu1 %4513 }
 0x462   :  { %v9561_v53 = vpop.permute.xlu0 %4684 }
 0x466   :  { %v4518_v44 = vpop.permute.xlu1 %4517 }
 0x468   :  { %v9569_v26 = vpop.permute.xlu0 %5068 }
 0x469   :  { %10913 = vst [vmem:[#allocation28_spill] sm:$0xff] %v9569_v26 }
 0x46a   :  { %v9567_v41 = vpop.permute.xlu1 %4686 }
 0x521   :  { %v4376_v2 = vpop.f32.mrb[8].mxu0  ;;  %v4465_v1 = vpop.f32.mrb[8].mxu1 }
 0x522   :  { %v4520_v14 = vadd.f32 %v4506_v7, %v4376_v2  ;;  %v4378_v11 = vpop.f32.mrb[9].mxu0  ;;  %v4467_v40 = vpop.f32.mrb[9].mxu1  ;;  %v4522_v25 = vadd.f32 %v4506_v7, %v4465_v1 }
 0x523   :  { %v4521_v35 = vadd.f32 %v4506_v7, %v4378_v11  ;;  %v4523_v6 = vadd.f32 %v4506_v7, %v4467_v40  ;;  %v9585_v11 = vpop.permute.xlu1 %5070  ;;  %v9587_v40 = vpop.permute.xlu0 %5302 }
 0x524   :  { %v9437_v36 = vmax.f32 %v4520_v14, 0.0  ;;  %v9443_v17 = vmax.f32 %v4522_v25, 0.0  ;;  %10916 = vst [vmem:[#allocation40_spill] sm:$0xff] %v9585_v11  ;;  %10917 = vst [vmem:[#allocation35_spill] sm:$0xff] %v9587_v40 }
 0x525   :  { %v4382_v37 = vpop.f32.mrb[10].mxu0  ;;  %v4471_v16 = vpop.f32.mrb[10].mxu1  ;;  %v9449_v18 = vmax.f32 %v4521_v35, 0.0  ;;  %v9451_v60 = vmax.f32 %v4523_v6, 0.0 }
 0x526   :  { %10901 = vst [vmem:[#allocation41_spill] sm:$0xff] %v9437_v36  ;;  %v4524_v55 = vadd.f32 %v4510_v47, %v4382_v37  ;;  %v4526_v49 = vadd.f32 %v4510_v47, %v4471_v16  ;;  %v4473_v62 = vpop.f32.mrb[11].mxu1  ;;  %5642 = vrot.lane.b32.xlu1 %v9437_v36, %s7527_s8  ;;  %4552 = vrot.lane.b32.xlu0 %v9437_v36, %s7523_s19  ;;  %v4384_v46 = vpop.f32.mrb[11].mxu0  ;;  %10902 = vst [vmem:[#allocation43_spill] sm:$0xff] %v9443_v17 }
 0x527   :  { %v4527_v63 = vadd.f32 %v4510_v47, %v4473_v62  ;;  %v4525_v31 = vadd.f32 %v4510_v47, %v4384_v46  ;;  %10905 = vst [vmem:[#allocation49_spill] sm:$0xff] %v9449_v18  ;;  %10906 = vst [vmem:[#allocation46_spill] sm:$0xff] %v9451_v60  ;;  %v9597_v35 = vpop.permute.xlu1 %5304  ;;  %v9599_v6 = vpop.permute.xlu0 %5706 }
 0x528   :  { %v9445_v38 = vmax.f32 %v4524_v55, 0.0  ;;  %v9447_v43 = vmax.f32 %v4526_v49, 0.0  ;;  %10920 = vst [vmem:[#allocation42_spill] sm:$0xff] %v9597_v35  ;;  %10921 = vst [vmem:[#allocation30_spill] sm:$0xff] %v9599_v6 }
 0x529   :  { %v9453_v13 = vmax.f32 %v4527_v63, 0.0  ;;  %v9455_v48 = vmax.f32 %v4525_v31, 0.0  ;;  %v4388_v54 = vpop.f32.mrb[12].mxu0  ;;  %v4477_v59 = vpop.f32.mrb[12].mxu1 }
 0x52a   :  { %10903 = vst [vmem:[#allocation44_spill] sm:$0xff] %v9445_v38  ;;  %10904 = vst [vmem:[#allocation45_spill] sm:$0xff] %v9447_v43  ;;  %v9457_v0 = vpop.f32.mrb[13].mxu1  ;;  %5658 = vrot.lane.b32.xlu1 %v9443_v17, %s7527_s8  ;;  %4568 = vrot.lane.b32.xlu0 %v9443_v17, %s7523_s19  ;;  %v4390_v28 = vpop.f32.mrb[13].mxu0  ;;  %v4528_v32 = vadd.f32 %v4514_v3, %v4388_v54  ;;  %v4530_v20 = vadd.f32 %v4514_v3, %v4477_v59 }
 0x52b   :  { %10907 = vst [vmem:[#allocation24_spill] sm:$0xff] %v9453_v13  ;;  %10908 = vst [vmem:[#allocation25_spill] sm:$0xff] %v9455_v48  ;;  %v4529_v58 = vadd.f32 %v4514_v3, %v4390_v28  ;;  %v4531_v7 = vadd.f32 %v4514_v3, %v9457_v0  ;;  %v9609_v37 = vpop.permute.xlu1 %5708  ;;  %v9611_v16 = vpop.permute.xlu0 %6004 }
 0x52c   :  { %v9529_v61 = vmax.f32 %v4528_v32, 0.0  ;;  %v9537_v33 = vmax.f32 %v4530_v20, 0.0  ;;  %10922 = vst [vmem:[#allocation22_spill] sm:$0xff] %v9609_v37  ;;  %10923 = vst [vmem:[#allocation23_spill] sm:$0xff] %v9611_v16  ;;  %v10932_v37 = vld [vmem:[#allocation2_spill] sm:$0xff] }
 0x52d   :  { %v4394_v4 = vpop.f32.mrb[14].mxu0  ;;  %v4483_v23 = vpop.f32.mrb[14].mxu1  ;;  %v9576_v2 = vmax.f32 %v4529_v58, 0.0  ;;  %v9589_v47 = vmax.f32 %v4531_v7, 0.0  ;;  %v10929_v7 = vld [vmem:[#allocation4_spill] sm:$0xff] }
 0x52e   :  { %v9471_v19 = vpop.f32.mrb[15].mxu1  ;;  %5876 = vrot.lane.b32.xlu0 %v9437_v36, %s7526_s7  ;;  %5650 = vrot.lane.b32.xlu1 %v9449_v18, %s7527_s8  ;;  %v4396_v42 = vpop.f32.mrb[15].mxu0  ;;  %v4532_v34 = vadd.f32 %v4518_v44, %v4394_v4  ;;  %10909 = vst [vmem:[#allocation16_spill] sm:$0xff] %v9529_v61  ;;  %v4534_v8 = vadd.f32 %v4518_v44, %v4483_v23  ;;  %10911 = vst [vmem:[#allocation17_spill] sm:$0xff] %v9537_v33 }
 0x52f   :  { %v4533_v15 = vadd.f32 %v4518_v44, %v4396_v42  ;;  %10914 = vst [vmem:[#allocation29_spill] sm:$0xff] %v9576_v2  ;;  %v4535_v1 = vadd.f32 %v4518_v44, %v9471_v19  ;;  %10918 = vst [vmem:[#allocation38_spill] sm:$0xff] %v9589_v47 }
 0x530   :  { %v9531_v24 = vmax.f32 %v4532_v34, 0.0  ;;  %v9539_v30 = vmax.f32 %v4534_v8, 0.0  ;;  %v10928_v34 = vld [vmem:[#allocation3_spill] sm:$0xff] }
 0x531   :  { %v9579_v14 = vmax.f32 %v4533_v15, 0.0  ;;  %v9591_v25 = vmax.f32 %v4535_v1, 0.0 }
 0x532   :  { %5892 = vrot.lane.b32.xlu0 %v9443_v17, %s7526_s7  ;;  %5666 = vrot.lane.b32.xlu1 %v9451_v60, %s7527_s8  ;;  %10910 = vst [vmem:[#allocation14_spill] sm:$0xff] %v9531_v24  ;;  %10912 = vst [vmem:[#allocation15_spill] sm:$0xff] %v9539_v30 }
 0x533   :  { %10915 = vst [vmem:[#allocation37_spill] sm:$0xff] %v9579_v14  ;;  %10919 = vst [vmem:[#allocation36_spill] sm:$0xff] %v9591_v25 }
 0x536   :  { %5238 = vrot.lane.b32.xlu0 %v9437_v36, %s7525_s30  ;;  %4554 = vrot.lane.b32.xlu1 %v9445_v38, %s7523_s19 }
 0x53a   :  { %5254 = vrot.lane.b32.xlu0 %v9443_v17, %s7525_s30  ;;  %4570 = vrot.lane.b32.xlu1 %v9447_v43, %s7523_s19 }
 0x53e   :  { %4560 = vrot.lane.b32.xlu0 %v9449_v18, %s7523_s19  ;;  %5878 = vrot.lane.b32.xlu1 %v9445_v38, %s7526_s7 }
 0x542   :  { %4576 = vrot.lane.b32.xlu0 %v9451_v60, %s7523_s19  ;;  %5894 = vrot.lane.b32.xlu1 %v9447_v43, %s7526_s7 }
 0x546   :  { %5884 = vrot.lane.b32.xlu0 %v9449_v18, %s7526_s7  ;;  %5240 = vrot.lane.b32.xlu1 %v9445_v38, %s7525_s30 }
 0x54a   :  { %5900 = vrot.lane.b32.xlu0 %v9451_v60, %s7526_s7  ;;  %5256 = vrot.lane.b32.xlu1 %v9447_v43, %s7525_s30 }
 0x54e   :  { %5246 = vrot.lane.b32.xlu0 %v9449_v18, %s7525_s30  ;;  %4562 = vrot.lane.b32.xlu1 %v9455_v48, %s7523_s19 }
 0x552   :  { %5262 = vrot.lane.b32.xlu0 %v9451_v60, %s7525_s30  ;;  %4578 = vrot.lane.b32.xlu1 %v9453_v13, %s7523_s19 }
 0x556   :  { %5644 = vrot.lane.b32.xlu0 %v9445_v38, %s7527_s8  ;;  %5886 = vrot.lane.b32.xlu1 %v9455_v48, %s7526_s7 }
 0x55a   :  { %5660 = vrot.lane.b32.xlu0 %v9447_v43, %s7527_s8  ;;  %5902 = vrot.lane.b32.xlu1 %v9453_v13, %s7526_s7 }
 0x55e   :  { %5652 = vrot.lane.b32.xlu0 %v9455_v48, %s7527_s8  ;;  %5248 = vrot.lane.b32.xlu1 %v9455_v48, %s7525_s30 }
 0x562   :  { %5668 = vrot.lane.b32.xlu0 %v9453_v13, %s7527_s8  ;;  %5264 = vrot.lane.b32.xlu1 %v9453_v13, %s7525_s30 }
 0x566   :  { %4556 = vrot.lane.b32.xlu0 %v9529_v61, %s7523_s19  ;;  %4558 = vrot.lane.b32.xlu1 %v9531_v24, %s7523_s19 }
 0x56a   :  { %4572 = vrot.lane.b32.xlu0 %v9537_v33, %s7523_s19  ;;  %4574 = vrot.lane.b32.xlu1 %v9539_v30, %s7523_s19 }
 0x56e   :  { %5880 = vrot.lane.b32.xlu0 %v9529_v61, %s7526_s7  ;;  %5882 = vrot.lane.b32.xlu1 %v9531_v24, %s7526_s7 }
 0x572   :  { %5896 = vrot.lane.b32.xlu0 %v9537_v33, %s7526_s7  ;;  %5898 = vrot.lane.b32.xlu1 %v9539_v30, %s7526_s7 }
 0x576   :  { %5242 = vrot.lane.b32.xlu0 %v9529_v61, %s7525_s30  ;;  %5244 = vrot.lane.b32.xlu1 %v9531_v24, %s7525_s30 }
 0x57a   :  { %5258 = vrot.lane.b32.xlu0 %v9537_v33, %s7525_s30  ;;  %5260 = vrot.lane.b32.xlu1 %v9539_v30, %s7525_s30 }
 0x57e   :  { %5646 = vrot.lane.b32.xlu0 %v9529_v61, %s7527_s8  ;;  %5648 = vrot.lane.b32.xlu1 %v9531_v24, %s7527_s8 }
 0x582   :  { %5662 = vrot.lane.b32.xlu0 %v9537_v33, %s7527_s8  ;;  %5664 = vrot.lane.b32.xlu1 %v9539_v30, %s7527_s8 }
 0x586   :  { %4564 = vrot.lane.b32.xlu0 %v9576_v2, %s7523_s19  ;;  %4566 = vrot.lane.b32.xlu1 %v9579_v14, %s7523_s19 }
 0x58a   :  { %4580 = vrot.lane.b32.xlu0 %v9589_v47, %s7523_s19  ;;  %4582 = vrot.lane.b32.xlu1 %v9591_v25, %s7523_s19 }
 0x58e   :  { %5888 = vrot.lane.b32.xlu0 %v9576_v2, %s7526_s7  ;;  %5890 = vrot.lane.b32.xlu1 %v9579_v14, %s7526_s7 }
 0x592   :  { %5904 = vrot.lane.b32.xlu0 %v9589_v47, %s7526_s7  ;;  %5906 = vrot.lane.b32.xlu1 %v9591_v25, %s7526_s7 }
 0x596   :  { %5250 = vrot.lane.b32.xlu0 %v9576_v2, %s7525_s30  ;;  %5252 = vrot.lane.b32.xlu1 %v9579_v14, %s7525_s30 }
 0x598   :  { %v9617_v55 = vpop.permute.xlu1 %5642  ;;  %v4553_v49 = vpop.permute.xlu0 %4552 }
 0x599   :  { %10924 = vst [vmem:[#allocation34_spill] sm:$0xff] %v9617_v55 }
 0x59a   :  { %5266 = vrot.lane.b32.xlu0 %v9589_v47, %s7525_s30  ;;  %5268 = vrot.lane.b32.xlu1 %v9591_v25, %s7525_s30 }
 0x59c   :  { %v9623_v62 = vpop.permute.xlu1 %5658  ;;  %v4569_v46 = vpop.permute.xlu0 %4568 }
 0x59d   :  { %10925 = vst [vmem:[#allocation39_spill] sm:$0xff] %v9623_v62 }
 0x59e   :  { %5654 = vrot.lane.b32.xlu0 %v9576_v2, %s7527_s8  ;;  %5656 = vrot.lane.b32.xlu1 %v9579_v14, %s7527_s8 }
 0x5a0   :  { %v9629_v63 = vpop.permute.xlu1 %5650  ;;  %v9631_v31 = vpop.permute.xlu0 %5876 }
 0x5a1   :  { %10926 = vst [vmem:[#allocation12_spill] sm:$0xff] %v9629_v63 }
 0x5a2   :  { %5670 = vrot.lane.b32.xlu0 %v9589_v47, %s7527_s8  ;;  %5672 = vrot.lane.b32.xlu1 %v9591_v25, %s7527_s8 }
 0x5a4   :  { %v9637_v54 = vpop.permute.xlu1 %5666  ;;  %v5893_v59 = vpop.permute.xlu0 %5892 }
 0x5a5   :  { %10927 = vst [vmem:[#allocation10_spill] sm:$0xff] %v9637_v54 }
 0x5a8   :  { %v4555_v0 = vpop.permute.xlu1 %4554  ;;  %v9639_v28 = vpop.permute.xlu0 %5238 }
 0x5ac   :  { %v4571_v4 = vpop.permute.xlu1 %4570  ;;  %v9641_v23 = vpop.permute.xlu0 %5254 }
 0x5b0   :  { %v9643_v19 = vpop.permute.xlu1 %5878  ;;  %v4561_v42 = vpop.permute.xlu0 %4560 }
 0x5b1   :  { %v4592_v8 = vsel %vm98_vm4, %v4553_v49, %v4561_v42  ;;  %v4588_v10 = vsel %vm98_vm4, %v4561_v42, %v4569_v46 }
 0x5b2   :  { %v4601_v1 = vmul.f32 %v10929_v7, %v4592_v8 }
 0x5b4   :  { %v9645_v3 = vpop.permute.xlu1 %5894  ;;  %v4577_v44 = vpop.permute.xlu0 %4576 }
 0x5b5   :  { %v4596_v32 = vsel %vm98_vm4, %v4577_v44, %v4553_v49  ;;  %v10931_v49 = vld [vmem:[#allocation5_spill] sm:$0xff]  ;;  %v4584_v39 = vsel %vm98_vm4, %v4569_v46, %v4577_v44 }
 0x5b6   :  { %v4600_v20 = vmul.f32 %v10928_v34, %v4596_v32  ;;  %v4602_v56 = vmul.f32 %v10931_v49, %v4588_v10  ;;  %v4603_v6 = vmul.f32 %v10932_v37, %v4584_v39 }
 0x5b8   :  { %v9652_v58 = vpop.permute.xlu1 %5240  ;;  %5004 = vrot.lane.b32.xlu1 %v4600_v20, %s7527_s8  ;;  %4616 = vrot.lane.b32.xlu0 %v4600_v20, %s7525_s30  ;;  %v5885_v15 = vpop.permute.xlu0 %5884 }
 0x5b9   :  { %v5916_v46 = vsel %vm1410_vm13, %v9631_v31, %v5885_v15  ;;  %v5912_v54 = vsel %vm1410_vm13, %v5885_v15, %v5893_v59 }
 0x5bc   :  { %v9659_v57 = vpop.permute.xlu1 %5256  ;;  %5012 = vrot.lane.b32.xlu1 %v4601_v1, %s7527_s8  ;;  %4624 = vrot.lane.b32.xlu0 %v4601_v1, %s7525_s30  ;;  %v5901_v32 = vpop.permute.xlu0 %5900 }
 0x5bd   :  { %10930 = vst [vmem:[#allocation26_spill] sm:$0xff] %v9659_v57 }
 0x5c0   :  { %v4563_v16 = vpop.permute.xlu1 %4562  ;;  %5020 = vrot.lane.b32.xlu1 %v4602_v56, %s7527_s8  ;;  %4632 = vrot.lane.b32.xlu0 %v4602_v56, %s7525_s30  ;;  %v9668_v8 = vpop.permute.xlu0 %5246 }
 0x5c1   :  { %v4593_v42 = vsel %vm98_vm4, %v4555_v0, %v4563_v16  ;;  %v4589_v30 = vsel %vm98_vm4, %v4563_v16, %v4571_v4 }
 0x5c2   :  { %v4605_v10 = vmul.f32 %v10929_v7, %v4593_v42  ;;  %v4606_v43 = vmul.f32 %v10931_v49, %v4589_v30  ;;  %v10933_v42 = vld [vmem:[#allocation6_spill] sm:$0xff] }
 0x5c3   :  { %v9689_v35 = vmul.f32 %v10933_v42, %v5916_v46 }
 0x5c4   :  { %v4579_v44 = vpop.permute.xlu1 %4578  ;;  %5028 = vrot.lane.b32.xlu1 %v4603_v6, %s7527_s8  ;;  %4640 = vrot.lane.b32.xlu0 %v4603_v6, %s7525_s30  ;;  %v9681_v33 = vpop.permute.xlu0 %5262  ;;  %v7010_v17 = vpack.c.bf16 %v4605_v10, %v4601_v1  ;;  %v7020_v46 = vpack.c.bf16 %v4606_v43, %v4602_v56  ;;  %v5920_v56 = vsel %vm1410_vm13, %v5901_v32, %v9631_v31 }
 0x5c5   :  { %v4585_v39 = vsel %vm98_vm4, %v4571_v4, %v4579_v44  ;;  %v4597_v16 = vsel %vm98_vm4, %v4579_v44, %v4555_v0  ;;  %10934 = vst [vmem:[#allocation27_spill] sm:$0xff] %v9689_v35  ;;  %v10936_v44 = vld [vmem:[#allocation7_spill] sm:$0xff] }
 0x5c6   :  { %v4604_v25 = vmul.f32 %v10928_v34, %v4597_v16  ;;  %v4607_v47 = vmul.f32 %v10932_v37, %v4585_v39  ;;  %7011 = vmatprep.subr.bf16.mxu0 %v7010_v17  ;;  %v9702_v16 = vmul.f32 %v10936_v44, %v5912_v54  ;;  %v5908_v17 = vsel %vm1410_vm13, %v5893_v59, %v5901_v32 }
 0x5c8   :  { %v5887_v1 = vpop.permute.xlu1 %5886  ;;  %6344 = vrot.lane.b32.xlu1 %v9689_v35, %s7527_s8  ;;  %5940 = vrot.lane.b32.xlu0 %v9689_v35, %s7525_s30  ;;  %v9699_v30 = vpop.permute.xlu0 %5644  ;;  %v7012_v0 = vpack.c.bf16 %v4604_v25, %v4600_v20  ;;  %v7018_v4 = vpack.c.bf16 %v4607_v47, %v4603_v6  ;;  %10937 = vst [vmem:[#allocation11_spill] sm:$0xff] %v9702_v16  ;;  %v10939_v20 = vld [vmem:[#allocation9_spill] sm:$0xff] }
 0x5c9   :  { %10935 = vst [vmem:[#allocation13_spill] sm:$0xff] %v9699_v30  ;;  %v9712_v6 = vmul.f32 %v10939_v20, %v5908_v17  ;;  %v5917_v32 = vsel %vm1410_vm13, %v9643_v19, %v5887_v1  ;;  %v5913_v24 = vsel %vm1410_vm13, %v5887_v1, %v9645_v3 }
 0x5ca   :  { %7013 = vmatpush1.bf16.msra.mxu0 %v7012_v0  ;;  %7019 = vmatprep.subr.bf16.mxu1 %v7018_v4  ;;  %v10942_v0 = vld [vmem:[#allocation8_spill] sm:$0xff]  ;;  %v9740_v35 = vmul.f32 %v10933_v42, %v5917_v32  ;;  %v9749_v13 = vmul.f32 %v10936_v44, %v5913_v24 }
 0x5cb   :  { %7021 = vmatpush1.bf16.msra.mxu1 %v7020_v46  ;;  %10940 = vst [vmem:[#allocation19_spill] sm:$0xff] %v9712_v6  ;;  %v9725_v4 = vmul.f32 %v10942_v0, %v5920_v56 }
 0x5cc   :  { %v5903_v15 = vpop.permute.xlu1 %5902  ;;  %4618 = vrot.lane.b32.xlu1 %v4604_v25, %s7525_s30  ;;  %5948 = vrot.lane.b32.xlu0 %v9702_v16, %s7525_s30  ;;  %v9709_v39 = vpop.permute.xlu0 %5660  ;;  %10945 = vst [vmem:[#allocation32_spill] sm:$0xff] %v9740_v35  ;;  %10946 = vst [vmem:[#allocation47_spill] sm:$0xff] %v9749_v13 }
 0x5cd   :  { %10938 = vst [vmem:[#allocation18_spill] sm:$0xff] %v9709_v39  ;;  %10943 = vst [vmem:[#allocation20_spill] sm:$0xff] %v9725_v4  ;;  %v5921_v24 = vsel %vm1410_vm13, %v5903_v15, %v9643_v19 }
 0x5d0   :  { %v9717_v54 = vpop.permute.xlu1 %5248  ;;  %4626 = vrot.lane.b32.xlu1 %v4605_v10, %s7525_s30  ;;  %5956 = vrot.lane.b32.xlu0 %v9712_v6, %s7525_s30  ;;  %v9722_v59 = vpop.permute.xlu0 %5652 }
 0x5d1   :  { %10941 = vst [vmem:[#allocation31_spill] sm:$0xff] %v9722_v59 }
 0x5d4   :  { %v9727_v46 = vpop.permute.xlu1 %5264  ;;  %4634 = vrot.lane.b32.xlu1 %v4606_v43, %s7525_s30  ;;  %5964 = vrot.lane.b32.xlu0 %v9725_v4, %s7525_s30  ;;  %v9732_v31 = vpop.permute.xlu0 %5668 }
 0x5d5   :  { %10944 = vst [vmem:[#allocation21_spill] sm:$0xff] %v9732_v31 }
 0x5d8   :  { %v4559_v17 = vpop.permute.xlu1 %4558  ;;  %4642 = vrot.lane.b32.xlu1 %v4607_v47, %s7525_s30  ;;  %5006 = vrot.lane.b32.xlu0 %v4604_v25, %s7527_s8  ;;  %v4557_v56 = vpop.permute.xlu0 %4556  ;;  %v5909_v25 = vsel %vm1410_vm13, %v9645_v3, %v5903_v15 }
 0x5d9   :  { %v9762_v55 = vmul.f32 %v10939_v20, %v5909_v25 }
 0x5db   :  { %10947 = vst [vmem:[#allocation48_spill] sm:$0xff] %v9762_v55 }
 0x5dc   :  { %v4575_v61 = vpop.permute.xlu1 %4574  ;;  %5942 = vrot.lane.b32.xlu1 %v9740_v35, %s7525_s30  ;;  %5014 = vrot.lane.b32.xlu0 %v4605_v10, %s7527_s8  ;;  %v4573_v60 = vpop.permute.xlu0 %4572 }
 0x5e0   :  { %v9754_v32 = vpop.permute.xlu1 %5882  ;;  %5950 = vrot.lane.b32.xlu1 %v9749_v13, %s7525_s30  ;;  %5022 = vrot.lane.b32.xlu0 %v4606_v43, %s7527_s8  ;;  %v9759_v1 = vpop.permute.xlu0 %5880  ;;  %v9775_v43 = vmul.f32 %v10942_v0, %v5921_v24 }
 0x5e2   :  { %10948 = vst [vmem:[#allocation33_spill] sm:$0xff] %v9775_v43 }
 0x5e4   :  { %v9767_v10 = vpop.permute.xlu1 %5898  ;;  %5958 = vrot.lane.b32.xlu1 %v9762_v55, %s7525_s30  ;;  %5030 = vrot.lane.b32.xlu0 %v4607_v47, %s7527_s8  ;;  %v9772_v3 = vpop.permute.xlu0 %5896 }
 0x5e8   :  { %v9777_v36 = vpop.permute.xlu1 %5244  ;;  %5966 = vrot.lane.b32.xlu1 %v9775_v43, %s7525_s30  ;;  %v9781_v25 = vpop.permute.xlu0 %5242 }
 0x5ec   :  { %v9783_v19 = vpop.permute.xlu1 %5260  ;;  %v9785_v15 = vpop.permute.xlu0 %5258 }
 0x5f0   :  { %v9787_v38 = vpop.permute.xlu1 %5648  ;;  %v9789_v31 = vpop.permute.xlu0 %5646 }
 0x5f4   :  { %v9791_v47 = vpop.permute.xlu1 %5664  ;;  %v9793_v14 = vpop.permute.xlu0 %5662 }
 0x5f8   :  { %v4567_v24 = vpop.permute.xlu1 %4566  ;;  %v4565_v2 = vpop.permute.xlu0 %4564 }
 0x5f9   :  { %v4591_v40 = vsel %vm98_vm4, %v4567_v24, %v4575_v61  ;;  %v4595_v30 = vsel %vm98_vm4, %v4559_v17, %v4567_v24  ;;  %v4590_v63 = vsel %vm98_vm4, %v4565_v2, %v4573_v60  ;;  %v4594_v62 = vsel %vm98_vm4, %v4557_v56, %v4565_v2 }
 0x5fa   :  { %v9804_v18 = vmul.f32 %v10929_v7, %v4595_v30  ;;  %v9807_v48 = vmul.f32 %v10929_v7, %v4594_v62  ;;  %v9810_v59 = vmul.f32 %v10931_v49, %v4591_v40  ;;  %v9813_v39 = vmul.f32 %v10931_v49, %v4590_v63 }
 0x5fc   :  { %v4583_v11 = vpop.permute.xlu1 %4582  ;;  %v4581_v24 = vpop.permute.xlu0 %4580  ;;  %v7014_v26 = vpack.c.bf16 %v9804_v18, %v9807_v48 }
 0x5fd   :  { %v4587_v2 = vsel %vm98_vm4, %v4575_v61, %v4583_v11  ;;  %v4599_v30 = vsel %vm98_vm4, %v4583_v11, %v4559_v17  ;;  %v4586_v62 = vsel %vm98_vm4, %v4573_v60, %v4581_v24  ;;  %v4598_v40 = vsel %vm98_vm4, %v4581_v24, %v4557_v56 }
 0x5fe   :  { %v4612_v63 = vmul.f32 %v10928_v34, %v4599_v30  ;;  %v9827_v7 = vmul.f32 %v10932_v37, %v4587_v2  ;;  %v9830_v49 = vmul.f32 %v10928_v34, %v4598_v40  ;;  %v9833_v57 = vmul.f32 %v10932_v37, %v4586_v62  ;;  %7015 = vmatprep.subr.bf16.mxu0 %v7014_v26 }
 0x5ff   :  { %v7024_v34 = vpack.c.bf16 %v9810_v59, %v9813_v39  ;;  %vm6606_vm4 = vcmask 7168  }
 0x600   :  { %v7016_v61 = vpack.c.bf16 %v4612_v63, %v9830_v49  ;;  %v9836_v11 = vpop.permute.xlu1 %5890  ;;  %4622 = vrot.lane.b32.xlu1 %v4612_v63, %s7525_s30  ;;  %4620 = vrot.lane.b32.xlu0 %v9830_v49, %s7525_s30  ;;  %v9841_v60 = vpop.permute.xlu0 %5888  ;;  %v7022_v17 = vpack.c.bf16 %v9827_v7, %v9833_v57 }
 0x601   :  { %v5919_v37 = vsel %vm1410_vm13, %v9754_v32, %v9836_v11  ;;  %v5918_v26 = vsel %vm1410_vm13, %v9759_v1, %v9841_v60 }
 0x602   :  { %v9856_v56 = vmul.f32 %v10933_v42, %v5919_v37  ;;  %v9859_v24 = vmul.f32 %v10933_v42, %v5918_v26  ;;  %7017 = vmatpush1.bf16.msra.mxu0 %v7016_v61  ;;  %7023 = vmatprep.subr.bf16.mxu1 %v7022_v17 }
 0x603   :  { %7025 = vmatpush1.bf16.msra.mxu1 %v7024_v34 }
 0x604   :  { %10949 = vst [vmem:[#allocation52_spill] sm:$0xff] %v9856_v56  ;;  %10950 = vst [vmem:[#allocation55_spill] sm:$0xff] %v9859_v24  ;;  %v9863_v30 = vpop.permute.xlu1 %5906  ;;  %4630 = vrot.lane.b32.xlu1 %v9804_v18, %s7525_s30  ;;  %v9867_v62 = vpop.permute.xlu0 %5904  ;;  %4628 = vrot.lane.b32.xlu0 %v9807_v48, %s7525_s30 }
 0x605   :  { %6830 = vmatmul.mubr.msk.f32.vlgmr.msra.gmra.mrb[16].mxu0 %vm2277_vm5, %v9561_v53 }
 0x606   :  { %6832 = vmatmul.mubr.msk.f32.vlgmr.msra.gmra.mrb[16].mxu1 %vm2277_vm5, %v9561_v53  ;;  %4762 = vmatprep.mubr.f32.mxu0 %v10843_v5 }
 0x607   :  { %4839 = vmatprep.mubr.f32.mxu1 %v10843_v5 }
 0x608   :  { %v5253_v42 = vpop.permute.xlu1 %5252  ;;  %4638 = vrot.lane.b32.xlu1 %v9810_v59, %s7525_s30  ;;  %v5251_v40 = vpop.permute.xlu0 %5250  ;;  %4636 = vrot.lane.b32.xlu0 %v9813_v39, %s7525_s30 }
 0x609   :  { %v5277_v61 = vsel %vm115_vm7, %v5253_v42, %v9783_v19  ;;  %v5281_v17 = vsel %vm115_vm7, %v9777_v36, %v5253_v42  ;;  %v5276_v53 = vsel %vm115_vm7, %v5251_v40, %v9785_v15  ;;  %v5280_v37 = vsel %vm115_vm7, %v9781_v25, %v5251_v40  ;;  %6831 = vmatmul.mubr.msk.f32.gmra.mrb[18].mxu0 %vm2277_vm5, %v9567_v41 }
 0x60a   :  { %v9894_v26 = vmul.f32 %v7752_v45, %v5281_v17  ;;  %v9897_v34 = vmul.f32 %v7764_v52, %v5277_v61  ;;  %v9900_v2 = vmul.f32 %v7752_v45, %v5280_v37  ;;  %v9903_v42 = vmul.f32 %v7764_v52, %v5276_v53  ;;  %6833 = vmatmul.mubr.msk.f32.gmra.mrb[18].mxu1 %vm2277_vm5, %v9567_v41 }
 0x60b   :  { %4914 = vmatprep.mubr.f32.mxu0 %v10843_v5  ;;  %4991 = vmatprep.mubr.f32.mxu1 %v10843_v5 }
 0x60c   :  { %10951 = vst [vmem:[#allocation50_spill] sm:$0xff] %v9897_v34  ;;  %10952 = vst [vmem:[#allocation53_spill] sm:$0xff] %v9900_v2  ;;  %v5269_v17 = vpop.permute.xlu1 %5268  ;;  %4646 = vrot.lane.b32.xlu1 %v9827_v7, %s7525_s30  ;;  %v5267_v61 = vpop.permute.xlu0 %5266  ;;  %4644 = vrot.lane.b32.xlu0 %v9833_v57, %s7525_s30 }
 0x60d   :  { %10953 = vst [vmem:[#allocation51_spill] sm:$0xff] %v9903_v42  ;;  %v5273_v37 = vsel %vm115_vm7, %v9783_v19, %v5269_v17  ;;  %v5285_v41 = vsel %vm115_vm7, %v5269_v17, %v9777_v36  ;;  %v5272_v40 = vsel %vm115_vm7, %v9785_v15, %v5267_v61  ;;  %v5284_v42 = vsel %vm115_vm7, %v5267_v61, %v9781_v25 }
 0x60e   :  { %v9932_v53 = vmul.f32 %v7758_v50, %v5285_v41  ;;  %v9935_v19 = vmul.f32 %v7761_v51, %v5273_v37  ;;  %v9938_v34 = vmul.f32 %v7758_v50, %v5284_v42  ;;  %v9941_v36 = vmul.f32 %v7761_v51, %v5272_v40 }
 0x610   :  { %v5657_v15 = vpop.permute.xlu1 %5656  ;;  %5010 = vrot.lane.b32.xlu1 %v4612_v63, %s7527_s8  ;;  %v5655_v2 = vpop.permute.xlu0 %5654  ;;  %5008 = vrot.lane.b32.xlu0 %v9830_v49, %s7527_s8 }
 0x611   :  { %v5681_v61 = vsel %vm521_vm2, %v5657_v15, %v9791_v47  ;;  %v5685_v42 = vsel %vm521_vm2, %v9787_v38, %v5657_v15  ;;  %v5680_v40 = vsel %vm521_vm2, %v5655_v2, %v9793_v14  ;;  %v5684_v63 = vsel %vm521_vm2, %v9789_v31, %v5655_v2 }
 0x612   :  { %v9963_v37 = vmul.f32 %v7827_v29, %v5685_v42  ;;  %v9966_v41 = vmul.f32 %v7819_v22, %v5681_v61  ;;  %v9969_v25 = vmul.f32 %v7827_v29, %v5684_v63  ;;  %v9972_v15 = vmul.f32 %v7819_v22, %v5680_v40 }
 0x614   :  { %v5673_v17 = vpop.permute.xlu1 %5672  ;;  %5018 = vrot.lane.b32.xlu1 %v9804_v18, %s7527_s8  ;;  %v5671_v2 = vpop.permute.xlu0 %5670  ;;  %5016 = vrot.lane.b32.xlu0 %v9807_v48, %s7527_s8 }
 0x615   :  { %v5677_v61 = vsel %vm521_vm2, %v9791_v47, %v5673_v17  ;;  %v5689_v40 = vsel %vm521_vm2, %v5673_v17, %v9787_v38  ;;  %v5676_v63 = vsel %vm521_vm2, %v9793_v14, %v5671_v2  ;;  %v5688_v18 = vsel %vm521_vm2, %v5671_v2, %v9789_v31 }
 0x616   :  { %v9995_v49 = vmul.f32 %v7822_v27, %v5677_v61  ;;  %v9998_v47 = vmul.f32 %v7814_v21, %v5689_v40  ;;  %v10001_v42 = vmul.f32 %v7822_v27, %v5676_v63  ;;  %v10004_v38 = vmul.f32 %v7814_v21, %v5688_v18 }
 0x617   :  { %v5922_v17 = vsel %vm1410_vm13, %v9867_v62, %v9759_v1  ;;  %v5915_v61 = vsel %vm1410_vm13, %v9836_v11, %v9767_v10  ;;  %v5911_v11 = vsel %vm1410_vm13, %v9767_v10, %v9863_v30  ;;  %v5923_v10 = vsel %vm1410_vm13, %v9863_v30, %v9754_v32 }
 0x618   :  { %5026 = vrot.lane.b32.xlu1 %v9810_v59, %s7527_s8  ;;  %5024 = vrot.lane.b32.xlu0 %v9813_v39, %s7527_s8  ;;  %v5914_v59 = vsel %vm1410_vm13, %v9841_v60, %v9772_v3  ;;  %v10057_v40 = vmul.f32 %v10942_v0, %v5922_v17  ;;  %v10068_v1 = vmul.f32 %v10936_v44, %v5915_v61 }
 0x619   :  { %v10031_v39 = vmul.f32 %v10936_v44, %v5914_v59  ;;  %v10083_v44 = vmul.f32 %v10939_v20, %v5911_v11 }
 0x61a   :  { %10956 = vst [vmem:[#allocation4_spill] sm:$0xff] %v10057_v40  ;;  %10957 = vst [vmem:[#allocation5_spill] sm:$0xff] %v10068_v1 }
 0x61b   :  { %10954 = vst [vmem:[#allocation54_spill] sm:$0xff] %v10031_v39  ;;  %10958 = vst [vmem:[#allocation2_spill] sm:$0xff] %v10083_v44 }
 0x61c   :  { %5034 = vrot.lane.b32.xlu1 %v9827_v7, %s7527_s8  ;;  %5032 = vrot.lane.b32.xlu0 %v9833_v57, %s7527_s8  ;;  %v5910_v57 = vsel %vm1410_vm13, %v9772_v3, %v9867_v62 }
 0x61d   :  { %v10042_v60 = vmul.f32 %v10939_v20, %v5910_v57  ;;  %v10102_v20 = vmul.f32 %v10942_v0, %v5923_v10 }
 0x61f   :  { %10955 = vst [vmem:[#allocation3_spill] sm:$0xff] %v10042_v60  ;;  %10959 = vst [vmem:[#allocation6_spill] sm:$0xff] %v10102_v20 }
 0x620   :  { %6352 = vrot.lane.b32.xlu1 %v9702_v16, %s7527_s8  ;;  %6346 = vrot.lane.b32.xlu0 %v9740_v35, %s7527_s8 }
 0x624   :  { %6360 = vrot.lane.b32.xlu1 %v9712_v6, %s7527_s8  ;;  %5944 = vrot.lane.b32.xlu0 %v9859_v24, %s7525_s30 }
 0x628   :  { %6368 = vrot.lane.b32.xlu1 %v9725_v4, %s7527_s8  ;;  %5952 = vrot.lane.b32.xlu0 %v10031_v39, %s7525_s30 }
 0x62a   :  { %v5005_v31 = vpop.permute.xlu1 %5004  ;;  %v4617_v7 = vpop.permute.xlu0 %4616 }
 0x62c   :  { %6006 = vrot.lane.b32.xlu1 %v9433_v12, %s7533_s14  ;;  %5960 = vrot.lane.b32.xlu0 %v10042_v60, %s7525_s30 }
 0x62e   :  { %v5013_v3 = vpop.permute.xlu1 %5012  ;;  %v4625_v2 = vpop.permute.xlu0 %4624 }
 0x62f   :  { %v10061_v63 = vsel %vm521_vm2, %v5005_v31, %v5013_v3  ;;  %v4656_v0 = vsel %vm115_vm7, %v4617_v7, %v4625_v2 }
 0x630   :  { %5946 = vrot.lane.b32.xlu1 %v9856_v56, %s7525_s30  ;;  %5968 = vrot.lane.b32.xlu0 %v10057_v40, %s7525_s30 }
 0x632   :  { %v5021_v62 = vpop.permute.xlu1 %5020  ;;  %v4633_v18 = vpop.permute.xlu0 %4632 }
 0x633   :  { %v10076_v59 = vsel %vm521_vm2, %v5013_v3, %v5021_v62 }
 0x634   :  { %5954 = vrot.lane.b32.xlu1 %v10068_v1, %s7525_s30  ;;  %6354 = vrot.lane.b32.xlu0 %v9749_v13, %s7527_s8 }
 0x636   :  { %v5029_v57 = vpop.permute.xlu1 %5028  ;;  %v4641_v17 = vpop.permute.xlu0 %4640 }
 0x637   :  { %v10091_v3 = vsel %vm521_vm2, %v5021_v62, %v5029_v57  ;;  %v10095_v61 = vsel %vm521_vm2, %v5029_v57, %v5005_v31 }
 0x638   :  { %5962 = vrot.lane.b32.xlu1 %v10083_v44, %s7525_s30  ;;  %6362 = vrot.lane.b32.xlu0 %v9762_v55, %s7527_s8 }
 0x63a   :  { %v10104_v11 = vpop.permute.xlu1 %6344  ;;  %v5941_v32 = vpop.permute.xlu0 %5940 }
 0x63b   :  { %10960 = vst [vmem:[#allocation7_spill] sm:$0xff] %v10104_v11  ;;  %v4665_v11 = vmul.f32 %v7752_v45, %v4656_v0 }
 0x63c   :  { %5970 = vrot.lane.b32.xlu1 %v10102_v20, %s7525_s30  ;;  %6370 = vrot.lane.b32.xlu0 %v9775_v43, %s7527_s8 }
 0x63e   :  { %v4619_v30 = vpop.permute.xlu1 %4618  ;;  %v5949_v31 = vpop.permute.xlu0 %5948 }
 0x63f   :  { %v5980_v62 = vsel %vm115_vm7, %v5941_v32, %v5949_v31 }
 0x640   :  { %6350 = vrot.lane.b32.xlu1 %v9856_v56, %s7527_s8  ;;  %6348 = vrot.lane.b32.xlu0 %v9859_v24, %s7527_s8 }
 0x642   :  { %v4627_v57 = vpop.permute.xlu1 %4626  ;;  %v5957_v10 = vpop.permute.xlu0 %5956 }
 0x643   :  { %v4657_v48 = vsel %vm115_vm7, %v4619_v30, %v4627_v57  ;;  %v5976_v14 = vsel %vm115_vm7, %v5949_v31, %v5957_v10 }
 0x644   :  { %v4669_v55 = vmul.f32 %v7752_v45, %v4657_v48  ;;  %6358 = vrot.lane.b32.xlu1 %v10068_v1, %s7527_s8  ;;  %6356 = vrot.lane.b32.xlu0 %v10031_v39, %s7527_s8  ;;  %v4648_v48 = vsel %vm115_vm7, %v4633_v18, %v4641_v17 }
 0x646   :  { %v4635_v56 = vpop.permute.xlu1 %4634  ;;  %v5965_v24 = vpop.permute.xlu0 %5964  ;;  %v7026_v6 = vpack.c.bf16 %v4669_v55, %v4665_v11  ;;  %v4660_v55 = vsel %vm115_vm7, %v4641_v17, %v4617_v7  ;;  %v4652_v11 = vsel %vm115_vm7, %v4625_v2, %v4633_v18 }
 0x647   :  { %v10130_v35 = vsel %vm115_vm7, %v5957_v10, %v5965_v24  ;;  %v5984_v31 = vsel %vm115_vm7, %v5965_v24, %v5941_v32  ;;  %v4653_v0 = vsel %vm115_vm7, %v4627_v57, %v4635_v56  ;;  %v4664_v10 = vmul.f32 %v7758_v50, %v4660_v55 }
 0x648   :  { %6366 = vrot.lane.b32.xlu1 %v10083_v44, %s7527_s8  ;;  %7027 = vmatprep.subr.bf16.mxu0 %v7026_v6  ;;  %v4670_v32 = vmul.f32 %v7764_v52, %v4653_v0  ;;  %v4667_v44 = vmul.f32 %v7761_v51, %v4648_v48  ;;  %v4666_v2 = vmul.f32 %v7764_v52, %v4652_v11  ;;  %v10163_v48 = vld [vmem:[%s10670_s1 + $0x28] sm:$0xff]  ;;  %v10782_v11 = vmov 2  }
 0x649   :  { %6364 = vrot.lane.b32.xlu0 %v10042_v60, %s7527_s8  ;;  %7497 = vset.pattern.permute.xlu1 %v10782_v11 }
 0x64a   :  { %v4643_v24 = vpop.permute.xlu1 %4642  ;;  %7496 = vset.pattern.permute.xlu0 %v10782_v11 }
 0x64b   :  { %v4649_v57 = vsel %vm115_vm7, %v4635_v56, %v4643_v24  ;;  %v4661_v6 = vsel %vm115_vm7, %v4643_v24, %v4619_v30  ;;  %v7036_v30 = vpack.c.bf16 %v4670_v32, %v4666_v2  ;;  %v10174_v24 = vmul.f32 %v7752_v45, %v5980_v62  ;;  %v10192_v62 = vld [vmem:[%s10671_s2 + $0x8] sm:$0xff] }
 0x64c   :  { %v4668_v7 = vmul.f32 %v7758_v50, %v4661_v6  ;;  %v4671_v17 = vmul.f32 %v7761_v51, %v4649_v57  ;;  %6374 = vrot.lane.b32.xlu1 %v10102_v20, %s7527_s8  ;;  %v10182_v57 = vld [vmem:[%s10671_s2] sm:$0xff]  ;;  %10962 = vst [vmem:[#allocation8_spill] sm:$0xff] %v10192_v62 }
 0x64d   :  { %6372 = vrot.lane.b32.xlu0 %v10057_v40, %s7527_s8  ;;  %10961 = vst [vmem:[#allocation9_spill] sm:$0xff] %v10182_v57 }
 0x64e   :  { %v7028_v56 = vpack.c.bf16 %v4668_v7, %v4664_v10  ;;  %v5943_v18 = vpop.permute.xlu1 %5942  ;;  %v7034_v0 = vpack.c.bf16 %v4671_v17, %v4667_v44  ;;  %v10199_v7 = vmul.f32 %v7764_v52, %v5976_v14 }
 0x650   :  { %7029 = vmatpush1.bf16.msra.mxu0 %v7028_v56  ;;  %7035 = vmatprep.subr.bf16.mxu1 %v7034_v0  ;;  %10963 = vst [vmem:[#allocation56_spill] sm:$0xff] %v10199_v7 }
 0x651   :  { %6174 = vrot.lane.b32.xlu0 %v10163_v48, %s7535_s6  ;;  %7037 = vmatpush1.bf16.msra.mxu1 %v7036_v30  ;;  %v10212_v30 = vmul.f32 %v7758_v50, %v5984_v31 }
 0x652   :  { %v5951_v55 = vpop.permute.xlu1 %5950  ;;  %6176 = vrot.lane.b32.xlu1 %v9433_v12, %s7535_s6 }
 0x653   :  { %v5981_v44 = vsel %vm115_vm7, %v5943_v18, %v5951_v55 }
 0x654   :  { %v10177_v32 = vmul.f32 %v7752_v45, %v5981_v44  ;;  %v5007_v44 = vpop.permute.xlu0 %5006 }
 0x655   :  { %6579 = vperm.xlu0 %7496, %v10182_v57  }
 0x656   :  { %v10185_v12 = vpop.permute.xlu1 %5958  ;;  %6583 = vperm.xlu1 %7497, %v10192_v62  }
 0x657   :  { %v5977_v10 = vsel %vm115_vm7, %v5951_v55, %v10185_v12 }
 0x658   :  { %v10202_v17 = vmul.f32 %v7764_v52, %v5977_v10  ;;  %v5015_v10 = vpop.permute.xlu0 %5014 }
 0x65a   :  { %10964 = vst [vmem:[#allocation57_spill] sm:$0xff] %v10202_v17  ;;  %v10206_v56 = vpop.permute.xlu1 %5966 }
 0x65b   :  { %v5985_v0 = vsel %vm115_vm7, %v10206_v56, %v5943_v18 }
 0x65c   :  { %v10215_v55 = vmul.f32 %v7758_v50, %v5985_v0  ;;  %v5023_v11 = vpop.permute.xlu0 %5022 }
 0x65d   :  { %v5041_v14 = vsel %vm521_vm2, %v5015_v10, %v5023_v11 }
 0x65e   :  { %v5057_v13 = vmul.f32 %v7819_v22, %v5041_v14 }
 0x660   :  { %v5031_v6 = vpop.permute.xlu0 %5030 }
 0x672   :  { %v4623_v2 = vpop.permute.xlu1 %4622  ;;  %v4621_v57 = vpop.permute.xlu0 %4620 }
 0x676   :  { %v4631_v62 = vpop.permute.xlu1 %4630  ;;  %v4629_v18 = vpop.permute.xlu0 %4628 }
 0x677   :  { %v4659_v60 = vsel %vm115_vm7, %v4623_v2, %v4631_v62  ;;  %v4658_v20 = vsel %vm115_vm7, %v4621_v57, %v4629_v18 }
 0x678   :  { %v4677_v31 = vmul.f32 %v7752_v45, %v4659_v60  ;;  %v4673_v0 = vmul.f32 %v7752_v45, %v4658_v20  ;;  %v5045_v60 = vsel %vm521_vm2, %v5007_v44, %v5015_v10  ;;  %v5049_v20 = vsel %vm521_vm2, %v5031_v6, %v5007_v44 }
 0x67a   :  { %v4639_v40 = vpop.permute.xlu1 %4638  ;;  %v4637_v1 = vpop.permute.xlu0 %4636  ;;  %v7030_v39 = vpack.c.bf16 %v4677_v31, %v4673_v0 }
 0x67b   :  { %v4655_v43 = vsel %vm115_vm7, %v4631_v62, %v4639_v40  ;;  %v4654_v4 = vsel %vm115_vm7, %v4629_v18, %v4637_v1 }
 0x67c   :  { %7031 = vmatprep.subr.bf16.mxu0 %v7030_v39  ;;  %v4678_v7 = vmul.f32 %v7764_v52, %v4655_v43  ;;  %v4674_v31 = vmul.f32 %v7764_v52, %v4654_v4  ;;  %v5037_v4 = vsel %vm521_vm2, %v5023_v11, %v5031_v6  ;;  %v5059_v43 = vmul.f32 %v7814_v21, %v5049_v20 }
 0x67d   :  { %v5058_v11 = vmul.f32 %v7822_v27, %v5037_v4  ;;  %v5283_v4 = vsel %vm115_vm7, %v9727_v46, %v9652_v58 }
 0x67e   :  { %v4647_v16 = vpop.permute.xlu1 %4646  ;;  %v4645_v39 = vpop.permute.xlu0 %4644  ;;  %v7040_v6 = vpack.c.bf16 %v4678_v7, %v4674_v31 }
 0x67f   :  { %v4651_v62 = vsel %vm115_vm7, %v4639_v40, %v4647_v16  ;;  %v4663_v18 = vsel %vm115_vm7, %v4647_v16, %v4623_v2  ;;  %v4650_v14 = vsel %vm115_vm7, %v4637_v1, %v4645_v39  ;;  %v4662_v44 = vsel %vm115_vm7, %v4645_v39, %v4621_v57 }
 0x680   :  { %v4676_v0 = vmul.f32 %v7758_v50, %v4663_v18  ;;  %v4679_v10 = vmul.f32 %v7761_v51, %v4651_v62  ;;  %v4672_v40 = vmul.f32 %v7758_v50, %v4662_v44  ;;  %v4675_v16 = vmul.f32 %v7761_v51, %v4650_v14 }
 0x681   :  { %v5053_v2 = vmul.f32 %v7819_v22, %v10076_v59  ;;  %v5055_v62 = vmul.f32 %v7814_v21, %v10095_v61  ;;  %v5056_v1 = vmul.f32 %v7827_v29, %v5045_v60  ;;  %v5052_v44 = vmul.f32 %v7827_v29, %v10061_v63  ;;  %v7519_v63 = vld [vmem:[%s10670_s1 + $0x20] sm:$0xff] }
 0x682   :  { %v5011_v18 = vpop.permute.xlu1 %5010  ;;  %v7032_v17 = vpack.c.bf16 %v4676_v0, %v4672_v40  ;;  %v5009_v57 = vpop.permute.xlu0 %5008  ;;  %v7038_v39 = vpack.c.bf16 %v4679_v10, %v4675_v16  ;;  %v5054_v59 = vmul.f32 %v7822_v27, %v10091_v3  ;;  %v5278_v3 = vsel %vm115_vm7, %v9639_v28, %v9668_v8 }
 0x683   :  { %v7042_v20 = vpack.c.bf16 %v5057_v13, %v5053_v2  ;;  %v7050_v14 = vpack.c.bf16 %v5059_v43, %v5055_v62  ;;  %v7044_v60 = vpack.c.bf16 %v5056_v1, %v5052_v44  ;;  %v5287_v62 = vmul.f32 %v7752_v45, %v5278_v3 }
 0x684   :  { %7033 = vmatpush1.bf16.msra.mxu0 %v7032_v17  ;;  %7039 = vmatprep.subr.bf16.mxu1 %v7038_v39  ;;  %v7052_v10 = vpack.c.bf16 %v5058_v11, %v5054_v59  ;;  %v5279_v17 = vsel %vm115_vm7, %v9652_v58, %v9717_v54  ;;  %v7520_v58 = vld [vmem:[%s10670_s1 + $0x58] sm:$0xff]  ;;  %v5270_v11 = vsel %vm115_vm7, %v9641_v23, %v9681_v33 }
 0x685   :  { %7041 = vmatpush1.bf16.msra.mxu1 %v7040_v6  ;;  %7043 = vmatprep.subr.bf16.mxu0 %v7042_v20  ;;  %v5291_v6 = vmul.f32 %v7752_v45, %v5279_v17  ;;  %v5282_v44 = vsel %vm115_vm7, %v9681_v33, %v9639_v28 }
 0x686   :  { %v5019_v61 = vpop.permute.xlu1 %5018  ;;  %7051 = vmatprep.subr.bf16.mxu1 %v7050_v14  ;;  %v5017_v0 = vpop.permute.xlu0 %5016  ;;  %v10965_v14 = vld [vmem:[#allocation26_spill] sm:$0xff] }
 0x687   :  { %v5047_v7 = vsel %vm521_vm2, %v5011_v18, %v5019_v61  ;;  %v5046_v13 = vsel %vm521_vm2, %v5009_v57, %v5017_v0  ;;  %6834 = vmatmul.mubr.msk.f32.vlgmr.msra.gmra.mrb[16].mxu0 %vm2277_vm5, %v7519_v63  ;;  %v5275_v59 = vsel %vm115_vm7, %v9717_v54, %v10965_v14 }
 0x688   :  { %7045 = vmatpush1.bf16.msra.mxu0 %v7044_v60  ;;  %6836 = vmatmul.mubr.msk.f32.vlgmr.msra.gmra.mrb[16].mxu1 %vm2277_vm5, %v7519_v63  ;;  %v5064_v43 = vmul.f32 %v7827_v29, %v5047_v7  ;;  %v5060_v40 = vmul.f32 %v7827_v29, %v5046_v13  ;;  %v5290_v60 = vmul.f32 %v7758_v50, %v5283_v4 }
 0x689   :  { %7053 = vmatpush1.bf16.msra.mxu1 %v7052_v10  ;;  %4920 = vmatprep.mubr.f32.mxu0 %v10843_v5 }
 0x68a   :  { %v5027_v31 = vpop.permute.xlu1 %5026  ;;  %v5025_v2 = vpop.permute.xlu0 %5024  ;;  %4997 = vmatprep.mubr.f32.mxu1 %v10843_v5  ;;  %v7048_v10 = vpack.c.bf16 %v5064_v43, %v5060_v40  ;;  %v5286_v43 = vmul.f32 %v7758_v50, %v5282_v44 }
 0x68b   :  { %v5043_v16 = vsel %vm521_vm2, %v5019_v61, %v5027_v31  ;;  %v5042_v39 = vsel %vm521_vm2, %v5017_v0, %v5025_v2  ;;  %6835 = vmatmul.mubr.msk.f32.gmra.mrb[18].mxu0 %vm2277_vm5, %v7520_v58  ;;  %v5271_v61 = vsel %vm115_vm7, %v10965_v14, %v9727_v46 }
 0x68c   :  { %v5065_v1 = vmul.f32 %v7819_v22, %v5043_v16  ;;  %v5061_v20 = vmul.f32 %v7819_v22, %v5042_v39  ;;  %5140 = vmatprep.mubr.f32.mxu0 %v10843_v5  ;;  %6837 = vmatmul.mubr.msk.f32.gmra.mrb[18].mxu1 %vm2277_vm5, %v7520_v58  ;;  %v5293_v17 = vmul.f32 %v7761_v51, %v5271_v61  ;;  %v10969_v61 = vld [vmem:[#allocation40_spill] sm:$0xff] }
 0x68d   :  { %5217 = vmatprep.mubr.f32.mxu1 %v10843_v5  ;;  %v5274_v16 = vsel %vm115_vm7, %v9668_v8, %v9641_v23  ;;  %v5292_v58 = vmul.f32 %v7764_v52, %v5275_v59  ;;  %v10967_v8 = vld [vmem:[#allocation53_spill] sm:$0xff] }
 0x68e   :  { %v5035_v0 = vpop.permute.xlu1 %5034  ;;  %v5033_v28 = vpop.permute.xlu0 %5032  ;;  %v7046_v13 = vpack.c.bf16 %v5065_v1, %v5061_v20  ;;  %v5288_v44 = vmul.f32 %v7764_v52, %v5274_v16 }
 0x68f   :  { %v5039_v7 = vsel %vm521_vm2, %v5027_v31, %v5035_v0  ;;  %v5051_v33 = vsel %vm521_vm2, %v5035_v0, %v5011_v18  ;;  %v5038_v46 = vsel %vm521_vm2, %v5025_v2, %v5033_v28  ;;  %v5050_v3 = vsel %vm521_vm2, %v5033_v28, %v5009_v57  ;;  %v10971_v0 = vld [vmem:[#allocation31_spill] sm:$0xff]  ;;  %v10974_v28 = vld [vmem:[#allocation25_spill] sm:$0xff] }
 0x690   :  { %v5066_v54 = vmul.f32 %v7822_v27, %v5039_v7  ;;  %v5067_v63 = vmul.f32 %v7814_v21, %v5051_v33  ;;  %v5062_v4 = vmul.f32 %v7822_v27, %v5038_v46  ;;  %v5063_v31 = vmul.f32 %v7814_v21, %v5050_v3  ;;  %7047 = vmatprep.subr.bf16.mxu0 %v7046_v13  ;;  %v10975_v13 = vld [vmem:[#allocation49_spill] sm:$0xff]  ;;  %v10977_v46 = vld [vmem:[#allocation39_spill] sm:$0xff]  ;;  %v10978_v3 = vld [vmem:[#allocation12_spill] sm:$0xff] }
 0x691   :  { %v7058_v18 = vpack.c.bf16 %v5291_v6, %v5287_v62  ;;  %7049 = vmatpush1.bf16.msra.mxu0 %v7048_v10  ;;  %v5289_v57 = vmul.f32 %v7761_v51, %v5270_v11  ;;  %v7060_v62 = vpack.c.bf16 %v5290_v60, %v5286_v43  ;;  %v10966_v6 = vld [vmem:[#allocation28_spill] sm:$0xff]  ;;  %v10968_v11 = vpack.c.bf16 %v9894_v26, %v10967_v8  ;;  %v10970_v60 = vld [vmem:[#allocation18_spill] sm:$0xff]  ;;  %v10983_v43 = vld [vmem:[#allocation21_spill] sm:$0xff] }
 0x692   :  { %v10334_v40 = vpop.permute.xlu1 %6352  ;;  %v7056_v2 = vpack.c.bf16 %v5066_v54, %v5062_v4  ;;  %v10341_v1 = vpop.permute.xlu0 %6346  ;;  %v7054_v39 = vpack.c.bf16 %v5067_v63, %v5063_v31  ;;  %v7068_v59 = vpack.c.bf16 %v5292_v58, %v5288_v44  ;;  %v5679_v10 = vsel %vm521_vm2, %v10971_v0, %v10970_v60  ;;  %v10981_v4 = vld [vmem:[#allocation29_spill] sm:$0xff]  ;;  %v10987_v58 = vld [vmem:[#allocation44_spill] sm:$0xff]  ;;  %v10990_v44 = vld [vmem:[#allocation34_spill] sm:$0xff] }
 0x693   :  { %7059 = vmatprep.subr.bf16.mxu0 %v7058_v18  ;;  %v7066_v20 = vpack.c.bf16 %v5293_v17, %v5289_v57  ;;  %v10972_v26 = vpack.c.bf16 %v9932_v53, %v9938_v34  ;;  %v10973_v33 = vpack.c.bf16 %v9935_v19, %v9941_v36  ;;  %v10976_v54 = vpack.c.bf16 %v10974_v28, %v10975_v13  ;;  %v10979_v34 = vld [vmem:[#allocation13_spill] sm:$0xff]  ;;  %v10980_v36 = vld [vmem:[#allocation35_spill] sm:$0xff]  ;;  %v10984_v57 = vld [vmem:[#allocation50_spill] sm:$0xff] }
 0x694   :  { %6838 = vmatmul.mubr.msk.f32.vlgmr.msra.gmra.mrb[16].mxu0 %vm2277_vm5, %v10966_v6  ;;  %7055 = vmatprep.subr.bf16.mxu1 %v7054_v39  ;;  %v5678_v17 = vsel %vm521_vm2, %v10978_v3, %v10977_v46  ;;  %v5683_v53 = vsel %vm521_vm2, %v10979_v34, %v10971_v0  ;;  %v5695_v19 = vmul.f32 %v7819_v22, %v5679_v10  ;;  %v10982_v31 = vld [vmem:[#allocation37_spill] sm:$0xff]  ;;  %v10996_v13 = vld [vmem:[#allocation10_spill] sm:$0xff] }
 0x695   :  { %7057 = vmatpush1.bf16.msra.mxu1 %v7056_v2  ;;  %7061 = vmatpush1.bf16.msra.mxu0 %v7060_v62  ;;  %v7078_v18 = vpack.c.bf16 %v10982_v31, %v10981_v4  ;;  %v5687_v16 = vsel %vm521_vm2, %v10983_v43, %v10979_v34  ;;  %v10985_v2 = vld [vmem:[#allocation51_spill] sm:$0xff]  ;;  %v10988_v62 = vld [vmem:[#allocation41_spill] sm:$0xff]  ;;  %v5682_v8 = vsel %vm521_vm2, %v10990_v44, %v10978_v3  ;;  %v10997_v3 = vld [vmem:[#allocation38_spill] sm:$0xff] }
 0x696   :  { %v10347_v23 = vpop.permute.xlu1 %6360  ;;  %7063 = vmatprep.subr.bf16.mxu0 %v10968_v11  ;;  %7067 = vmatprep.subr.bf16.mxu1 %v7066_v20  ;;  %v10352_v14 = vpop.permute.xlu0 %5944  ;;  %v10986_v39 = vpack.c.bf16 %v10984_v57, %v10985_v2  ;;  %v5691_v11 = vmul.f32 %v7819_v22, %v5678_v17  ;;  %v5694_v34 = vmul.f32 %v7827_v29, %v5683_v53  ;;  %v10998_v17 = vld [vmem:[#allocation36_spill] sm:$0xff]  ;;  %v10999_v57 = vld [vmem:[#allocation42_spill] sm:$0xff] }
 0x697   :  { %5146 = vmatprep.mubr.f32.mxu0 %v10843_v5  ;;  %v7086_v4 = vpack.c.bf16 %v10998_v17, %v10997_v3  ;;  %v5675_v31 = vsel %vm521_vm2, %v10970_v60, %v10983_v43  ;;  %v5690_v2 = vmul.f32 %v7827_v29, %v5682_v8  ;;  %v5674_v60 = vsel %vm521_vm2, %v10977_v46, %v10996_v13  ;;  %v11004_v8 = vld [vmem:[#allocation15_spill] sm:$0xff] }
 0x698   :  { %6839 = vmatmul.mubr.msk.f32.gmra.mrb[18].mxu0 %vm2277_vm5, %v10969_v61  ;;  %6840 = vmatmul.mubr.msk.f32.vlgmr.msra.gmra.mrb[16].mxu1 %vm2277_vm5, %v10966_v6  ;;  %v10989_v6 = vpack.c.bf16 %v10987_v58, %v10988_v62  ;;  %v7090_v53 = vpack.c.bf16 %v5695_v19, %v5691_v11  ;;  %v11001_v58 = vld [vmem:[#allocation43_spill] sm:$0xff]  ;;  %v5696_v19 = vmul.f32 %v7822_v27, %v5675_v31 }
 0x699   :  { %7065 = vmatpush1.bf16.msra.mxu0 %v10972_v26  ;;  %7069 = vmatpush1.bf16.msra.mxu1 %v7068_v59  ;;  %v10991_v59 = vld [vmem:[#allocation24_spill] sm:$0xff]  ;;  %v5973_v46 = vsel %vm115_vm7, %v10185_v12, %v10206_v56  ;;  %v11008_v31 = vpack.c.bf16 %v10177_v32, %v10174_v24  ;;  %v11010_v24 = vpack.c.bf16 %v9995_v49, %v10001_v42 }
 0x69a   :  { %v10366_v7 = vpop.permute.xlu1 %6368  ;;  %7071 = vmatprep.subr.bf16.mxu1 %v10973_v33  ;;  %7075 = vmatprep.subr.bf16.mxu0 %v10976_v54  ;;  %v10374_v63 = vpop.permute.xlu0 %5952  ;;  %v10994_v26 = vld [vmem:[#allocation16_spill] sm:$0xff]  ;;  %v10995_v33 = vld [vmem:[#allocation14_spill] sm:$0xff]  ;;  %v5686_v54 = vsel %vm521_vm2, %v10996_v13, %v10990_v44  ;;  %v11003_v44 = vld [vmem:[#allocation17_spill] sm:$0xff]  ;;  %v11011_v32 = vpack.c.bf16 %v10215_v55, %v10212_v30 }
 0x69b   :  { %5223 = vmatprep.mubr.f32.mxu1 %v10843_v5  ;;  %5374 = vmatprep.mubr.f32.mxu0 %v10843_v5  ;;  %v7080_v28 = vpack.c.bf16 %v10995_v33, %v10994_v26  ;;  %v5693_v43 = vmul.f32 %v7814_v21, %v5686_v54  ;;  %v7088_v11 = vpack.c.bf16 %v11004_v8, %v11003_v44 }
 0x69c   :  { %6841 = vmatmul.mubr.msk.f32.gmra.mrb[18].mxu1 %vm2277_vm5, %v10969_v61  ;;  %6842 = vmatmul.mubr.msk.f32.vlgmr.msra.gmra.mrb[16].mxu0 %vm2277_vm5, %v10980_v36  ;;  %v10992_v61 = vld [vmem:[#allocation46_spill] sm:$0xff]  ;;  %v11005_v33 = vpack.c.bf16 %v9966_v41, %v9972_v15  ;;  %v5982_v13 = vsel %vm115_vm7, %v10352_v14, %v10374_v63  ;;  %v5991_v15 = vmul.f32 %v7761_v51, %v10130_v35 }
 0x69d   :  { %7073 = vmatpush1.bf16.msra.mxu1 %v10986_v39  ;;  %7077 = vmatpush1.bf16.msra.mxu0 %v10989_v6  ;;  %v10993_v0 = vpack.c.bf16 %v10991_v59, %v10992_v61  ;;  %v11000_v39 = vld [vmem:[#allocation45_spill] sm:$0xff]  ;;  %v5692_v61 = vmul.f32 %v7822_v27, %v5674_v60  ;;  %v7521_v41 = vld [vmem:[%s10670_s1 + $0x60] sm:$0xff]  ;;  %v5997_v17 = vmul.f32 %v7752_v45, %v5982_v13  ;;  %v11022_v13 = vld [vmem:[#allocation23_spill] sm:$0xff] }
 0x69e   :  { %v10403_v20 = vpop.permute.xlu1 %6006  ;;  %7079 = vmatprep.subr.bf16.mxu0 %v7078_v18  ;;  %v10413_v10 = vpop.permute.xlu0 %5960  ;;  %5380 = vmatprep.mubr.f32.mxu0 %v10843_v5  ;;  %v5697_v18 = vmul.f32 %v7814_v21, %v5687_v16  ;;  %v11002_v62 = vpack.c.bf16 %v11000_v39, %v11001_v58 }
 0x69f   :  { %7083 = vmatprep.subr.bf16.mxu1 %v10993_v0  ;;  %5451 = vmatprep.mubr.f32.mxu1 %v10843_v5  ;;  %v7100_v56 = vpack.c.bf16 %v5696_v19, %v5692_v61 }
 0x6a0   :  { %6843 = vmatmul.mubr.msk.f32.gmra.mrb[18].mxu0 %vm2277_vm5, %v10999_v57  ;;  %6844 = vmatmul.mubr.msk.f32.vlgmr.msra.gmra.mrb[16].mxu1 %vm2277_vm5, %v10980_v36  ;;  %v7092_v36 = vpack.c.bf16 %v5694_v34, %v5690_v2  ;;  %v7098_v59 = vpack.c.bf16 %v5697_v18, %v5693_v43  ;;  %v11006_v34 = vpack.c.bf16 %v9963_v37, %v9969_v25  ;;  %v11009_v37 = vld [vmem:[#allocation30_spill] sm:$0xff] }
 0x6a1   :  { %7081 = vmatpush1.bf16.msra.mxu0 %v7080_v28  ;;  %7085 = vmatpush1.bf16.msra.mxu1 %v11002_v62  ;;  %v5995_v28 = vmul.f32 %v7761_v51, %v5973_v46  ;;  %v11018_v46 = vld [vmem:[#allocation20_spill] sm:$0xff] }
 0x6a2   :  { %v5947_v6 = vpop.permute.xlu1 %5946  ;;  %7087 = vmatprep.subr.bf16.mxu1 %v7086_v4  ;;  %7091 = vmatprep.subr.bf16.mxu0 %v7090_v53  ;;  %v5969_v16 = vpop.permute.xlu0 %5968  ;;  %v11007_v4 = vpack.c.bf16 %v9998_v47, %v10004_v38 }
 0x6a3   :  { %5457 = vmatprep.mubr.f32.mxu1 %v10843_v5  ;;  %5544 = vmatprep.mubr.f32.mxu0 %v10843_v5  ;;  %v7114_v35 = vpack.c.bf16 %v5995_v28, %v5991_v15  ;;  %v5974_v25 = vsel %vm115_vm7, %v10413_v10, %v5969_v16 }
 0x6a4   :  { %6845 = vmatmul.mubr.msk.f32.gmra.mrb[18].mxu1 %vm2277_vm5, %v10999_v57  ;;  %6846 = vmatmul.mubr.msk.f32.vlgmr.msra.gmra.mrb[16].mxu0 %vm2277_vm5, %v10163_v48  ;;  %v5999_v30 = vmul.f32 %v7761_v51, %v5974_v25 }
 0x6a5   :  { %7089 = vmatpush1.bf16.msra.mxu1 %v7088_v11  ;;  %7093 = vmatpush1.bf16.msra.mxu0 %v7092_v36  ;;  %v11017_v36 = vld [vmem:[#allocation47_spill] sm:$0xff] }
 0x6a6   :  { %v5955_v0 = vpop.permute.xlu1 %5954  ;;  %7095 = vmatprep.subr.bf16.mxu0 %v11005_v33  ;;  %7099 = vmatprep.subr.bf16.mxu1 %v7098_v59  ;;  %v10463_v12 = vpop.permute.xlu0 %6354  ;;  %v11019_v59 = vld [vmem:[#allocation33_spill] sm:$0xff] }
 0x6a7   :  { %v5983_v26 = vsel %vm115_vm7, %v5947_v6, %v5955_v0  ;;  %5550 = vmatprep.mubr.f32.mxu0 %v10843_v5  ;;  %5621 = vmatprep.mubr.f32.mxu1 %v10843_v5  ;;  %v7130_v61 = vpack.c.bf16 %v11019_v59, %v11018_v46 }
 0x6a8   :  { %v6001_v54 = vmul.f32 %v7752_v45, %v5983_v26  ;;  %6847 = vmatmul.mubr.msk.f32.gmra.mrb[18].mxu0 %vm2277_vm5, %v7521_v41  ;;  %6848 = vmatmul.mubr.msk.f32.vlgmr.msra.gmra.mrb[16].mxu1 %vm2277_vm5, %v10163_v48  ;;  %v5986_v45 = vsel %vm115_vm7, %v5969_v16, %v10352_v14  ;;  %v5978_v14 = vsel %vm115_vm7, %v10374_v63, %v10413_v10  ;;  %v11012_v10 = vld [vmem:[#allocation22_spill] sm:$0xff]  ;;  %v11016_v16 = vld [vmem:[#allocation11_spill] sm:$0xff]  ;;  %v11021_v26 = vld [vmem:[#allocation32_spill] sm:$0xff] }
 0x6a9   :  { %7097 = vmatpush1.bf16.msra.mxu0 %v11006_v34  ;;  %7101 = vmatpush1.bf16.msra.mxu1 %v7100_v56  ;;  %v5996_v42 = vmul.f32 %v7758_v50, %v5986_v45  ;;  %v7122_v19 = vpack.c.bf16 %v11017_v36, %v11016_v16  ;;  %v11025_v34 = vld [vmem:[#allocation19_spill] sm:$0xff] }
 0x6aa   :  { %v5963_v3 = vpop.permute.xlu1 %5962  ;;  %7103 = vmatprep.subr.bf16.mxu1 %v11007_v4  ;;  %7107 = vmatprep.subr.bf16.mxu0 %v11008_v31  ;;  %v10491_v48 = vpop.permute.xlu0 %6362  ;;  %v7110_v47 = vpack.c.bf16 %v6001_v54, %v5997_v17  ;;  %v11023_v54 = vld [vmem:[#allocation54_spill] sm:$0xff]  ;;  %v11027_v4 = vld [vmem:[#allocation7_spill] sm:$0xff] }
 0x6ab   :  { %5627 = vmatprep.mubr.f32.mxu1 %v10843_v5  ;;  %5778 = vmatprep.mubr.f32.mxu0 %v10843_v5  ;;  %v5979_v38 = vsel %vm115_vm7, %v5955_v0, %v5963_v3  ;;  %v6381_v8 = vsel %vm521_vm2, %v10463_v12, %v10491_v48  ;;  %v11020_v0 = vld [vmem:[#allocation27_spill] sm:$0xff]  ;;  %v6384_v31 = vsel %vm521_vm2, %v11027_v4, %v10334_v40 }
 0x6ac   :  { %6849 = vmatmul.mubr.msk.f32.gmra.mrb[18].mxu1 %vm2277_vm5, %v7521_v41  ;;  %6850 = vmatmul.mubr.msk.f32.vlgmr.msra.gmra.mrb[16].mxu0 %vm2277_vm5, %v11009_v37  ;;  %v6002_v63 = vmul.f32 %v7764_v52, %v5979_v38  ;;  %v7124_v33 = vpack.c.bf16 %v11021_v26, %v11020_v0  ;;  %v11024_v41 = vld [vmem:[#allocation5_spill] sm:$0xff]  ;;  %v6397_v25 = vmul.f32 %v7819_v22, %v6381_v8 }
 0x6ad   :  { %7105 = vmatpush1.bf16.msra.mxu1 %v11010_v24  ;;  %7109 = vmatpush1.bf16.msra.mxu0 %v11011_v32  ;;  %v7126_v15 = vpack.c.bf16 %v11024_v41, %v11023_v54  ;;  %v6385_v24 = vsel %vm521_vm2, %v10341_v1, %v10463_v12 }
 0x6ae   :  { %v5971_v18 = vpop.permute.xlu1 %5970  ;;  %7111 = vmatprep.subr.bf16.mxu0 %v7110_v47  ;;  %7115 = vmatprep.subr.bf16.mxu1 %v7114_v35  ;;  %v6371_v49 = vpop.permute.xlu0 %6370  ;;  %v6388_v35 = vsel %vm521_vm2, %v10366_v7, %v11027_v4  ;;  %v11029_v47 = vld [vmem:[#allocation6_spill] sm:$0xff] }
 0x6af   :  { %v5975_v57 = vsel %vm115_vm7, %v5963_v3, %v5971_v18  ;;  %v5987_v53 = vsel %vm115_vm7, %v5971_v18, %v5947_v6  ;;  %5784 = vmatprep.mubr.f32.mxu0 %v10843_v5  ;;  %5855 = vmatprep.mubr.f32.mxu1 %v10843_v5  ;;  %v11014_v6 = vld [vmem:[#allocation56_spill] sm:$0xff]  ;;  %v6389_v56 = vsel %vm521_vm2, %v6371_v49, %v10341_v1  ;;  %vm6620_vm7 = vcmask 15360  }
 0x6b0   :  { %v6000_v55 = vmul.f32 %v7758_v50, %v5987_v53  ;;  %v6003_v2 = vmul.f32 %v7761_v51, %v5975_v57  ;;  %6851 = vmatmul.mubr.msk.f32.gmra.mrb[18].mxu0 %vm2277_vm5, %v11012_v10  ;;  %6852 = vmatmul.mubr.msk.f32.vlgmr.msra.gmra.mrb[16].mxu1 %vm2277_vm5, %v11009_v37  ;;  %v5998_v50 = vmul.f32 %v7764_v52, %v5978_v14  ;;  %v11013_v51 = vld [vmem:[#allocation57_spill] sm:$0xff]  ;;  %v11026_v3 = vld [vmem:[#allocation48_spill] sm:$0xff]  ;;  %v11031_v14 = vld [vmem:[#allocation2_spill] sm:$0xff] }
 0x6b1   :  { %6076 = vmatprep.mubr.f32.mxu0 %v10843_v5  ;;  %v11015_v60 = vpack.c.bf16 %v11013_v51, %v11014_v6  ;;  %5861 = vmatprep.mubr.f32.mxu1 %v10843_v5  ;;  %v6380_v52 = vsel %vm521_vm2, %v10334_v40, %v10347_v23  ;;  %v7132_v17 = vpack.c.bf16 %v11026_v3, %v11025_v34  ;;  %v11028_v40 = vld [vmem:[#allocation4_spill] sm:$0xff] }
 0x6b2   :  { %v7112_v39 = vpack.c.bf16 %v6000_v55, %v5996_v42  ;;  %v10531_v58 = vpop.permute.xlu1 %6350  ;;  %v7118_v62 = vpack.c.bf16 %v6003_v2, %v5999_v30  ;;  %v10538_v43 = vpop.permute.xlu0 %6348  ;;  %v7120_v44 = vpack.c.bf16 %v6002_v63, %v5998_v50  ;;  %v6393_v45 = vmul.f32 %v7819_v22, %v6380_v52  ;;  %v11032_v63 = vld [vmem:[#allocation52_spill] sm:$0xff] }
 0x6b3   :  { %7117 = vmatpush1.bf16.msra.mxu1 %v11015_v60  ;;  %v6376_v37 = vsel %vm521_vm2, %v10347_v23, %v10366_v7  ;;  %v7134_v38 = vpack.c.bf16 %v11029_v47, %v11028_v40  ;;  %v6377_v32 = vsel %vm521_vm2, %v10491_v48, %v6371_v49  ;;  %v6399_v18 = vmul.f32 %v7814_v21, %v6389_v56  ;;  %v11030_v7 = vld [vmem:[#allocation3_spill] sm:$0xff] }
 0x6b4   :  { %7113 = vmatpush1.bf16.msra.mxu0 %v7112_v39  ;;  %7119 = vmatprep.subr.bf16.mxu1 %v7118_v62  ;;  %v7136_v57 = vpack.c.bf16 %v11031_v14, %v11030_v7  ;;  %v6392_v53 = vmul.f32 %v7827_v29, %v6384_v31  ;;  %v6395_v42 = vmul.f32 %v7814_v21, %v6388_v35  ;;  %v11035_v14 = vld [vmem:[#allocation8_spill] sm:$0xff] }
 0x6b5   :  { %7123 = vmatprep.subr.bf16.mxu0 %v7122_v19  ;;  %6853 = vmatmul.mubr.msk.f32.gmra.mrb[18].mxu1 %vm2277_vm5, %v11012_v10  ;;  %v7138_v49 = vpack.c.bf16 %v6397_v25, %v6393_v45  ;;  %v6394_v30 = vmul.f32 %v7822_v27, %v6376_v37  ;;  %v6396_v55 = vmul.f32 %v7827_v29, %v6385_v24  ;;  %v11033_v10 = vld [vmem:[#allocation55_spill] sm:$0xff] }
 0x6b6   :  { %v6359_v11 = vpop.permute.xlu1 %6358  ;;  %v6357_v28 = vpop.permute.xlu0 %6356  ;;  %6153 = vmatprep.mubr.f32.mxu1 %v10843_v5  ;;  %v6398_v2 = vmul.f32 %v7822_v27, %v6377_v32  ;;  %v11034_v39 = vpack.c.bf16 %v11032_v63, %v11033_v10  ;;  %v7146_v6 = vpack.c.bf16 %v6399_v18, %v6395_v42  ;;  %v11037_v42 = vld [vmem:[#allocation9_spill] sm:$0xff] }
 0x6b7   :  { %7121 = vmatpush1.bf16.msra.mxu1 %v7120_v44  ;;  %6854 = vmatmul.mubr.msk.f32.vlgmr.msra.gmra.mrb[16].mxu0 %vm2277_vm5, %v11022_v13  ;;  %v6387_v62 = vsel %vm521_vm2, %v10531_v58, %v6359_v11  ;;  %v6386_v50 = vsel %vm521_vm2, %v10538_v43, %v6357_v28 }
 0x6b8   :  { %7131 = vmatprep.subr.bf16.mxu1 %v7130_v61  ;;  %7125 = vmatpush1.bf16.msra.mxu0 %v7124_v33  ;;  %v6404_v46 = vmul.f32 %v7827_v29, %v6387_v62  ;;  %v6400_v59 = vmul.f32 %v7827_v29, %v6386_v50  ;;  %v6409_v29 = vld [vmem:[%s10670_s1 + $0x68] sm:$0xff] }
 0x6b9   :  { %6082 = vmatprep.mubr.f32.mxu0 %v10843_v5  ;;  %7127 = vmatprep.subr.bf16.mxu0 %v7126_v15 }
 0x6ba   :  { %6856 = vmatmul.mubr.msk.f32.vlgmr.msra.gmra.mrb[16].mxu1 %vm2277_vm5, %v11022_v13  ;;  %v6367_v23 = vpop.permute.xlu1 %6366 }
 0x6bb   :  { %7133 = vmatpush1.bf16.msra.mxu1 %v7132_v17  ;;  %v6365_v1 = vpop.permute.xlu0 %6364  ;;  %6855 = vmatmul.mubr.msk.f32.gmra.mrb[18].mxu0 %vm2277_vm5, %v10403_v20  ;;  %v6383_v12 = vsel %vm521_vm2, %v6359_v11, %v6367_v23  ;;  %v7140_v11 = vpack.c.bf16 %v6396_v55, %v6392_v53  ;;  %v11036_v53 = vmov 2  }
 0x6bc   :  { %7135 = vmatprep.subr.bf16.mxu1 %v7134_v38  ;;  %v6382_v48 = vsel %vm521_vm2, %v6357_v28, %v6365_v1  ;;  %6159 = vmatprep.mubr.f32.mxu1 %v10843_v5  ;;  %v6405_v60 = vmul.f32 %v7819_v22, %v6383_v12  ;;  %v7538_v28 = vmov 3  }
 0x6bd   :  { %7129 = vmatpush1.bf16.msra.mxu0 %v11034_v39  ;;  %6246 = vmatprep.mubr.f32.mxu0 %v10843_v5  ;;  %v6401_v16 = vmul.f32 %v7819_v22, %v6382_v48 }
 0x6be   :  { %6857 = vmatmul.mubr.msk.f32.gmra.mrb[18].mxu1 %vm2277_vm5, %v10403_v20  ;;  %7139 = vmatprep.subr.bf16.mxu0 %v7138_v49  ;;  %v6375_v51 = vpop.permute.xlu1 %6374 }
 0x6bf   :  { %7137 = vmatpush1.bf16.msra.mxu1 %v7136_v57  ;;  %v6391_v36 = vsel %vm521_vm2, %v6375_v51, %v10531_v58  ;;  %v6373_v19 = vpop.permute.xlu0 %6372  ;;  %6323 = vmatprep.mubr.f32.mxu1 %v10843_v5  ;;  %v6379_v44 = vsel %vm521_vm2, %v6367_v23, %v6375_v51  ;;  %v7148_v58 = vpack.c.bf16 %v6398_v2, %v6394_v30  ;;  %v6609_v57 = vld [vmem:[%s10672_s3] sm:$0x1] }
 0x6c0   :  { %v6407_v20 = vmul.f32 %v7814_v21, %v6391_v36  ;;  %7147 = vmatprep.subr.bf16.mxu1 %v7146_v6  ;;  %v6378_v8 = vsel %vm521_vm2, %v6365_v1, %v6373_v19  ;;  %v6390_v22 = vsel %vm521_vm2, %v6373_v19, %v10538_v43  ;;  %v6406_v61 = vmul.f32 %v7822_v27, %v6379_v44 }
 0x6c1   :  { %v6403_v52 = vmul.f32 %v7814_v21, %v6390_v22  ;;  %v6402_v0 = vmul.f32 %v7822_v27, %v6378_v8  ;;  %v7142_v9 = vpack.c.bf16 %v6405_v60, %v6401_v16  ;;  %v7144_v43 = vpack.c.bf16 %v6404_v46, %v6400_v59  ;;  %v6408_v27 = vld [vmem:[%s10670_s1 + $0x30] sm:$0xff]  ;;  %7499 = vset.pattern.permute.xlu1 %v7538_v28 }
 0x6c2   :  { %7498 = vset.pattern.permute.xlu0 %v7538_v28  ;;  %v7539_v1 = vmov 4   ;;  %v6651_v12 = vmul.f32 1.442695, %v6609_v57  ;;  %v11038_v36 = vlaneseq }
 0x6c3   :  { %v6175_v26 = vpop.permute.xlu0 %6174  ;;  %v7150_v33 = vpack.c.bf16 %v6407_v20, %v6403_v52  ;;  %v7152_v56 = vpack.c.bf16 %v6406_v61, %v6402_v0 }
 0x6c4   :  { %6858 = vmatmul.mubr.msk.f32.vlgmr.msra.gmra.mrb[16].mxu0 %vm2277_vm5, %v6175_v26  ;;  %6860 = vmatmul.mubr.msk.f32.vlgmr.msra.gmra.mrb[16].mxu1 %vm2277_vm5, %v6175_v26  ;;  %v6177_v21 = vpop.permute.xlu1 %6176  ;;  %7504 = vpow2.f32 %v6651_v12  ;;  %v6636_v19 = vshrl.u32 %v11038_v36, 7 }
 0x6c5   :  { %7141 = vmatpush1.bf16.msra.mxu0 %v7140_v11  ;;  %7149 = vmatpush1.bf16.msra.mxu1 %v7148_v58 }
 0x6c6   :  { %7143 = vmatprep.subr.bf16.mxu0 %v7142_v9  ;;  %7151 = vmatprep.subr.bf16.mxu1 %v7150_v33  ;;  %v6637_v8 = vsub.s32 0, %v6636_v19 }
 0x6c7   :  { %6252 = vmatprep.mubr.f32.mxu0 %v10843_v5  ;;  %6329 = vmatprep.mubr.f32.mxu1 %v10843_v5 }
 0x6c8   :  { %6859 = vmatmul.mubr.msk.f32.gmra.mrb[18].mxu0 %vm2277_vm5, %v6177_v21  ;;  %6861 = vmatmul.mubr.msk.f32.gmra.mrb[18].mxu1 %vm2277_vm5, %v6177_v21 }
 0x6c9   :  { %7145 = vmatpush1.bf16.msra.mxu0 %v7144_v43  ;;  %7153 = vmatpush1.bf16.msra.mxu1 %v7152_v56 }
 0x6ca   :  { %6480 = vmatprep.mubr.f32.mxu0 %v10843_v5  ;;  %6557 = vmatprep.mubr.f32.mxu1 %v10843_v5 }
 0x6cc   :  { %6862 = vmatmul.mubr.msk.f32.vlgmr.msra.gmra.mrb[16].mxu0 %vm2277_vm5, %v6408_v27  ;;  %6864 = vmatmul.mubr.msk.f32.vlgmr.msra.gmra.mrb[16].mxu1 %vm2277_vm5, %v6408_v27 }
 0x6cd   :  { %6486 = vmatprep.mubr.f32.mxu0 %v10843_v5  ;;  %6563 = vmatprep.mubr.f32.mxu1 %v10843_v5 }
 0x6ce   :  { %v7505_v48 = vpop.eup %7504 }
 0x6d0   :  { %6863 = vmatmul.mubr.msk.f32.gmra.mrb[18].mxu0 %vm2277_vm5, %v6409_v29  ;;  %6865 = vmatmul.mubr.msk.f32.gmra.mrb[18].mxu1 %vm2277_vm5, %v6409_v29 }
 0x6d4   :  { %v6580_v13 = vpop.permute.xlu0 %6579 }
 0x6d5   :  { %v6584_v31 = vpop.permute.xlu1 %6583 }
 0x79f   :  { %v6482_v54 = vpop.f32.mrb[16].mxu0  ;;  %v6559_v41 = vpop.f32.mrb[16].mxu1 }
 0x7a0   :  { %v6484_v15 = vpop.f32.mrb[17].mxu0  ;;  %v6586_v34 = vadd.f32 %v6580_v13, %v6482_v54  ;;  %v6561_v3 = vpop.f32.mrb[17].mxu1  ;;  %v6588_v17 = vadd.f32 %v6580_v13, %v6559_v41 }
 0x7a1   :  { %v6587_v4 = vadd.f32 %v6580_v13, %v6484_v15  ;;  %v6589_v5 = vadd.f32 %v6580_v13, %v6561_v3 }
 0x7a3   :  { %v6594_v35 = vmax.f32 %v6586_v34, %v6587_v4  ;;  %v6600_v25 = vmax.f32 %v6588_v17, %v6589_v5  ;;  %v6488_v45 = vpop.f32.mrb[18].mxu0  ;;  %v6565_v37 = vpop.f32.mrb[18].mxu1 }
 0x7a4   :  { %v6590_v40 = vadd.f32 %v6584_v31, %v6488_v45  ;;  %v6592_v47 = vadd.f32 %v6584_v31, %v6565_v37  ;;  %v6490_v38 = vpop.f32.mrb[19].mxu0  ;;  %v6567_v24 = vpop.f32.mrb[19].mxu1 }
 0x7a5   :  { %v6591_v32 = vadd.f32 %v6584_v31, %v6490_v38  ;;  %v6593_v18 = vadd.f32 %v6584_v31, %v6567_v24  ;;  %6601 = vmax.xlane.f32.xlu0 %v6600_v25  ;;  %6595 = vmax.xlane.f32.xlu1 %v6594_v35 }
 0x7a7   :  { %v6597_v23 = vmax.f32 %v6590_v40, %v6591_v32  ;;  %v6603_v7 = vmax.f32 %v6592_v47, %v6593_v18 }
 0x7a9   :  { %6598 = vmax.xlane.f32.xlu0 %v6597_v23 }
 0x7b6   :  { %6615 = vperm.xlu1 %7499, %v11035_v14  }
 0x7ba   :  { %7500 = vset.pattern.permute.xlu1 %v11036_v53 }
 0x7bb   :  { %6632 = vperm.xlu1 %7500, %v6609_v57  }
 0x7bf   :  { %6611 = vperm.xlu0 %7498, %v11037_v42   ;;  %7501 = vset.pattern.permute.xlu1 %v7538_v28 }
 0x7c3   :  { %7503 = vset.pattern.permute.xlu0 %v7539_v1 }
 0x7df   :  { %6604 = vmax.xlane.f32.xlu1 %v6603_v7 }
 0x7f0   :  { %6642 = vperm.xlu1 %7501, %v6609_v57  }
 0x7f4   :  { %7502 = vset.pattern.permute.xlu1 %v7539_v1 }
 0x7f5   :  { %6655 = vperm.xlu1 %7502, %v7505_v48  }
 0x832   :  { %v6596_v49 = vpop.xlane.xlu1 %6595  ;;  %v6602_v30 = vpop.xlane.xlu0 %6601 }
 0x833   :  { %v6607_v39 = vsel %vm6606_vm4, %v6596_v49, %v6602_v30 }
 0x836   :  { %v6616_v55 = vpop.permute.xlu1 %6615  ;;  %v6599_v2 = vpop.xlane.xlu0 %6598 }
 0x83a   :  { %v6633_v63 = vpop.permute.xlu1 %6632 }
 0x83b   :  { %v6638_v11 = vrot.slane %v6633_v63, %v6637_v8 }
 0x83d   :  { %v6639_v61 = vmul.f32 %v6638_v11, %v6609_v57 }
 0x83e   :  { %v6612_v10 = vpop.permute.xlu0 %6611 }
 0x83f   :  { %v6618_v62 = vmul.f32 %v6612_v10, %v6607_v39 }
 0x841   :  { %v6621_v60 = vsel %vm6620_vm7, %v6618_v62, 0.0 }
 0x86c   :  { %v6605_v50 = vpop.xlane.xlu1 %6604 }
 0x86d   :  { %v6608_v51 = vsel %vm6606_vm4, %v6599_v2, %v6605_v50 }
 0x86e   :  { %v6619_v6 = vmul.f32 %v6616_v55, %v6608_v51 }
 0x870   :  { %v6622_v16 = vsel %vm6620_vm7, %v6619_v6, 0.0  ;;  %v6643_v46 = vpop.permute.xlu1 %6642 }
 0x871   :  { %v6623_v44 = vadd.f32 %v6622_v16, %v6621_v60  ;;  %v6648_v26 = vrot.slane %v6643_v46, %v6637_v8 }
 0x873   :  { %v6624_v20 = vrot.slane %v6623_v44, 4 }
 0x874   :  { %v6656_v21 = vpop.permute.xlu1 %6655 }
 0x875   :  { %v6625_v22 = vadd.f32 %v6624_v20, %v6623_v44  ;;  %v6661_v43 = vrot.slane %v6656_v21, %v6637_v8 }
 0x877   :  { %v6626_v52 = vrot.slane %v6625_v22, 2 }
 0x879   :  { %v6627_v58 = vadd.f32 %v6626_v52, %v6625_v22 }
 0x87b   :  { %v6628_v59 = vrot.slane %v6627_v58, 1 }
 0x87d   :  { %v6629_v0 = vadd.f32 %v6628_v59, %v6627_v58 }
 0x87f   :  { %v6640_v33 = vadd.f32 %v6639_v61, %v6629_v0 }
 0x881   :  { %v6649_v9 = vadd.f32 %v6648_v26, %v6640_v33 }
 0x883   :  { %7506 = vtanh.f32 %v6649_v9 }
 0x88d   :  { %v7507_v56 = vpop.eup %7506 }
 0x88e   :  { %v6663_v27 = vsel %vm6662_vm8, %v7507_v56, %v6661_v43 }
 0x88f   :  { %6665 = vst.msk [vmem:[%s10673_s4] sm:$0x3] %vm6664_vm9, %v6663_v27 }

</bundles_post_ra>
